<compile_context>
chip_gen: v6e
topology: v6e:2x2x1
jax: 0.10.0
libtpu: 0.0.40
codegen_flags: <defaults>
</compile_context>

<pallas_src>
import jax
import jax.numpy as jnp
from jax.experimental import pallas as pl
from jax.experimental.pallas import tpu as pltpu

BOARD_SIZE = 15
S = BOARD_SIZE * BOARD_SIZE            # 225 spatial positions
C_OUT = 64
K_FLAT = C_OUT * S                     # 14400 flattened conv features
N_OUT = S                              # 225 policy logits
N_PAD = 256                            # padded to a lane multiple
TK = 3840                              # contraction tile (4 grid steps)
K_PAD = ((K_FLAT + TK - 1) // TK) * TK # 15360
NEG_INF = -1e30


# ---------------- Pallas kernels ----------------

def conv_relu_kernel(p_ref, w_ref, b_ref, o_ref):
    # p_ref: (B*225, 9) f32, w_ref: (9, 64) f32, b_ref: (1, 64) f32
    # o_ref: (B*225, 64) bf16  (bf16 so the fc stage reads bf16 activations)
    acc = jnp.dot(p_ref[...], w_ref[...], preferred_element_type=jnp.float32)
    o_ref[...] = jnp.maximum(acc + b_ref[...], 0.0).astype(o_ref.dtype)


def fc_softmax_kernel(x_ref, w_ref, b_ref, o_ref, acc_ref):
    # Grid axis 0 iterates over K (contraction) blocks of the fc layer.
    # x_ref: (B, TK) bf16, w_ref: (TK, 256) bf16, b_ref: (1, 256) f32
    # o_ref: (B, 256) f32, acc_ref: (B, 256) f32 VMEM accumulator
    k = pl.program_id(0)

    @pl.when(k == 0)
    def _():
        acc_ref[...] = jnp.zeros_like(acc_ref)

    acc_ref[...] += jnp.dot(x_ref[...], w_ref[...],
                            preferred_element_type=jnp.float32)

    @pl.when(k == pl.num_programs(0) - 1)
    def _():
        # bias is pre-padded with -1e30 on columns >= 225 so padded logits
        # vanish under softmax (exp -> 0).
        logits = acc_ref[...] + b_ref[...]
        m = jnp.max(logits, axis=-1, keepdims=True)
        e = jnp.exp(logits - m)
        denom = jnp.sum(e, axis=-1, keepdims=True)
        o_ref[...] = e / denom


# ---------------- JAX glue ----------------

def im2col(x):
    # x: (B, 1, 15, 15) NCHW -> (B*225, 9) 3x3 patches with zero padding=1.
    B = x.shape[0]
    xp = jnp.pad(x[:, 0], ((0, 0), (1, 1), (1, 1)))                  # (B, 17, 17)
    taps = [xp[:, dh:dh + BOARD_SIZE, dw:dw + BOARD_SIZE]
            for dh in range(3) for dw in range(3)]
    patches = jnp.stack(taps, axis=-1)                               # (B,15,15,9)
    return patches.reshape(B * S, 9)


def prepare_kernel_params(params):
    """One-time re-layout of PyTorch-style params into kernel layouts.

    Done OUTSIDE the jitted forward (perf review item #1): the fc weight
    transpose / column permutation / pad / bf16 cast happens once at init,
    not on every call.
    """
    conv_w, conv_b, fc_w, fc_b = params
    # conv: (64, 1, 3, 3) -> (9, 64), tap index dh*3 + dw
    wc = conv_w.reshape(C_OUT, 9).T.astype(jnp.float32)
    bc = conv_b.reshape(1, C_OUT).astype(jnp.float32)
    # fc: PyTorch weight (225, 14400) with column index c*225 + s.
    # The kernel's flat activation has index s*64 + c (free reshape of the conv
    # output), so permute the columns accordingly and transpose to (K, N).
    wf = fc_w.reshape(N_OUT, C_OUT, S).transpose(2, 1, 0).reshape(K_FLAT, N_OUT)
    wf = jnp.pad(wf, ((0, K_PAD - K_FLAT), (0, N_PAD - N_OUT)))
    wf = wf.astype(jnp.bfloat16)                # halve the dominant HBM read
    bf = jnp.full((N_PAD,), NEG_INF, jnp.float32).at[:N_OUT].set(
        fc_b.astype(jnp.float32)).reshape(1, N_PAD)
    return wc, bc, wf, bf


def policy_network_forward(x, kparams):
    wc, bc, wf, bf = kparams
    B = x.shape[0]

    # ---- conv(1->64, 3x3, pad=1) + ReLU as a single VMEM-resident matmul ----
    patches = im2col(x)                                              # (B*225, 9)
    conv_out = pl.pallas_call(
        conv_relu_kernel,
        out_shape=jax.ShapeDtypeStruct((B * S, C_OUT), jnp.bfloat16),
    )(patches, wc, bc)

    # ---- flatten: conv_out[(b*225+s), c] -> flat[b, s*64 + c] (free reshape;
    #      the matching column permutation is baked into wf at init) ----
    flat = conv_out.reshape(B, K_FLAT)
    x_pad = jnp.pad(flat, ((0, 0), (0, K_PAD - K_FLAT)))             # (B, 15360) bf16

    # ---- fc (14400 -> 225) + softmax, tiled over the contraction dim ----
    probs_pad = pl.pallas_call(
        fc_softmax_kernel,
        out_shape=jax.ShapeDtypeStruct((B, N_PAD), jnp.float32),
        grid_spec=pltpu.PrefetchScalarGridSpec(
            num_scalar_prefetch=0,
            grid=(K_PAD // TK,),                                     # 4 steps
            in_specs=[
                pl.BlockSpec((B, TK), lambda k: (0, k)),
                pl.BlockSpec((TK, N_PAD), lambda k: (k, 0)),
                pl.BlockSpec((1, N_PAD), lambda k: (0, 0)),
            ],
            out_specs=pl.BlockSpec((B, N_PAD), lambda k: (0, 0)),
            scratch_shapes=[pltpu.VMEM((B, N_PAD), jnp.float32)],
        ),
        compiler_params=pltpu.CompilerParams(
            dimension_semantics=("arbitrary",)),
    )(x_pad, wf, bf)
    return probs_pad[:, :N_OUT]


# ---------------- deterministic parameter init (PyTorch-style uniform) ----------------

def init_params(key):
    ks = jax.random.split(key, 4)

    def u(k, shape, fan_in):
        bound = 1.0 / (fan_in ** 0.5)
        return jax.random.uniform(k, shape, jnp.float32, -bound, bound)

    conv_w = u(ks[0], (C_OUT, 1, 3, 3), 9)
    conv_b = u(ks[1], (C_OUT,), 9)
    fc_w = u(ks[2], (N_OUT, K_FLAT), K_FLAT)
    fc_b = u(ks[3], (N_OUT,), K_FLAT)
    return conv_w, conv_b, fc_w, fc_b


def reference_forward(x, params):
    # Pure-JAX reference with PyTorch semantics (NCHW conv + NCHW flatten).
    conv_w, conv_b, fc_w, fc_b = params
    B = x.shape[0]
    hi = jax.lax.Precision.HIGHEST
    conv = jax.lax.conv_general_dilated(
        x, conv_w, window_strides=(1, 1), padding="SAME",
        dimension_numbers=("NCHW", "OIHW", "NCHW"), precision=hi)
    conv = jnp.maximum(conv + conv_b.reshape(1, C_OUT, 1, 1), 0.0)
    flat = conv.reshape(B, K_FLAT)                # x.view(-1, 64*15*15)
    logits = jnp.dot(flat, fc_w.T, precision=hi) + fc_b
    return jax.nn.softmax(logits, axis=1)


if __name__ == "__main__":
    key = jax.random.PRNGKey(0)
    pkey, xkey = jax.random.split(key)
    params = init_params(pkey)
    # One-time weight re-layout (outside the jitted forward).
    kparams = jax.block_until_ready(prepare_kernel_params(params))

    x = jax.random.normal(xkey, (2, 1, BOARD_SIZE, BOARD_SIZE), jnp.float32)

    fwd = jax.jit(policy_network_forward)
    out = jax.block_until_ready(fwd(x, kparams))

    ref = reference_forward(x, params)
    assert out.shape == (2, N_OUT), out.shape
    assert jnp.allclose(jnp.sum(out, axis=1), 1.0, atol=1e-3), jnp.sum(out, axis=1)
    assert jnp.allclose(out, ref, atol=5e-3, rtol=5e-3), (out, ref)
    print("KERNEL_OK")
</pallas_src>

<mosaic_0001>
module attributes {stable_mosaic.version = 11 : i64} {
  func.func @conv_relu_kernel(%arg0: memref<450x9xf32, #tpu.memory_space<vmem>>, %arg1: memref<9x64xf32, #tpu.memory_space<vmem>>, %arg2: memref<1x64xf32, #tpu.memory_space<vmem>>, %arg3: memref<450x64xbf16, #tpu.memory_space<vmem>>) attributes {dimension_semantics = [], scalar_prefetch = 0 : i64, scratch_operands = 0 : i64, tpu.core_type = #tpu.core_type<tc>} {
    %c0 = arith.constant 0 : index
    %c0_0 = arith.constant 0 : index
    %0 = vector.load %arg0[%c0, %c0_0] : memref<450x9xf32, #tpu.memory_space<vmem>>, vector<450x9xf32>
    %c0_1 = arith.constant 0 : index
    %c0_2 = arith.constant 0 : index
    %1 = vector.load %arg1[%c0_1, %c0_2] : memref<9x64xf32, #tpu.memory_space<vmem>>, vector<9x64xf32>
    %cst = arith.constant dense<0.000000e+00> : vector<450x64xf32>
    %2 = tpu.matmul %0, %1, %cst {dimension_numbers = #tpu.dot_dimension_numbers<[1], [0], [0], [1], [0, 0, 1, 1], [], []>} : vector<450x9xf32>, vector<9x64xf32>, vector<450x64xf32> -> vector<450x64xf32>
    %c0_3 = arith.constant 0 : index
    %c0_4 = arith.constant 0 : index
    %3 = vector.load %arg2[%c0_3, %c0_4] : memref<1x64xf32, #tpu.memory_space<vmem>>, vector<1x64xf32>
    %4 = vector.broadcast %3 : vector<1x64xf32> to vector<450x64xf32>
    %5 = arith.addf %2, %4 : vector<450x64xf32>
    %cst_5 = arith.constant 0.000000e+00 : f32
    %6 = vector.broadcast %cst_5 : f32 to vector<450x64xf32>
    %7 = arith.maximumf %5, %6 : vector<450x64xf32>
    %8 = arith.truncf %7 : vector<450x64xf32> to vector<450x64xbf16>
    %c0_6 = arith.constant 0 : index
    %c0_7 = arith.constant 0 : index
    %9 = vector.load %arg3[%c0_6, %c0_7] : memref<450x64xbf16, #tpu.memory_space<vmem>>, vector<450x64xbf16>
    tpu.vector_store %arg3[%c0_6, %c0_7], %8 {strides = array<i32>} : memref<450x64xbf16, #tpu.memory_space<vmem>>, vector<450x64xbf16>,
    return
  }
}

module attributes {stable_mosaic.version = 11 : i64} {
  func.func @fc_softmax_kernel(%arg0: i32, %arg1: memref<2x3840xbf16, #tpu.memory_space<vmem>>, %arg2: memref<3840x256xbf16, #tpu.memory_space<vmem>>, %arg3: memref<1x256xf32, #tpu.memory_space<vmem>>, %arg4: memref<2x256xf32, #tpu.memory_space<vmem>>, %arg5: memref<2x256xf32, #tpu.memory_space<vmem>>) attributes {dimension_semantics = [#tpu.dimension_semantics<arbitrary>], iteration_bounds = array<i64: 4>, scalar_prefetch = 0 : i64, scratch_operands = 1 : i64, tpu.core_type = #tpu.core_type<tc>, window_params = [{transform_indices = @transform_0, window_bounds = array<i64: 2, 3840>}, {transform_indices = @transform_1, window_bounds = array<i64: 3840, 256>}, {pipeline_mode = #tpu.pipeline_mode<synchronous>, transform_indices = @transform_2, window_bounds = array<i64: 1, 256>}, {pipeline_mode = #tpu.pipeline_mode<synchronous>, transform_indices = @transform_3, window_bounds = array<i64: 2, 256>}]} {
    %c0_i32 = arith.constant 0 : i32
    %0 = arith.cmpi eq, %arg0, %c0_i32 : i32
    %1 = arith.extui %0 : i1 to i32
    %c0_i32_0 = arith.constant 0 : i32
    %2 = arith.cmpi ne, %1, %c0_i32_0 : i32
    scf.if %2 {
      %cst_9 = arith.constant 0.000000e+00 : f32
      %12 = vector.broadcast %cst_9 : f32 to vector<2x256xf32>
      %c0_10 = arith.constant 0 : index
      %c0_11 = arith.constant 0 : index
      %13 = vector.load %arg5[%c0_10, %c0_11] : memref<2x256xf32, #tpu.memory_space<vmem>>, vector<2x256xf32>
      tpu.vector_store %arg5[%c0_10, %c0_11], %12 {strides = array<i32>} : memref<2x256xf32, #tpu.memory_space<vmem>>, vector<2x256xf32>,
    } else {
    }
    %c0 = arith.constant 0 : index
    %c0_1 = arith.constant 0 : index
    %3 = vector.load %arg5[%c0, %c0_1] : memref<2x256xf32, #tpu.memory_space<vmem>>, vector<2x256xf32>
    %c0_2 = arith.constant 0 : index
    %c0_3 = arith.constant 0 : index
    %4 = vector.load %arg1[%c0_2, %c0_3] : memref<2x3840xbf16, #tpu.memory_space<vmem>>, vector<2x3840xbf16>
    %c0_4 = arith.constant 0 : index
    %c0_5 = arith.constant 0 : index
    %5 = vector.load %arg2[%c0_4, %c0_5] : memref<3840x256xbf16, #tpu.memory_space<vmem>>, vector<3840x256xbf16>
    %cst = arith.constant dense<0.000000e+00> : vector<2x256xf32>
    %6 = tpu.matmul %4, %5, %cst {dimension_numbers = #tpu.dot_dimension_numbers<[1], [0], [0], [1], [0, 0, 1, 1], [], []>} : vector<2x3840xbf16>, vector<3840x256xbf16>, vector<2x256xf32> -> vector<2x256xf32>
    %7 = arith.addf %3, %6 : vector<2x256xf32>
    %c0_6 = arith.constant 0 : index
    %c0_7 = arith.constant 0 : index
    %8 = vector.load %arg5[%c0_6, %c0_7] : memref<2x256xf32, #tpu.memory_space<vmem>>, vector<2x256xf32>
    tpu.vector_store %arg5[%c0_6, %c0_7], %7 {strides = array<i32>} : memref<2x256xf32, #tpu.memory_space<vmem>>, vector<2x256xf32>,
    %c3_i32 = arith.constant 3 : i32
    %9 = arith.cmpi eq, %arg0, %c3_i32 : i32
    %10 = arith.extui %9 : i1 to i32
    %c0_i32_8 = arith.constant 0 : i32
    %11 = arith.cmpi ne, %10, %c0_i32_8 : i32
    scf.if %11 {
      %c0_9 = arith.constant 0 : index
      %c0_10 = arith.constant 0 : index
      %12 = vector.load %arg5[%c0_9, %c0_10] : memref<2x256xf32, #tpu.memory_space<vmem>>, vector<2x256xf32>
      %c0_11 = arith.constant 0 : index
      %c0_12 = arith.constant 0 : index
      %13 = vector.load %arg3[%c0_11, %c0_12] : memref<1x256xf32, #tpu.memory_space<vmem>>, vector<1x256xf32>
      %14 = vector.broadcast %13 : vector<1x256xf32> to vector<2x256xf32>
      %15 = arith.addf %12, %14 : vector<2x256xf32>
      %cst_13 = arith.constant dense<0xFF800000> : vector<2xf32>
      %16 = vector.multi_reduction <maximumf>, %15, %cst_13 [1] : vector<2x256xf32> to vector<2xf32>
      %17 = vector.shape_cast %16 : vector<2xf32> to vector<2x1xf32>
      %18 = vector.broadcast %17 : vector<2x1xf32> to vector<2x256xf32>
      %19 = arith.subf %15, %18 : vector<2x256xf32>
      %20 = math.exp %19 : vector<2x256xf32>
      %cst_14 = arith.constant dense<0.000000e+00> : vector<2xf32>
      %21 = vector.multi_reduction <add>, %20, %cst_14 [1] : vector<2x256xf32> to vector<2xf32>
      %22 = vector.shape_cast %21 : vector<2xf32> to vector<2x1xf32>
      %23 = vector.broadcast %22 : vector<2x1xf32> to vector<2x256xf32>
      %24 = arith.divf %20, %23 : vector<2x256xf32>
      %c0_15 = arith.constant 0 : index
      %c0_16 = arith.constant 0 : index
      %25 = vector.load %arg4[%c0_15, %c0_16] : memref<2x256xf32, #tpu.memory_space<vmem>>, vector<2x256xf32>
      tpu.vector_store %arg4[%c0_15, %c0_16], %24 {strides = array<i32>} : memref<2x256xf32, #tpu.memory_space<vmem>>, vector<2x256xf32>,
    } else {
    }
    return
  }
  func.func @transform_0(%arg0: i32) -> (i32, i32) {
    %c0_i32 = arith.constant 0 : i32
    %c0_i32_0 = arith.constant 0 : i32
    return %c0_i32, %arg0 : i32, i32
  }
  func.func @transform_1(%arg0: i32) -> (i32, i32) {
    %c0_i32 = arith.constant 0 : i32
    %c0_i32_0 = arith.constant 0 : i32
    return %arg0, %c0_i32 : i32, i32
  }
  func.func @transform_2(%arg0: i32) -> (i32, i32) {
    %c0_i32 = arith.constant 0 : i32
    %c0_i32_0 = arith.constant 0 : i32
    %c0_i32_1 = arith.constant 0 : i32
    return %c0_i32, %c0_i32_0 : i32, i32
  }
  func.func @transform_3(%arg0: i32) -> (i32, i32) {
    %c0_i32 = arith.constant 0 : i32
    %c0_i32_0 = arith.constant 0 : i32
    %c0_i32_1 = arith.constant 0 : i32
    return %c0_i32, %c0_i32_0 : i32, i32
  }
}

</mosaic_0001>

<bundles_post_ra>
// kernel: policy_network_forward.2
= control target key start
LH: loop header
LB: loop body
LE: loop exit
PB: predicated region body
PF: predicated region fallthrough
CT: control target
= control target key end

     0   :  { %8 = vsyncpa [#allocation3], 0  ;;  %s2108_s0 = inlined_call_operand.vmem [shape: f32[450,9], index: 0, kind: input, shape index: {}]   ;;  %s2109_s1 = inlined_call_operand.hbm [shape: f32[9,64], index: 1, kind: input, shape index: {}]   ;;  %s2110_s2 = inlined_call_operand.hbm [shape: f32[1,64], index: 2, kind: input, shape index: {}]   ;;  %s2111_s3 = inlined_call_operand.vmem [shape: bf16[450,64], index: 3, kind: output, shape index: {}]  }
   0x1   :  { %9 = vsyncpa [#allocation5], 0  ;;  %s1444_s12 = smov [#allocation2]  }
   0x2   :  { %s17_s13 = sshll.u32 %s1444_s12, 4  ;;  %s18_s13 = int_to_ptr.vmem [resolvable:$true] %s17_s13 }
   0x3   :  { %s1408_s14 = scalar_lea.vmem %s18_s13, 256  ;;  %p1413_p1 = scmp.lt.s32.totalorder %s18_s13, %s18_s13 }
   0x4   :  { %p1409_p0 = scmp.ne.s32.totalorder %s18_s13, %s1408_s14  ;;  %p1414_p2 = scmp.lt.s32.totalorder %s1408_s14, %s1408_s14 }
   0x6   :  { %p1415_p3 = por %p1414_p2, %p1413_p1 }
   0x8   :  { %p1416_p4 = pnand %p1415_p3, %p1409_p0 }
   0xa   :  { %1419 = shalt.err (!%p1416_p4)
}
   0xb   :  { %s1445_s15 = smov 128   ;;  %s1446_s16 = smov 8  }
   0xc   :  { %23 = dma.hbm_to_vmem [thread:$0]  %s2109_s1, 256, %s18_s13, [#allocation3], %s1445_s15, %s1445_s15, %s1446_s16  }
   0xd   :  { %s1447_s19 = smov [#allocation4]  }
   0xe   :  { %s30_s20 = sshll.u32 %s1447_s19, 4  ;;  %s31_s20 = int_to_ptr.vmem [resolvable:$true] %s30_s20 }
   0xf   :  { %s1428_s21 = scalar_lea.vmem %s31_s20, 16  ;;  %s1432_s22 = scalar_lea.vmem %s31_s20, 32 }
  0x10   :  { %p1429_p5 = scmp.ne.s32.totalorder %s31_s20, %s1428_s21  ;;  %p1433_p6 = scmp.lt.s32.totalorder %s31_s20, %s31_s20 }
  0x11   :  { %p1434_p7 = scmp.lt.s32.totalorder %s1432_s22, %s1428_s21 }
  0x13   :  { %p1435_p8 = por %p1434_p7, %p1433_p6 }
  0x15   :  { %p1436_p9 = pnand %p1435_p8, %p1429_p5 }
  0x17   :  { %1439 = shalt.err (!%p1436_p9)
}
  0x18   :  { %33 = dma.hbm_to_vmem [thread:$0]  %s2110_s2, 16, %s31_s20, [#allocation5]  }
  0x19   :  { %1440 = dma.done.wait [#allocation3], 256  }
  0x1a   :  { %1441 = vsyncadd [#allocation3], 4294967040 }
  0x1b   :  { %1442 = dma.done.wait [#allocation5], 16  }
  0x1c   :  { %1443 = vsyncadd [#allocation5], 4294967280  ;;  %v1448_v0 = vmov 0.0   ;;  %vm1449_vm0 = vmmov 0   ;;  %vm278_vm1 = vcmask 1040384   ;;  %v97_v2 = vld [vmem:[#allocation2] sm:$0xff] }
  0x1d   :  { %1215 = vmatprep.subr.mxu0 %v1448_v0  ;;  %1390 = vmatprep.subr.mxu1 %v1448_v0  ;;  %v98_v1 = vld [vmem:[#allocation2 + $0x8] sm:$0x1]  ;;  %v40_v3 = vld [vmem:[%s2108_s0] sm:$0xff]  ;;  %vm106_vm2 = vcmask 72704   ;;  %v70_v6 = vld [vmem:[%s2108_s0 + $0xf0] sm:$0xff]  ;;  %vm918_vm3 = vcmask 519168  }
  0x1e   :  { %1219 = vmatprep.mubr.msk.f32.mxu0 %vm1449_vm0, %v1448_v0  ;;  %1306 = vmatprep.mubr.msk.f32.mxu1 %vm1449_vm0, %v1448_v0  ;;  %v69_v4 = vld [vmem:[%s2108_s0 + $0xe8] sm:$0xff]  ;;  %v42_v7 = vld [vmem:[%s2108_s0 + $0x10] sm:$0xff]  ;;  %v71_v8 = vld [vmem:[%s2108_s0 + $0xf8] sm:$0xff]  ;;  %vm975_vm4 = vcmask 516096  }
  0x1f   :  { %1216 = vmatpush3.msk.msra.mxu0 %vm278_vm1, %v98_v1  ;;  %1392 = vmatpush3.msk.msra.mxu1 %vm278_vm1, %v98_v1  ;;  %v41_v5 = vld [vmem:[%s2108_s0 + $0x8] sm:$0xff]  ;;  %v43_v9 = vld [vmem:[%s2108_s0 + $0x18] sm:$0xff]  ;;  %v72_v10 = vld [vmem:[%s2108_s0 + $0x100] sm:$0xff] }
  0x20   :  { %1217 = vmatprep.subr.mxu0 %v1448_v0  ;;  %1391 = vmatprep.subr.mxu1 %v1448_v0  ;;  %v44_v11 = vld [vmem:[%s2108_s0 + $0x20] sm:$0xff]  ;;  %v73_v12 = vld [vmem:[%s2108_s0 + $0x108] sm:$0xff]  ;;  %v74_v14 = vld [vmem:[%s2108_s0 + $0x110] sm:$0xff] }
  0x21   :  { %1218 = vmatpush3.msra.mxu0 %v97_v2  ;;  %1393 = vmatpush3.msra.mxu1 %v97_v2  ;;  %v45_v13 = vld [vmem:[%s2108_s0 + $0x28] sm:$0xff]  ;;  %v46_v15 = vld [vmem:[%s2108_s0 + $0x30] sm:$0xff]  ;;  %v75_v16 = vld [vmem:[%s2108_s0 + $0x118] sm:$0xff] }
  0x22   :  { %1220 = vmatmul.mubr.msk.f32.vlgmr.msra.gmra.mxu0 %vm106_vm2, %v40_v3  ;;  %1307 = vmatmul.mubr.msk.f32.vlgmr.msra.gmra.mxu1 %vm106_vm2, %v69_v4  ;;  %v47_v17 = vld [vmem:[%s2108_s0 + $0x38] sm:$0xff]  ;;  %v76_v18 = vld [vmem:[%s2108_s0 + $0x120] sm:$0xff]  ;;  %v77_v20 = vld [vmem:[%s2108_s0 + $0x128] sm:$0xff] }
  0x23   :  { %1222 = vmatprep.mubr.msk.f32.mxu0 %vm1449_vm0, %v1448_v0  ;;  %1309 = vmatprep.mubr.msk.f32.mxu1 %vm1449_vm0, %v1448_v0  ;;  %v48_v19 = vld [vmem:[%s2108_s0 + $0x40] sm:$0xff]  ;;  %v49_v21 = vld [vmem:[%s2108_s0 + $0x48] sm:$0xff]  ;;  %v78_v22 = vld [vmem:[%s2108_s0 + $0x130] sm:$0xff] }
  0x24   :  { %v50_v23 = vld [vmem:[%s2108_s0 + $0x50] sm:$0xff]  ;;  %v79_v24 = vld [vmem:[%s2108_s0 + $0x138] sm:$0xff]  ;;  %v80_v26 = vld [vmem:[%s2108_s0 + $0x140] sm:$0xff] }
  0x25   :  { %v51_v25 = vld [vmem:[%s2108_s0 + $0x58] sm:$0xff]  ;;  %v52_v27 = vld [vmem:[%s2108_s0 + $0x60] sm:$0xff]  ;;  %v81_v28 = vld [vmem:[%s2108_s0 + $0x148] sm:$0xff] }
  0x26   :  { %1223 = vmatmul.mubr.msk.f32.gmra.mxu0 %vm106_vm2, %v41_v5  ;;  %1310 = vmatmul.mubr.msk.f32.gmra.mxu1 %vm106_vm2, %v70_v6  ;;  %v53_v29 = vld [vmem:[%s2108_s0 + $0x68] sm:$0xff]  ;;  %v82_v30 = vld [vmem:[%s2108_s0 + $0x150] sm:$0xff]  ;;  %v83_v32 = vld [vmem:[%s2108_s0 + $0x158] sm:$0xff] }
  0x27   :  { %1225 = vmatprep.mubr.msk.f32.mxu0 %vm1449_vm0, %v1448_v0  ;;  %1312 = vmatprep.mubr.msk.f32.mxu1 %vm1449_vm0, %v1448_v0  ;;  %v54_v31 = vld [vmem:[%s2108_s0 + $0x70] sm:$0xff]  ;;  %v55_v33 = vld [vmem:[%s2108_s0 + $0x78] sm:$0xff]  ;;  %v84_v34 = vld [vmem:[%s2108_s0 + $0x160] sm:$0xff] }
  0x28   :  { %v56_v35 = vld [vmem:[%s2108_s0 + $0x80] sm:$0xff]  ;;  %v85_v36 = vld [vmem:[%s2108_s0 + $0x168] sm:$0xff]  ;;  %v86_v38 = vld [vmem:[%s2108_s0 + $0x170] sm:$0xff] }
  0x29   :  { %v57_v37 = vld [vmem:[%s2108_s0 + $0x88] sm:$0xff]  ;;  %v58_v39 = vld [vmem:[%s2108_s0 + $0x90] sm:$0xff]  ;;  %v87_v40 = vld [vmem:[%s2108_s0 + $0x178] sm:$0xff] }
  0x2a   :  { %1226 = vmatmul.mubr.msk.f32.gmra.mxu0 %vm106_vm2, %v42_v7  ;;  %1313 = vmatmul.mubr.msk.f32.gmra.mxu1 %vm106_vm2, %v71_v8  ;;  %v59_v41 = vld [vmem:[%s2108_s0 + $0x98] sm:$0xff]  ;;  %v88_v42 = vld [vmem:[%s2108_s0 + $0x180] sm:$0xff]  ;;  %v89_v44 = vld [vmem:[%s2108_s0 + $0x188] sm:$0xff] }
  0x2b   :  { %1228 = vmatprep.mubr.msk.f32.mxu0 %vm1449_vm0, %v1448_v0  ;;  %1315 = vmatprep.mubr.msk.f32.mxu1 %vm1449_vm0, %v1448_v0  ;;  %v60_v43 = vld [vmem:[%s2108_s0 + $0xa0] sm:$0xff]  ;;  %v61_v45 = vld [vmem:[%s2108_s0 + $0xa8] sm:$0xff]  ;;  %v90_v46 = vld [vmem:[%s2108_s0 + $0x190] sm:$0xff] }
  0x2c   :  { %v62_v47 = vld [vmem:[%s2108_s0 + $0xb0] sm:$0xff]  ;;  %v91_v48 = vld [vmem:[%s2108_s0 + $0x198] sm:$0xff]  ;;  %v92_v50 = vld [vmem:[%s2108_s0 + $0x1a0] sm:$0xff] }
  0x2d   :  { %v63_v49 = vld [vmem:[%s2108_s0 + $0xb8] sm:$0xff]  ;;  %v64_v51 = vld [vmem:[%s2108_s0 + $0xc0] sm:$0xff]  ;;  %v93_v52 = vld [vmem:[%s2108_s0 + $0x1a8] sm:$0xff] }
  0x2e   :  { %1229 = vmatmul.mubr.msk.f32.gmra.mxu0 %vm106_vm2, %v43_v9  ;;  %1316 = vmatmul.mubr.msk.f32.gmra.mxu1 %vm106_vm2, %v72_v10  ;;  %v65_v53 = vld [vmem:[%s2108_s0 + $0xc8] sm:$0xff]  ;;  %v94_v54 = vld [vmem:[%s2108_s0 + $0x1b0] sm:$0xff]  ;;  %v95_v56 = vld [vmem:[%s2108_s0 + $0x1b8] sm:$0xff] }
  0x2f   :  { %1231 = vmatprep.mubr.msk.f32.mxu0 %vm1449_vm0, %v1448_v0  ;;  %1318 = vmatprep.mubr.msk.f32.mxu1 %vm1449_vm0, %v1448_v0  ;;  %v66_v55 = vld [vmem:[%s2108_s0 + $0xd0] sm:$0xff]  ;;  %v67_v57 = vld [vmem:[%s2108_s0 + $0xd8] sm:$0xff]  ;;  %v96_v58 = vld [vmem:[%s2108_s0 + $0x1c0] sm:$0x3] }
  0x30   :  { %v68_v59 = vld [vmem:[%s2108_s0 + $0xe0] sm:$0xff]  ;;  %v1822_v60 = vld [vmem:[#allocation4] ss:$0 sm:$0xff] }
  0x32   :  { %1232 = vmatmul.mubr.msk.f32.gmra.mxu0 %vm106_vm2, %v44_v11  ;;  %1319 = vmatmul.mubr.msk.f32.gmra.mxu1 %vm106_vm2, %v73_v12 }
  0x33   :  { %1234 = vmatprep.mubr.msk.f32.mxu0 %vm1449_vm0, %v1448_v0  ;;  %1321 = vmatprep.mubr.msk.f32.mxu1 %vm1449_vm0, %v1448_v0 }
  0x36   :  { %1235 = vmatmul.mubr.msk.f32.gmra.mxu0 %vm106_vm2, %v45_v13  ;;  %1322 = vmatmul.mubr.msk.f32.gmra.mxu1 %vm106_vm2, %v74_v14 }
  0x37   :  { %1237 = vmatprep.mubr.msk.f32.mxu0 %vm1449_vm0, %v1448_v0  ;;  %1324 = vmatprep.mubr.msk.f32.mxu1 %vm1449_vm0, %v1448_v0 }
  0x3a   :  { %1238 = vmatmul.mubr.msk.f32.gmra.mxu0 %vm106_vm2, %v46_v15  ;;  %1325 = vmatmul.mubr.msk.f32.gmra.mxu1 %vm106_vm2, %v75_v16 }
  0x3b   :  { %1240 = vmatprep.mubr.msk.f32.mxu0 %vm1449_vm0, %v1448_v0  ;;  %1327 = vmatprep.mubr.msk.f32.mxu1 %vm1449_vm0, %v1448_v0 }
  0x3e   :  { %1241 = vmatmul.mubr.msk.f32.gmra.mxu0 %vm106_vm2, %v47_v17  ;;  %1328 = vmatmul.mubr.msk.f32.gmra.mxu1 %vm106_vm2, %v76_v18 }
  0x3f   :  { %1243 = vmatprep.mubr.msk.f32.mxu0 %vm1449_vm0, %v1448_v0  ;;  %1330 = vmatprep.mubr.msk.f32.mxu1 %vm1449_vm0, %v1448_v0 }
  0x42   :  { %1244 = vmatmul.mubr.msk.f32.gmra.mxu0 %vm106_vm2, %v48_v19  ;;  %1331 = vmatmul.mubr.msk.f32.gmra.mxu1 %vm106_vm2, %v77_v20 }
  0x43   :  { %1246 = vmatprep.mubr.msk.f32.mxu0 %vm1449_vm0, %v1448_v0  ;;  %1333 = vmatprep.mubr.msk.f32.mxu1 %vm1449_vm0, %v1448_v0 }
  0x46   :  { %1247 = vmatmul.mubr.msk.f32.gmra.mxu0 %vm106_vm2, %v49_v21  ;;  %1334 = vmatmul.mubr.msk.f32.gmra.mxu1 %vm106_vm2, %v78_v22 }
  0x47   :  { %1249 = vmatprep.mubr.msk.f32.mxu0 %vm1449_vm0, %v1448_v0  ;;  %1336 = vmatprep.mubr.msk.f32.mxu1 %vm1449_vm0, %v1448_v0 }
  0x4a   :  { %1250 = vmatmul.mubr.msk.f32.gmra.mxu0 %vm106_vm2, %v50_v23  ;;  %1337 = vmatmul.mubr.msk.f32.gmra.mxu1 %vm106_vm2, %v79_v24 }
  0x4b   :  { %1252 = vmatprep.mubr.msk.f32.mxu0 %vm1449_vm0, %v1448_v0  ;;  %1339 = vmatprep.mubr.msk.f32.mxu1 %vm1449_vm0, %v1448_v0 }
  0x4e   :  { %1253 = vmatmul.mubr.msk.f32.gmra.mxu0 %vm106_vm2, %v51_v25  ;;  %1340 = vmatmul.mubr.msk.f32.gmra.mxu1 %vm106_vm2, %v80_v26 }
  0x4f   :  { %1255 = vmatprep.mubr.msk.f32.mxu0 %vm1449_vm0, %v1448_v0  ;;  %1342 = vmatprep.mubr.msk.f32.mxu1 %vm1449_vm0, %v1448_v0 }
  0x52   :  { %1256 = vmatmul.mubr.msk.f32.gmra.mxu0 %vm106_vm2, %v52_v27  ;;  %1343 = vmatmul.mubr.msk.f32.gmra.mxu1 %vm106_vm2, %v81_v28 }
  0x53   :  { %1258 = vmatprep.mubr.msk.f32.mxu0 %vm1449_vm0, %v1448_v0  ;;  %1345 = vmatprep.mubr.msk.f32.mxu1 %vm1449_vm0, %v1448_v0 }
  0x56   :  { %1259 = vmatmul.mubr.msk.f32.gmra.mxu0 %vm106_vm2, %v53_v29  ;;  %1346 = vmatmul.mubr.msk.f32.gmra.mxu1 %vm106_vm2, %v82_v30 }
  0x57   :  { %1261 = vmatprep.mubr.msk.f32.mxu0 %vm1449_vm0, %v1448_v0  ;;  %1348 = vmatprep.mubr.msk.f32.mxu1 %vm1449_vm0, %v1448_v0 }
  0x5a   :  { %1262 = vmatmul.mubr.msk.f32.gmra.mxu0 %vm106_vm2, %v54_v31  ;;  %1349 = vmatmul.mubr.msk.f32.gmra.mxu1 %vm106_vm2, %v83_v32 }
  0x5b   :  { %1264 = vmatprep.mubr.msk.f32.mxu0 %vm1449_vm0, %v1448_v0  ;;  %1351 = vmatprep.mubr.msk.f32.mxu1 %vm1449_vm0, %v1448_v0 }
  0x5e   :  { %1265 = vmatmul.mubr.msk.f32.gmra.mxu0 %vm106_vm2, %v55_v33  ;;  %1352 = vmatmul.mubr.msk.f32.gmra.mxu1 %vm106_vm2, %v84_v34 }
  0x5f   :  { %1267 = vmatprep.mubr.msk.f32.mxu0 %vm1449_vm0, %v1448_v0  ;;  %1354 = vmatprep.mubr.msk.f32.mxu1 %vm1449_vm0, %v1448_v0 }
  0x62   :  { %1268 = vmatmul.mubr.msk.f32.gmra.mxu0 %vm106_vm2, %v56_v35  ;;  %1355 = vmatmul.mubr.msk.f32.gmra.mxu1 %vm106_vm2, %v85_v36 }
  0x63   :  { %1270 = vmatprep.mubr.msk.f32.mxu0 %vm1449_vm0, %v1448_v0  ;;  %1357 = vmatprep.mubr.msk.f32.mxu1 %vm1449_vm0, %v1448_v0 }
  0x66   :  { %1271 = vmatmul.mubr.msk.f32.gmra.mxu0 %vm106_vm2, %v57_v37  ;;  %1358 = vmatmul.mubr.msk.f32.gmra.mxu1 %vm106_vm2, %v86_v38 }
  0x67   :  { %1273 = vmatprep.mubr.msk.f32.mxu0 %vm1449_vm0, %v1448_v0  ;;  %1360 = vmatprep.mubr.msk.f32.mxu1 %vm1449_vm0, %v1448_v0 }
  0x6a   :  { %1274 = vmatmul.mubr.msk.f32.gmra.mxu0 %vm106_vm2, %v58_v39  ;;  %1361 = vmatmul.mubr.msk.f32.gmra.mxu1 %vm106_vm2, %v87_v40 }
  0x6b   :  { %1276 = vmatprep.mubr.msk.f32.mxu0 %vm1449_vm0, %v1448_v0  ;;  %1363 = vmatprep.mubr.msk.f32.mxu1 %vm1449_vm0, %v1448_v0 }
  0x6e   :  { %1277 = vmatmul.mubr.msk.f32.gmra.mxu0 %vm106_vm2, %v59_v41  ;;  %1364 = vmatmul.mubr.msk.f32.gmra.mxu1 %vm106_vm2, %v88_v42 }
  0x6f   :  { %1279 = vmatprep.mubr.msk.f32.mxu0 %vm1449_vm0, %v1448_v0  ;;  %1366 = vmatprep.mubr.msk.f32.mxu1 %vm1449_vm0, %v1448_v0 }
  0x72   :  { %1280 = vmatmul.mubr.msk.f32.gmra.mxu0 %vm106_vm2, %v60_v43  ;;  %1367 = vmatmul.mubr.msk.f32.gmra.mxu1 %vm106_vm2, %v89_v44 }
  0x73   :  { %1282 = vmatprep.mubr.msk.f32.mxu0 %vm1449_vm0, %v1448_v0  ;;  %1369 = vmatprep.mubr.msk.f32.mxu1 %vm1449_vm0, %v1448_v0 }
  0x76   :  { %1283 = vmatmul.mubr.msk.f32.gmra.mxu0 %vm106_vm2, %v61_v45  ;;  %1370 = vmatmul.mubr.msk.f32.gmra.mxu1 %vm106_vm2, %v90_v46 }
  0x77   :  { %1285 = vmatprep.mubr.msk.f32.mxu0 %vm1449_vm0, %v1448_v0  ;;  %1372 = vmatprep.mubr.msk.f32.mxu1 %vm1449_vm0, %v1448_v0 }
  0x7a   :  { %1286 = vmatmul.mubr.msk.f32.gmra.mxu0 %vm106_vm2, %v62_v47  ;;  %1373 = vmatmul.mubr.msk.f32.gmra.mxu1 %vm106_vm2, %v91_v48 }
  0x7b   :  { %1288 = vmatprep.mubr.msk.f32.mxu0 %vm1449_vm0, %v1448_v0  ;;  %1375 = vmatprep.mubr.msk.f32.mxu1 %vm1449_vm0, %v1448_v0 }
  0x7e   :  { %1289 = vmatmul.mubr.msk.f32.gmra.mxu0 %vm106_vm2, %v63_v49  ;;  %1376 = vmatmul.mubr.msk.f32.gmra.mxu1 %vm106_vm2, %v92_v50 }
  0x7f   :  { %1291 = vmatprep.mubr.msk.f32.mxu0 %vm1449_vm0, %v1448_v0  ;;  %1378 = vmatprep.mubr.msk.f32.mxu1 %vm1449_vm0, %v1448_v0 }
  0x82   :  { %1292 = vmatmul.mubr.msk.f32.gmra.mxu0 %vm106_vm2, %v64_v51  ;;  %1379 = vmatmul.mubr.msk.f32.gmra.mxu1 %vm106_vm2, %v93_v52 }
  0x83   :  { %1294 = vmatprep.mubr.msk.f32.mxu0 %vm1449_vm0, %v1448_v0  ;;  %1381 = vmatprep.mubr.msk.f32.mxu1 %vm1449_vm0, %v1448_v0 }
  0x86   :  { %1295 = vmatmul.mubr.msk.f32.gmra.mxu0 %vm106_vm2, %v65_v53  ;;  %1382 = vmatmul.mubr.msk.f32.gmra.mxu1 %vm106_vm2, %v94_v54 }
  0x87   :  { %1297 = vmatprep.mubr.msk.f32.mxu0 %vm1449_vm0, %v1448_v0  ;;  %1384 = vmatprep.mubr.msk.f32.mxu1 %vm1449_vm0, %v1448_v0 }
  0x8a   :  { %1298 = vmatmul.mubr.msk.f32.gmra.mxu0 %vm106_vm2, %v66_v55  ;;  %1385 = vmatmul.mubr.msk.f32.gmra.mxu1 %vm106_vm2, %v95_v56 }
  0x8b   :  { %1300 = vmatprep.mubr.msk.f32.mxu0 %vm1449_vm0, %v1448_v0  ;;  %1387 = vmatprep.mubr.msk.f32.mxu1 %vm1449_vm0, %v1448_v0 }
  0x8e   :  { %1301 = vmatmul.mubr.msk.f32.gmra.mxu0 %vm106_vm2, %v67_v57  ;;  %1388 = vmatmul.mubr.msk.f32.gmra.mxu1 %vm106_vm2, %v96_v58 }
  0x8f   :  { %1303 = vmatprep.mubr.msk.f32.mxu0 %vm1449_vm0, %v1448_v0 }
  0x92   :  { %1304 = vmatmul.mubr.msk.f32.gmra.mxu0 %vm106_vm2, %v68_v59 }
  0xe2   :  { %v348_v61 = vpop.f32.mrf.mxu0  ;;  %v493_v62 = vpop.f32.mrf.mxu1 }
  0xe3   :  { %v349_v63 = vadd.f32 %v1822_v60, %v348_v61  ;;  %v494_v1 = vadd.f32 %v1822_v60, %v493_v62 }
  0xe4   :  { %v1221_v2 = vpop.f32.mrf.mxu0  ;;  %v1308_v3 = vpop.f32.mrf.mxu1 }
  0xe5   :  { %v632_v4 = vmax.f32 %v349_v63, 0.0  ;;  %v661_v5 = vmax.f32 %v494_v1, 0.0 }
  0xe6   :  { %v353_v0 = vpop.f32.mrf.mxu0  ;;  %v498_v6 = vpop.f32.mrf.mxu1 }
  0xe7   :  { %v1099_v7 = vpack.c.bf16 %v632_v4, %v632_v4  ;;  %v1128_v8 = vpack.c.bf16 %v661_v5, %v661_v5  ;;  %v354_v9 = vadd.f32 %v1822_v60, %v353_v0  ;;  %v499_v10 = vadd.f32 %v1822_v60, %v498_v6 }
  0xe8   :  { %v1224_v11 = vpop.f32.mrf.mxu0  ;;  %v1311_v12 = vpop.f32.mrf.mxu1 }
  0xe9   :  { %919 = vst.msk [vmem:[%s2111_s3] sm:$0xf] %vm918_vm3, %v1099_v7  ;;  %948 = vst.msk [vmem:[%s2111_s3 + $0x74] sm:$0xf] %vm918_vm3, %v1128_v8  ;;  %v633_v13 = vmax.f32 %v354_v9, 0.0  ;;  %v662_v14 = vmax.f32 %v499_v10, 0.0 }
  0xea   :  { %v358_v15 = vpop.f32.mrf.mxu0  ;;  %v503_v16 = vpop.f32.mrf.mxu1 }
  0xeb   :  { %v1100_v17 = vpack.c.bf16 %v633_v13, %v633_v13  ;;  %v1129_v18 = vpack.c.bf16 %v662_v14, %v662_v14  ;;  %v359_v19 = vadd.f32 %v1822_v60, %v358_v15  ;;  %v504_v20 = vadd.f32 %v1822_v60, %v503_v16 }
  0xec   :  { %v1227_v21 = vpop.f32.mrf.mxu0  ;;  %v1314_v22 = vpop.f32.mrf.mxu1 }
  0xed   :  { %920 = vst.msk [vmem:[%s2111_s3 + $0x4] sm:$0xf] %vm918_vm3, %v1100_v17  ;;  %949 = vst.msk [vmem:[%s2111_s3 + $0x78] sm:$0xf] %vm918_vm3, %v1129_v18  ;;  %v634_v23 = vmax.f32 %v359_v19, 0.0  ;;  %v663_v24 = vmax.f32 %v504_v20, 0.0 }
  0xee   :  { %v363_v25 = vpop.f32.mrf.mxu0  ;;  %v508_v26 = vpop.f32.mrf.mxu1 }
  0xef   :  { %v1101_v27 = vpack.c.bf16 %v634_v23, %v634_v23  ;;  %v1130_v28 = vpack.c.bf16 %v663_v24, %v663_v24  ;;  %v364_v29 = vadd.f32 %v1822_v60, %v363_v25  ;;  %v509_v30 = vadd.f32 %v1822_v60, %v508_v26 }
  0xf0   :  { %v1230_v31 = vpop.f32.mrf.mxu0  ;;  %v1317_v32 = vpop.f32.mrf.mxu1 }
  0xf1   :  { %921 = vst.msk [vmem:[%s2111_s3 + $0x8] sm:$0xf] %vm918_vm3, %v1101_v27  ;;  %950 = vst.msk [vmem:[%s2111_s3 + $0x7c] sm:$0xf] %vm918_vm3, %v1130_v28  ;;  %v635_v33 = vmax.f32 %v364_v29, 0.0  ;;  %v664_v34 = vmax.f32 %v509_v30, 0.0 }
  0xf2   :  { %v368_v35 = vpop.f32.mrf.mxu0  ;;  %v513_v36 = vpop.f32.mrf.mxu1 }
  0xf3   :  { %v1102_v37 = vpack.c.bf16 %v635_v33, %v635_v33  ;;  %v1131_v38 = vpack.c.bf16 %v664_v34, %v664_v34  ;;  %v369_v39 = vadd.f32 %v1822_v60, %v368_v35  ;;  %v514_v40 = vadd.f32 %v1822_v60, %v513_v36 }
  0xf4   :  { %v1233_v41 = vpop.f32.mrf.mxu0  ;;  %v1320_v42 = vpop.f32.mrf.mxu1 }
  0xf5   :  { %922 = vst.msk [vmem:[%s2111_s3 + $0xc] sm:$0xf] %vm918_vm3, %v1102_v37  ;;  %951 = vst.msk [vmem:[%s2111_s3 + $0x80] sm:$0xf] %vm918_vm3, %v1131_v38  ;;  %v636_v43 = vmax.f32 %v369_v39, 0.0  ;;  %v665_v44 = vmax.f32 %v514_v40, 0.0 }
  0xf6   :  { %v373_v45 = vpop.f32.mrf.mxu0  ;;  %v518_v46 = vpop.f32.mrf.mxu1 }
  0xf7   :  { %v1103_v47 = vpack.c.bf16 %v636_v43, %v636_v43  ;;  %v1132_v48 = vpack.c.bf16 %v665_v44, %v665_v44  ;;  %v374_v49 = vadd.f32 %v1822_v60, %v373_v45  ;;  %v519_v50 = vadd.f32 %v1822_v60, %v518_v46 }
  0xf8   :  { %v1236_v51 = vpop.f32.mrf.mxu0  ;;  %v1323_v52 = vpop.f32.mrf.mxu1 }
  0xf9   :  { %923 = vst.msk [vmem:[%s2111_s3 + $0x10] sm:$0xf] %vm918_vm3, %v1103_v47  ;;  %952 = vst.msk [vmem:[%s2111_s3 + $0x84] sm:$0xf] %vm918_vm3, %v1132_v48  ;;  %v637_v53 = vmax.f32 %v374_v49, 0.0  ;;  %v666_v54 = vmax.f32 %v519_v50, 0.0 }
  0xfa   :  { %v378_v55 = vpop.f32.mrf.mxu0  ;;  %v523_v56 = vpop.f32.mrf.mxu1 }
  0xfb   :  { %v1104_v57 = vpack.c.bf16 %v637_v53, %v637_v53  ;;  %v1133_v58 = vpack.c.bf16 %v666_v54, %v666_v54  ;;  %v379_v59 = vadd.f32 %v1822_v60, %v378_v55  ;;  %v524_v61 = vadd.f32 %v1822_v60, %v523_v56 }
  0xfc   :  { %v1239_v62 = vpop.f32.mrf.mxu0  ;;  %v1326_v63 = vpop.f32.mrf.mxu1 }
  0xfd   :  { %924 = vst.msk [vmem:[%s2111_s3 + $0x14] sm:$0xf] %vm918_vm3, %v1104_v57  ;;  %953 = vst.msk [vmem:[%s2111_s3 + $0x88] sm:$0xf] %vm918_vm3, %v1133_v58  ;;  %v638_v1 = vmax.f32 %v379_v59, 0.0  ;;  %v667_v2 = vmax.f32 %v524_v61, 0.0 }
  0xfe   :  { %v383_v3 = vpop.f32.mrf.mxu0  ;;  %v528_v4 = vpop.f32.mrf.mxu1 }
  0xff   :  { %v1105_v5 = vpack.c.bf16 %v638_v1, %v638_v1  ;;  %v1134_v0 = vpack.c.bf16 %v667_v2, %v667_v2  ;;  %v384_v6 = vadd.f32 %v1822_v60, %v383_v3  ;;  %v529_v7 = vadd.f32 %v1822_v60, %v528_v4 }
 0x100   :  { %v1242_v8 = vpop.f32.mrf.mxu0  ;;  %v1329_v9 = vpop.f32.mrf.mxu1 }
 0x101   :  { %925 = vst.msk [vmem:[%s2111_s3 + $0x18] sm:$0xf] %vm918_vm3, %v1105_v5  ;;  %954 = vst.msk [vmem:[%s2111_s3 + $0x8c] sm:$0xf] %vm918_vm3, %v1134_v0  ;;  %v639_v10 = vmax.f32 %v384_v6, 0.0  ;;  %v668_v11 = vmax.f32 %v529_v7, 0.0 }
 0x102   :  { %v388_v12 = vpop.f32.mrf.mxu0  ;;  %v533_v13 = vpop.f32.mrf.mxu1 }
 0x103   :  { %v1106_v14 = vpack.c.bf16 %v639_v10, %v639_v10  ;;  %v1135_v15 = vpack.c.bf16 %v668_v11, %v668_v11  ;;  %v389_v16 = vadd.f32 %v1822_v60, %v388_v12  ;;  %v534_v17 = vadd.f32 %v1822_v60, %v533_v13 }
 0x104   :  { %v1245_v18 = vpop.f32.mrf.mxu0  ;;  %v1332_v19 = vpop.f32.mrf.mxu1 }
 0x105   :  { %926 = vst.msk [vmem:[%s2111_s3 + $0x1c] sm:$0xf] %vm918_vm3, %v1106_v14  ;;  %955 = vst.msk [vmem:[%s2111_s3 + $0x90] sm:$0xf] %vm918_vm3, %v1135_v15  ;;  %v640_v20 = vmax.f32 %v389_v16, 0.0  ;;  %v669_v21 = vmax.f32 %v534_v17, 0.0 }
 0x106   :  { %v393_v22 = vpop.f32.mrf.mxu0  ;;  %v538_v23 = vpop.f32.mrf.mxu1 }
 0x107   :  { %v1107_v24 = vpack.c.bf16 %v640_v20, %v640_v20  ;;  %v1136_v25 = vpack.c.bf16 %v669_v21, %v669_v21  ;;  %v394_v26 = vadd.f32 %v1822_v60, %v393_v22  ;;  %v539_v27 = vadd.f32 %v1822_v60, %v538_v23 }
 0x108   :  { %v1248_v28 = vpop.f32.mrf.mxu0  ;;  %v1335_v29 = vpop.f32.mrf.mxu1 }
 0x109   :  { %927 = vst.msk [vmem:[%s2111_s3 + $0x20] sm:$0xf] %vm918_vm3, %v1107_v24  ;;  %956 = vst.msk [vmem:[%s2111_s3 + $0x94] sm:$0xf] %vm918_vm3, %v1136_v25  ;;  %v641_v30 = vmax.f32 %v394_v26, 0.0  ;;  %v670_v31 = vmax.f32 %v539_v27, 0.0 }
 0x10a   :  { %v398_v32 = vpop.f32.mrf.mxu0  ;;  %v543_v33 = vpop.f32.mrf.mxu1 }
 0x10b   :  { %v1108_v34 = vpack.c.bf16 %v641_v30, %v641_v30  ;;  %v1137_v35 = vpack.c.bf16 %v670_v31, %v670_v31  ;;  %v399_v36 = vadd.f32 %v1822_v60, %v398_v32  ;;  %v544_v37 = vadd.f32 %v1822_v60, %v543_v33 }
 0x10c   :  { %v1251_v38 = vpop.f32.mrf.mxu0  ;;  %v1338_v39 = vpop.f32.mrf.mxu1 }
 0x10d   :  { %928 = vst.msk [vmem:[%s2111_s3 + $0x24] sm:$0xf] %vm918_vm3, %v1108_v34  ;;  %957 = vst.msk [vmem:[%s2111_s3 + $0x98] sm:$0xf] %vm918_vm3, %v1137_v35  ;;  %v642_v40 = vmax.f32 %v399_v36, 0.0  ;;  %v671_v41 = vmax.f32 %v544_v37, 0.0 }
 0x10e   :  { %v403_v42 = vpop.f32.mrf.mxu0  ;;  %v548_v43 = vpop.f32.mrf.mxu1 }
 0x10f   :  { %v1109_v44 = vpack.c.bf16 %v642_v40, %v642_v40  ;;  %v1138_v45 = vpack.c.bf16 %v671_v41, %v671_v41  ;;  %v404_v46 = vadd.f32 %v1822_v60, %v403_v42  ;;  %v549_v47 = vadd.f32 %v1822_v60, %v548_v43 }
 0x110   :  { %v1254_v48 = vpop.f32.mrf.mxu0  ;;  %v1341_v49 = vpop.f32.mrf.mxu1 }
 0x111   :  { %929 = vst.msk [vmem:[%s2111_s3 + $0x28] sm:$0xf] %vm918_vm3, %v1109_v44  ;;  %958 = vst.msk [vmem:[%s2111_s3 + $0x9c] sm:$0xf] %vm918_vm3, %v1138_v45  ;;  %v643_v50 = vmax.f32 %v404_v46, 0.0  ;;  %v672_v51 = vmax.f32 %v549_v47, 0.0 }
 0x112   :  { %v408_v52 = vpop.f32.mrf.mxu0  ;;  %v553_v53 = vpop.f32.mrf.mxu1 }
 0x113   :  { %v1110_v54 = vpack.c.bf16 %v643_v50, %v643_v50  ;;  %v1139_v55 = vpack.c.bf16 %v672_v51, %v672_v51  ;;  %v409_v56 = vadd.f32 %v1822_v60, %v408_v52  ;;  %v554_v57 = vadd.f32 %v1822_v60, %v553_v53 }
 0x114   :  { %v1257_v58 = vpop.f32.mrf.mxu0  ;;  %v1344_v59 = vpop.f32.mrf.mxu1 }
 0x115   :  { %930 = vst.msk [vmem:[%s2111_s3 + $0x2c] sm:$0xf] %vm918_vm3, %v1110_v54  ;;  %959 = vst.msk [vmem:[%s2111_s3 + $0xa0] sm:$0xf] %vm918_vm3, %v1139_v55  ;;  %v644_v61 = vmax.f32 %v409_v56, 0.0  ;;  %v673_v62 = vmax.f32 %v554_v57, 0.0 }
 0x116   :  { %v413_v63 = vpop.f32.mrf.mxu0  ;;  %v558_v1 = vpop.f32.mrf.mxu1 }
 0x117   :  { %v1111_v2 = vpack.c.bf16 %v644_v61, %v644_v61  ;;  %v1140_v3 = vpack.c.bf16 %v673_v62, %v673_v62  ;;  %v414_v4 = vadd.f32 %v1822_v60, %v413_v63  ;;  %v559_v5 = vadd.f32 %v1822_v60, %v558_v1 }
 0x118   :  { %v1260_v0 = vpop.f32.mrf.mxu0  ;;  %v1347_v6 = vpop.f32.mrf.mxu1 }
 0x119   :  { %931 = vst.msk [vmem:[%s2111_s3 + $0x30] sm:$0xf] %vm918_vm3, %v1111_v2  ;;  %960 = vst.msk [vmem:[%s2111_s3 + $0xa4] sm:$0xf] %vm918_vm3, %v1140_v3  ;;  %v645_v7 = vmax.f32 %v414_v4, 0.0  ;;  %v674_v8 = vmax.f32 %v559_v5, 0.0 }
 0x11a   :  { %v418_v9 = vpop.f32.mrf.mxu0  ;;  %v563_v10 = vpop.f32.mrf.mxu1 }
 0x11b   :  { %v1112_v11 = vpack.c.bf16 %v645_v7, %v645_v7  ;;  %v1141_v12 = vpack.c.bf16 %v674_v8, %v674_v8  ;;  %v419_v13 = vadd.f32 %v1822_v60, %v418_v9  ;;  %v564_v14 = vadd.f32 %v1822_v60, %v563_v10 }
 0x11c   :  { %v1263_v15 = vpop.f32.mrf.mxu0  ;;  %v1350_v16 = vpop.f32.mrf.mxu1 }
 0x11d   :  { %932 = vst.msk [vmem:[%s2111_s3 + $0x34] sm:$0xf] %vm918_vm3, %v1112_v11  ;;  %961 = vst.msk [vmem:[%s2111_s3 + $0xa8] sm:$0xf] %vm918_vm3, %v1141_v12  ;;  %v646_v17 = vmax.f32 %v419_v13, 0.0  ;;  %v675_v18 = vmax.f32 %v564_v14, 0.0 }
 0x11e   :  { %v423_v19 = vpop.f32.mrf.mxu0  ;;  %v568_v20 = vpop.f32.mrf.mxu1 }
 0x11f   :  { %v1113_v21 = vpack.c.bf16 %v646_v17, %v646_v17  ;;  %v1142_v22 = vpack.c.bf16 %v675_v18, %v675_v18  ;;  %v424_v23 = vadd.f32 %v1822_v60, %v423_v19  ;;  %v569_v24 = vadd.f32 %v1822_v60, %v568_v20 }
 0x120   :  { %v1266_v25 = vpop.f32.mrf.mxu0  ;;  %v1353_v26 = vpop.f32.mrf.mxu1 }
 0x121   :  { %933 = vst.msk [vmem:[%s2111_s3 + $0x38] sm:$0xf] %vm918_vm3, %v1113_v21  ;;  %962 = vst.msk [vmem:[%s2111_s3 + $0xac] sm:$0xf] %vm918_vm3, %v1142_v22  ;;  %v647_v27 = vmax.f32 %v424_v23, 0.0  ;;  %v676_v28 = vmax.f32 %v569_v24, 0.0 }
 0x122   :  { %v428_v29 = vpop.f32.mrf.mxu0  ;;  %v573_v30 = vpop.f32.mrf.mxu1 }
 0x123   :  { %v1114_v31 = vpack.c.bf16 %v647_v27, %v647_v27  ;;  %v1143_v32 = vpack.c.bf16 %v676_v28, %v676_v28  ;;  %v429_v33 = vadd.f32 %v1822_v60, %v428_v29  ;;  %v574_v34 = vadd.f32 %v1822_v60, %v573_v30 }
 0x124   :  { %v1269_v35 = vpop.f32.mrf.mxu0  ;;  %v1356_v36 = vpop.f32.mrf.mxu1 }
 0x125   :  { %934 = vst.msk [vmem:[%s2111_s3 + $0x3c] sm:$0xf] %vm918_vm3, %v1114_v31  ;;  %963 = vst.msk [vmem:[%s2111_s3 + $0xb0] sm:$0xf] %vm918_vm3, %v1143_v32  ;;  %v648_v37 = vmax.f32 %v429_v33, 0.0  ;;  %v677_v38 = vmax.f32 %v574_v34, 0.0 }
 0x126   :  { %v433_v39 = vpop.f32.mrf.mxu0  ;;  %v578_v40 = vpop.f32.mrf.mxu1 }
 0x127   :  { %v1115_v41 = vpack.c.bf16 %v648_v37, %v648_v37  ;;  %v1144_v42 = vpack.c.bf16 %v677_v38, %v677_v38  ;;  %v434_v43 = vadd.f32 %v1822_v60, %v433_v39  ;;  %v579_v44 = vadd.f32 %v1822_v60, %v578_v40 }
 0x128   :  { %v1272_v45 = vpop.f32.mrf.mxu0  ;;  %v1359_v46 = vpop.f32.mrf.mxu1 }
 0x129   :  { %935 = vst.msk [vmem:[%s2111_s3 + $0x40] sm:$0xf] %vm918_vm3, %v1115_v41  ;;  %964 = vst.msk [vmem:[%s2111_s3 + $0xb4] sm:$0xf] %vm918_vm3, %v1144_v42  ;;  %v649_v47 = vmax.f32 %v434_v43, 0.0  ;;  %v678_v48 = vmax.f32 %v579_v44, 0.0 }
 0x12a   :  { %v438_v49 = vpop.f32.mrf.mxu0  ;;  %v583_v50 = vpop.f32.mrf.mxu1 }
 0x12b   :  { %v1116_v51 = vpack.c.bf16 %v649_v47, %v649_v47  ;;  %v1145_v52 = vpack.c.bf16 %v678_v48, %v678_v48  ;;  %v439_v53 = vadd.f32 %v1822_v60, %v438_v49  ;;  %v584_v54 = vadd.f32 %v1822_v60, %v583_v50 }
 0x12c   :  { %v1275_v55 = vpop.f32.mrf.mxu0  ;;  %v1362_v56 = vpop.f32.mrf.mxu1 }
 0x12d   :  { %936 = vst.msk [vmem:[%s2111_s3 + $0x44] sm:$0xf] %vm918_vm3, %v1116_v51  ;;  %965 = vst.msk [vmem:[%s2111_s3 + $0xb8] sm:$0xf] %vm918_vm3, %v1145_v52  ;;  %v650_v57 = vmax.f32 %v439_v53, 0.0  ;;  %v679_v58 = vmax.f32 %v584_v54, 0.0 }
 0x12e   :  { %v443_v59 = vpop.f32.mrf.mxu0  ;;  %v588_v61 = vpop.f32.mrf.mxu1 }
 0x12f   :  { %v1117_v62 = vpack.c.bf16 %v650_v57, %v650_v57  ;;  %v1146_v63 = vpack.c.bf16 %v679_v58, %v679_v58  ;;  %v444_v1 = vadd.f32 %v1822_v60, %v443_v59  ;;  %v589_v2 = vadd.f32 %v1822_v60, %v588_v61 }
 0x130   :  { %v1278_v3 = vpop.f32.mrf.mxu0  ;;  %v1365_v4 = vpop.f32.mrf.mxu1 }
 0x131   :  { %937 = vst.msk [vmem:[%s2111_s3 + $0x48] sm:$0xf] %vm918_vm3, %v1117_v62  ;;  %966 = vst.msk [vmem:[%s2111_s3 + $0xbc] sm:$0xf] %vm918_vm3, %v1146_v63  ;;  %v651_v5 = vmax.f32 %v444_v1, 0.0  ;;  %v680_v0 = vmax.f32 %v589_v2, 0.0 }
 0x132   :  { %v448_v6 = vpop.f32.mrf.mxu0  ;;  %v593_v7 = vpop.f32.mrf.mxu1 }
 0x133   :  { %v1118_v8 = vpack.c.bf16 %v651_v5, %v651_v5  ;;  %v1147_v9 = vpack.c.bf16 %v680_v0, %v680_v0  ;;  %v449_v10 = vadd.f32 %v1822_v60, %v448_v6  ;;  %v594_v11 = vadd.f32 %v1822_v60, %v593_v7 }
 0x134   :  { %v1281_v12 = vpop.f32.mrf.mxu0  ;;  %v1368_v13 = vpop.f32.mrf.mxu1 }
 0x135   :  { %938 = vst.msk [vmem:[%s2111_s3 + $0x4c] sm:$0xf] %vm918_vm3, %v1118_v8  ;;  %967 = vst.msk [vmem:[%s2111_s3 + $0xc0] sm:$0xf] %vm918_vm3, %v1147_v9  ;;  %v652_v14 = vmax.f32 %v449_v10, 0.0  ;;  %v681_v15 = vmax.f32 %v594_v11, 0.0 }
 0x136   :  { %v453_v16 = vpop.f32.mrf.mxu0  ;;  %v598_v17 = vpop.f32.mrf.mxu1 }
 0x137   :  { %v1119_v18 = vpack.c.bf16 %v652_v14, %v652_v14  ;;  %v1148_v19 = vpack.c.bf16 %v681_v15, %v681_v15  ;;  %v454_v20 = vadd.f32 %v1822_v60, %v453_v16  ;;  %v599_v21 = vadd.f32 %v1822_v60, %v598_v17 }
 0x138   :  { %v1284_v22 = vpop.f32.mrf.mxu0  ;;  %v1371_v23 = vpop.f32.mrf.mxu1 }
 0x139   :  { %939 = vst.msk [vmem:[%s2111_s3 + $0x50] sm:$0xf] %vm918_vm3, %v1119_v18  ;;  %968 = vst.msk [vmem:[%s2111_s3 + $0xc4] sm:$0xf] %vm918_vm3, %v1148_v19  ;;  %v653_v24 = vmax.f32 %v454_v20, 0.0  ;;  %v682_v25 = vmax.f32 %v599_v21, 0.0 }
 0x13a   :  { %v458_v26 = vpop.f32.mrf.mxu0  ;;  %v603_v27 = vpop.f32.mrf.mxu1 }
 0x13b   :  { %v1120_v28 = vpack.c.bf16 %v653_v24, %v653_v24  ;;  %v1149_v29 = vpack.c.bf16 %v682_v25, %v682_v25  ;;  %v459_v30 = vadd.f32 %v1822_v60, %v458_v26  ;;  %v604_v31 = vadd.f32 %v1822_v60, %v603_v27 }
 0x13c   :  { %v1287_v32 = vpop.f32.mrf.mxu0  ;;  %v1374_v33 = vpop.f32.mrf.mxu1 }
 0x13d   :  { %940 = vst.msk [vmem:[%s2111_s3 + $0x54] sm:$0xf] %vm918_vm3, %v1120_v28  ;;  %969 = vst.msk [vmem:[%s2111_s3 + $0xc8] sm:$0xf] %vm918_vm3, %v1149_v29  ;;  %v654_v34 = vmax.f32 %v459_v30, 0.0  ;;  %v683_v35 = vmax.f32 %v604_v31, 0.0 }
 0x13e   :  { %v463_v36 = vpop.f32.mrf.mxu0  ;;  %v608_v37 = vpop.f32.mrf.mxu1 }
 0x13f   :  { %v1121_v38 = vpack.c.bf16 %v654_v34, %v654_v34  ;;  %v1150_v39 = vpack.c.bf16 %v683_v35, %v683_v35  ;;  %v464_v40 = vadd.f32 %v1822_v60, %v463_v36  ;;  %v609_v41 = vadd.f32 %v1822_v60, %v608_v37 }
 0x140   :  { %v1290_v42 = vpop.f32.mrf.mxu0  ;;  %v1377_v43 = vpop.f32.mrf.mxu1 }
 0x141   :  { %941 = vst.msk [vmem:[%s2111_s3 + $0x58] sm:$0xf] %vm918_vm3, %v1121_v38  ;;  %970 = vst.msk [vmem:[%s2111_s3 + $0xcc] sm:$0xf] %vm918_vm3, %v1150_v39  ;;  %v655_v44 = vmax.f32 %v464_v40, 0.0  ;;  %v684_v45 = vmax.f32 %v609_v41, 0.0 }
 0x142   :  { %v468_v46 = vpop.f32.mrf.mxu0  ;;  %v613_v47 = vpop.f32.mrf.mxu1 }
 0x143   :  { %v1122_v48 = vpack.c.bf16 %v655_v44, %v655_v44  ;;  %v1151_v49 = vpack.c.bf16 %v684_v45, %v684_v45  ;;  %v469_v50 = vadd.f32 %v1822_v60, %v468_v46  ;;  %v614_v51 = vadd.f32 %v1822_v60, %v613_v47 }
 0x144   :  { %v1293_v52 = vpop.f32.mrf.mxu0  ;;  %v1380_v53 = vpop.f32.mrf.mxu1 }
 0x145   :  { %942 = vst.msk [vmem:[%s2111_s3 + $0x5c] sm:$0xf] %vm918_vm3, %v1122_v48  ;;  %971 = vst.msk [vmem:[%s2111_s3 + $0xd0] sm:$0xf] %vm918_vm3, %v1151_v49  ;;  %v656_v54 = vmax.f32 %v469_v50, 0.0  ;;  %v685_v55 = vmax.f32 %v614_v51, 0.0 }
 0x146   :  { %v473_v56 = vpop.f32.mrf.mxu0  ;;  %v618_v57 = vpop.f32.mrf.mxu1 }
 0x147   :  { %v1123_v58 = vpack.c.bf16 %v656_v54, %v656_v54  ;;  %v1152_v59 = vpack.c.bf16 %v685_v55, %v685_v55  ;;  %v474_v61 = vadd.f32 %v1822_v60, %v473_v56  ;;  %v619_v62 = vadd.f32 %v1822_v60, %v618_v57 }
 0x148   :  { %v1296_v63 = vpop.f32.mrf.mxu0  ;;  %v1383_v1 = vpop.f32.mrf.mxu1 }
 0x149   :  { %943 = vst.msk [vmem:[%s2111_s3 + $0x60] sm:$0xf] %vm918_vm3, %v1123_v58  ;;  %972 = vst.msk [vmem:[%s2111_s3 + $0xd4] sm:$0xf] %vm918_vm3, %v1152_v59  ;;  %v657_v2 = vmax.f32 %v474_v61, 0.0  ;;  %v686_v3 = vmax.f32 %v619_v62, 0.0 }
 0x14a   :  { %v478_v4 = vpop.f32.mrf.mxu0  ;;  %v623_v5 = vpop.f32.mrf.mxu1 }
 0x14b   :  { %v1124_v0 = vpack.c.bf16 %v657_v2, %v657_v2  ;;  %v1153_v6 = vpack.c.bf16 %v686_v3, %v686_v3  ;;  %v479_v7 = vadd.f32 %v1822_v60, %v478_v4  ;;  %v624_v8 = vadd.f32 %v1822_v60, %v623_v5 }
 0x14c   :  { %v1299_v9 = vpop.f32.mrf.mxu0  ;;  %v1386_v10 = vpop.f32.mrf.mxu1 }
 0x14d   :  { %944 = vst.msk [vmem:[%s2111_s3 + $0x64] sm:$0xf] %vm918_vm3, %v1124_v0  ;;  %973 = vst.msk [vmem:[%s2111_s3 + $0xd8] sm:$0xf] %vm918_vm3, %v1153_v6  ;;  %v658_v11 = vmax.f32 %v479_v7, 0.0  ;;  %v687_v12 = vmax.f32 %v624_v8, 0.0 }
 0x14e   :  { %v483_v13 = vpop.f32.mrf.mxu0  ;;  %v628_v14 = vpop.f32.mrf.mxu1 }
 0x14f   :  { %v1125_v15 = vpack.c.bf16 %v658_v11, %v658_v11  ;;  %v1154_v16 = vpack.c.bf16 %v687_v12, %v687_v12  ;;  %v484_v17 = vadd.f32 %v1822_v60, %v483_v13  ;;  %v629_v18 = vadd.f32 %v1822_v60, %v628_v14 }
 0x150   :  { %v1302_v19 = vpop.f32.mrf.mxu0  ;;  %v1389_v20 = vpop.f32.mrf.mxu1 }
 0x151   :  { %945 = vst.msk [vmem:[%s2111_s3 + $0x68] sm:$0xf] %vm918_vm3, %v1125_v15  ;;  %974 = vst.msk [vmem:[%s2111_s3 + $0xdc] sm:$0xf] %vm918_vm3, %v1154_v16  ;;  %v659_v21 = vmax.f32 %v484_v17, 0.0  ;;  %v688_v22 = vmax.f32 %v629_v18, 0.0 }
 0x152   :  { %v488_v23 = vpop.f32.mrf.mxu0 }
 0x153   :  { %v1126_v24 = vpack.c.bf16 %v659_v21, %v659_v21  ;;  %v1155_v25 = vpack.c.bf16 %v688_v22, %v688_v22  ;;  %v489_v26 = vadd.f32 %v1822_v60, %v488_v23 }
 0x154   :  { %v1305_v27 = vpop.f32.mrf.mxu0 }
 0x155   :  { %946 = vst.msk [vmem:[%s2111_s3 + $0x6c] sm:$0xf] %vm918_vm3, %v1126_v24  ;;  %v660_v28 = vmax.f32 %v489_v26, 0.0 }
 0x156   :  { %976 = vst.msk [vmem:[%s2111_s3 + $0xe0] sm:$0x1] %vm975_vm4, %v1155_v25 }
 0x157   :  { %v1127_v29 = vpack.c.bf16 %v660_v28, %v660_v28 }
 0x159   :  { %947 = vst.msk [vmem:[%s2111_s3 + $0x70] sm:$0xf] %vm918_vm3, %v1127_v29 }
 0x15a   :  { %981 = vsyncpa [#allocation3], 1 }
 0x15b   :  { %982 = vsyncpa [#allocation5], 1 }

// kernel: policy_network_forward.3
= control target key start
LH: loop header
LB: loop body
LE: loop exit
PB: predicated region body
PF: predicated region fallthrough
CT: control target
= control target key end

     0   :  { %8 = vsyncpa [#allocation4], 0  ;;  %s6302_s0 = inlined_call_operand.vmem [shape: bf16[2,15360], index: 0, kind: input, shape index: {}]   ;;  %s6303_s1 = inlined_call_operand.hbm [shape: bf16[15360,256], index: 1, kind: input, shape index: {}]   ;;  %s6304_s2 = inlined_call_operand.hbm [shape: f32[1,256], index: 2, kind: input, shape index: {}]   ;;  %s6305_s3 = inlined_call_operand.hbm [shape: f32[2,256], index: 3, kind: output, shape index: {}]  }
   0x1   :  { %10 = vsyncpa [#allocation4 + $0x1], 0 }
   0x2   :  { %11 = vsyncpa [#allocation7], 0 }
   0x3   :  { %12 = vsyncpa [#allocation5], 0  ;;  %s5556_s12 = smov 0   ;;  %s5558_s13 = smov 0  }
   0x4   :  { %s5560_s14 = smov 0   ;;  %s5562_s15 = smov 0  }
   0x5 LB: > { %s5575_s16 = sadd.s32 4294967295, %s5525_s15   ;;  %s5578_s17 = sadd.s32 1, %s5525_s15   ;;  %s5525_s15 = sphi %s5562_s15, %s6322_s15   ;;  %s5521_s14 = sphi %s5560_s14, %s6321_s14   ;;  %s5517_s13 = sphi %s5558_s13, %s6320_s13   ;;  %s5513_s12 = sphi %s5556_s12, %s6319_s12  }
   0x6   : > { %s48_s18 = ssub.s32 %s5525_s15, %s5578_s17  ;;  %s51_s19 = sadd.s32 1, %s5521_s14 }
   0x7   : > { %p49_p0 = scmp.eq.s32.totalorder %s48_s18, 0  ;;  %p58_p1 = scmp.ne.s32.totalorder %s5521_s14, %s5517_s13 }
   0x8   : > { %p59_p2 = scmp.eq.s32.totalorder %s5525_s15, 0  ;;  %p64_p3 = scmp.ne.s32.totalorder %s5517_s13, %s5513_s12 }
   0x9   : > { %s5588_s20 = scalar_select %p49_p0, %s5521_s14, %s51_s19  }
   0xa   : > { %p5590_p4 = por %p59_p2, %p58_p1  ;;  %p6306_p5 = scmp.eq.s32.totalorder %s5575_s16, 0 }
   0xb   : > { %p4116_p6 = scmp.ge.s32.totalorder %s5525_s15, 1  ;;  %p117_p7 = scmp.lt.s32.totalorder %s5525_s15, 5 }
   0xc   : > { %p5599_p8 = por %p6306_p5, %p64_p3  ;;  %s5527_s24 = smov [#allocation6]  }
   0xd   : > { %p5604_p10 = pnand %p4116_p6, %p117_p7  ;;  %s130_s25 = sshll.u32 %s5527_s24, 4  ;;  %s131_s25 = int_to_ptr.vmem [resolvable:$true] %s130_s25 }
   0xe   : > { %s6310_s22 = scalar_select %p5599_p8, 1, 0 }
   0xf   : > { %s6311_s23 = scalar_select %p5604_p10, 1, 0 }
  0x10   : > { %p4624_p11 = pneg %p5604_p10  ;;  %p4633_p12 = scmp.lt.s32.totalorder %s5525_s15, 4 }
  0x11   : > { %s149_s26 = sand.u32 1, %s5521_s14   ;;  %s4611_s30 = smul.u32 61440, %s5525_s15 }
  0x12   : > { %p5614_p13 = pnand %p4624_p11, %p6306_p5  ;;  %p5620_p0 = pnand %p4633_p12, %p5590_p4 }
  0x13   : > { %s4612_s29 = smul.u32 3840, %s149_s26  ;;  %s5416_s4 = scalar_lea.vmem %s131_s25, 32 }
  0x14   : > { %p5407_p1 = pneg %p5614_p13  ;;  %p5417_p2 = scmp.ne.s32.totalorder %s131_s25, %s5416_s4 }
  0x15   : > { %p5424_p7 = scmp.lt.s32.totalorder %s131_s25, %s131_s25  ;;  %p5425_p9 = scmp.lt.s32.totalorder %s5416_s4, %s5416_s4 }
  0x16   : > { %p5419_p3 = pnand %p5417_p2, %p5407_p1 }
  0x17   : > { %p5426_p11 = por %p5425_p9, %p5424_p7 }
  0x18   : > { %p5420_p6 = pneg %p5419_p3 }
  0x1a   : > { %p5427_p5 = pnand %p5426_p11, %p5420_p6 }
  0x1c   : > { %5430 = shalt.err (!%p5427_p5)
}
  0x1d   : > { %4627 = dma.hbm_to_vmem [thread:$0]  (!%p5614_p13), %s6304_s2, 32, %s131_s25, [#allocation7]  }
  0x1e   : > { %s5635_s9 = scalar_lea.hbm %s6303_s1, %s4611_s30  ;;  %s153_s10 = scalar_lea.vmem [#allocation3], %s4612_s29 }
  0x1f   : > { %s161_s11 = sshll.u32 %s153_s10, 4  ;;  %s5639_s12 = scalar_lea.sflag [#allocation4], %s149_s26  ;;  %s5637_s11 = int_to_ptr.vmem [resolvable:$true] %s161_s11 }
  0x20   : > { %s5431_s15 = scalar_lea.hbm %s5635_s9, 61440  ;;  %p5433_p5 = pneg %p5620_p0 }
  0x21   : > { %p5432_p4 = scmp.ne.s32.totalorder %s5635_s9, %s5431_s15  ;;  %s5436_s21 = scalar_lea.hbm %s6303_s1, 245760 }
  0x22   : > { %p5437_p13 = scmp.lt.s32.totalorder %s5635_s9, %s6303_s1  ;;  %p5438_p1 = scmp.lt.s32.totalorder %s5436_s21, %s5431_s15 }
  0x23   : > { %p5434_p9 = pnand %p5433_p5, %p5432_p4 }
  0x24   : > { %p5439_p2 = por %p5438_p1, %p5437_p13 }
  0x25   : > { %p5435_p12 = pneg %p5434_p9 }
  0x27   : > { %p5440_p3 = pnand %p5439_p2, %p5435_p12 }
  0x29   : > { %5443 = shalt.err (!%p5440_p3)
}
  0x2a   : > { %s5444_s26 = scalar_lea.vmem %s5637_s11, 61440  ;;  %s5528_s27 = smov [#allocation3]  }
  0x2b   : > { %p5445_p6 = scmp.ne.s32.totalorder %s5637_s11, %s5444_s26  ;;  %s5449_s29 = sshll.u32 %s5528_s27, 4  ;;  %s5450_s29 = int_to_ptr.vmem [resolvable:$false] %s5449_s29 }
  0x2c   : > { %s5451_s30 = scalar_lea.vmem %s5450_s29, 122880  ;;  %p5452_p4 = scmp.lt.s32.totalorder %s5637_s11, %s5450_s29 }
  0x2d   : > { %p5447_p7 = pnand %p5445_p6, %p5433_p5  ;;  %p5453_p9 = scmp.lt.s32.totalorder %s5451_s30, %s5444_s26 }
  0x2f   : > { %p5448_p11 = pneg %p5447_p7  ;;  %p5454_p8 = por %p5453_p9, %p5452_p4 }
  0x31   : > { %p5455_p10 = pnand %p5454_p8, %p5448_p11 }
  0x33   : > { %5458 = shalt.err (!%p5455_p10)
}
  0x34   : > { %s5529_s4 = smov 128   ;;  %s5530_s5 = smov 8  }
  0x35   : > { %4631 = dma.hbm_to_vmem [thread:$0]  (!%p5620_p0), %s5635_s9, 61440, %s5637_s11, %s5639_s12, %s5529_s4, %s5529_s4, %s5530_s5  }
  0x36   : > { %p6314_p5 = scmp.ne.s32.totalorder %s6311_s23, 0 }
  0x37   : > { %s175_s6 = sand.u32 (!%p6314_p5), 1, %s5517_s13   ;;  %p6315_p8 = scmp.ne.s32.totalorder (!%p6314_p5), %s6310_s22, 0 }
  0x38   : > { %173 = sbr.rel (%p6314_p5) target bundleno = 1145 (0x479), region = 32  ;;  %s176_s8 = scalar_lea.sflag (!%p6314_p5), [#allocation4], %s175_s6 }
  0x39   : > { %s4613_s7 = smul.u32 (!%p6314_p5), 3840, %s175_s6 }
  0x3b   : > { %s5663_s10 = scalar_lea.vmem (!%p6314_p5), [#allocation3], %s4613_s7 }
  0x3d   : > { %5500 = dma.done.wait (%p6315_p8), %s176_s8, 61440  }
  0x3e   : > { %5502 = vsyncadd (%p6315_p8), %s176_s8, 4294905856  ;;  %p6316_p10 = scmp.eq.s32.totalorder %s5575_s16, 0 }
  0x40   : > { %5504 = dma.done.wait (%p6316_p10), [#allocation7], 32   ;;  %p6317_p0 = pmov %p6316_p10 }
  0x41   : > { %s205_s23 = smul.u32 30, %s5575_s16  ;;  %p6318_p13 = scmp.ne.s32.totalorder %s5575_s16, 0 }
  0x42   : > { %5506 = vsyncadd (%p6317_p0), [#allocation7], 4294967264 }
  0x43   : > { %p206_p12 = scmp.lt.s32.totalorder %s205_s23, 119  ;;  %214 = sbr.rel (%p6318_p13) target bundleno = 74 (0x4a), region = 44 }
  0x45   : > { %s6324_s23 = smov (!%p206_p12, %s205_s23), 119 }
  0x46   : > { %s5677_s11 = scalar_lea.vmem %s6302_s0, %s6324_s23 }
  0x48   : > { %v5531_v0 = vmov 0.0  }
  0x49   : > { %215 = vst [vmem:[#allocation2] sm:$0xf] %v5531_v0 }
  0x4a PF: > { %v4677_v1 = vld [vmem:[%s5663_s10 + $0x74] ss:$8 sps:$4 sm:$0xff]   ;;  %v4681_v3 = vld [vmem:[%s5663_s10 + $0x70] ss:$8 sps:$4 sm:$0xff]   ;;  %v4683_v5 = vld [vmem:[%s5663_s10 + $0x64] ss:$8 sps:$4 sm:$0xff]   ;;  %v709_v39 = vlaneseq }
  0x4b   : > { %v4679_v2 = vld [vmem:[%s5663_s10 + $0x174] ss:$8 sps:$4 sm:$0xff]   ;;  %3329 = vmatprep.subr.bf16.mxu0 %v4677_v1  ;;  %v4682_v4 = vld [vmem:[%s5663_s10 + $0x170] ss:$8 sps:$4 sm:$0xff]   ;;  %v4685_v6 = vld [vmem:[%s5663_s10 + $0x164] ss:$8 sps:$4 sm:$0xff]  }
  0x4c   : > { %3370 = vmatprep.subr.bf16.mxu1 %v4679_v2  ;;  %3330 = vmatpush1.bf16.msra.mxu0 %v4681_v3  ;;  %v4687_v7 = vld [vmem:[%s5663_s10 + $0x60] ss:$8 sps:$4 sm:$0xff]   ;;  %v4689_v9 = vld [vmem:[%s5663_s10 + $0x54] ss:$8 sps:$4 sm:$0xff]   ;;  %v4693_v11 = vld [vmem:[%s5663_s10 + $0x50] ss:$8 sps:$4 sm:$0xff]  }
  0x4d   : > { %3371 = vmatpush1.bf16.msra.mxu1 %v4682_v4  ;;  %3331 = vmatprep.subr.bf16.mxu0 %v4683_v5  ;;  %v4688_v8 = vld [vmem:[%s5663_s10 + $0x160] ss:$8 sps:$4 sm:$0xff]   ;;  %v4691_v10 = vld [vmem:[%s5663_s10 + $0x154] ss:$8 sps:$4 sm:$0xff]   ;;  %v4694_v12 = vld [vmem:[%s5663_s10 + $0x150] ss:$8 sps:$4 sm:$0xff]  }
  0x4e   : > { %3372 = vmatprep.subr.bf16.mxu1 %v4685_v6  ;;  %v4695_v13 = vld [vmem:[%s5663_s10 + $0x44] ss:$8 sps:$4 sm:$0xff]   ;;  %v4699_v15 = vld [vmem:[%s5663_s10 + $0x40] ss:$8 sps:$4 sm:$0xff]   ;;  %v4701_v17 = vld [vmem:[%s5663_s10 + $0x34] ss:$8 sps:$4 sm:$0xff]  }
  0x4f   : > { %v4697_v14 = vld [vmem:[%s5663_s10 + $0x144] ss:$8 sps:$4 sm:$0xff]   ;;  %v4700_v16 = vld [vmem:[%s5663_s10 + $0x140] ss:$8 sps:$4 sm:$0xff]   ;;  %v4703_v18 = vld [vmem:[%s5663_s10 + $0x134] ss:$8 sps:$4 sm:$0xff]  }
  0x50   : > { %3332 = vmatpush1.bf16.msra.mxu0 %v4687_v7  ;;  %v4705_v19 = vld [vmem:[%s5663_s10 + $0x30] ss:$8 sps:$4 sm:$0xff]   ;;  %v4707_v21 = vld [vmem:[%s5663_s10 + $0x24] ss:$8 sps:$4 sm:$0xff]   ;;  %v4711_v23 = vld [vmem:[%s5663_s10 + $0x20] ss:$8 sps:$4 sm:$0xff]  }
  0x51   : > { %3373 = vmatpush1.bf16.msra.mxu1 %v4688_v8  ;;  %3333 = vmatprep.subr.bf16.mxu0 %v4689_v9  ;;  %v4706_v20 = vld [vmem:[%s5663_s10 + $0x130] ss:$8 sps:$4 sm:$0xff]   ;;  %v4709_v22 = vld [vmem:[%s5663_s10 + $0x124] ss:$8 sps:$4 sm:$0xff]   ;;  %v4712_v24 = vld [vmem:[%s5663_s10 + $0x120] ss:$8 sps:$4 sm:$0xff]  }
  0x52   : > { %3374 = vmatprep.subr.bf16.mxu1 %v4691_v10  ;;  %v4713_v25 = vld [vmem:[%s5663_s10 + $0x14] ss:$8 sps:$4 sm:$0xff]   ;;  %v4717_v27 = vld [vmem:[%s5663_s10 + $0x10] ss:$8 sps:$4 sm:$0xff]   ;;  %v4719_v29 = vld [vmem:[%s5663_s10 + $0x4] ss:$8 sps:$4 sm:$0xff]  }
  0x53   : > { %v4715_v26 = vld [vmem:[%s5663_s10 + $0x114] ss:$8 sps:$4 sm:$0xff]   ;;  %v4718_v28 = vld [vmem:[%s5663_s10 + $0x110] ss:$8 sps:$4 sm:$0xff]   ;;  %v4721_v30 = vld [vmem:[%s5663_s10 + $0x104] ss:$8 sps:$4 sm:$0xff]  }
  0x54   : > { %3334 = vmatpush1.bf16.msra.mxu0 %v4693_v11  ;;  %v4723_v31 = vld [vmem:[%s5663_s10] ss:$8 sps:$4 sm:$0xff]   ;;  %v4725_v33 = vld [vmem:[%s5663_s10 + $0xf4] ss:$8 sps:$4 sm:$0xff]   ;;  %v4729_v35 = vld [vmem:[%s5663_s10 + $0xf0] ss:$8 sps:$4 sm:$0xff]  }
  0x55   : > { %3375 = vmatpush1.bf16.msra.mxu1 %v4694_v12  ;;  %3335 = vmatprep.subr.bf16.mxu0 %v4695_v13  ;;  %v4724_v32 = vld [vmem:[%s5663_s10 + $0x100] ss:$8 sps:$4 sm:$0xff]   ;;  %v4727_v34 = vld [vmem:[%s5663_s10 + $0x1f4] ss:$8 sps:$4 sm:$0xff]   ;;  %v4730_v36 = vld [vmem:[%s5663_s10 + $0x1f0] ss:$8 sps:$4 sm:$0xff]  }
  0x56   : > { %3376 = vmatprep.subr.bf16.mxu1 %v4697_v14  ;;  %v5532_v37 = vmov 1966171168   ;;  %v4731_v40 = vld [vmem:[%s5663_s10 + $0xe4] ss:$8 sps:$4 sm:$0xff]   ;;  %v4735_v42 = vld [vmem:[%s5663_s10 + $0xe0] ss:$8 sps:$4 sm:$0xff]  }
  0x57   : > { %v707_v38 = vunpack.c.l.s4 %v5532_v37  ;;  %v4733_v41 = vld [vmem:[%s5663_s10 + $0x1e4] ss:$8 sps:$4 sm:$0xff]   ;;  %v5720_v44 = vshrl.u32 %v709_v39, 7  ;;  %v4736_v45 = vld [vmem:[%s5663_s10 + $0x1e0] ss:$8 sps:$4 sm:$0xff]   ;;  %p4604_p1 = scmp.ne.s32.totalorder %s5575_s16, 3 }
  0x58   : > { %3336 = vmatpush1.bf16.msra.mxu0 %v4699_v15  ;;  %v4737_v46 = vld [vmem:[%s5663_s10 + $0xd4] ss:$8 sps:$4 sm:$0xff]   ;;  %v4741_v48 = vld [vmem:[%s5663_s10 + $0xd0] ss:$8 sps:$4 sm:$0xff]   ;;  %v4743_v51 = vld [vmem:[%s5663_s10 + $0xc4] ss:$8 sps:$4 sm:$0xff]  }
  0x59   : > { %3377 = vmatpush1.bf16.msra.mxu1 %v4700_v16  ;;  %3337 = vmatprep.subr.bf16.mxu0 %v4701_v17  ;;  %v708_v43 = vunpack.c.0.s8 %v707_v38  ;;  %v4739_v47 = vld [vmem:[%s5663_s10 + $0x1d4] ss:$8 sps:$4 sm:$0xff]   ;;  %v4742_v49 = vld [vmem:[%s5663_s10 + $0x1d0] ss:$8 sps:$4 sm:$0xff]   ;;  %v4745_v52 = vld [vmem:[%s5663_s10 + $0x1c4] ss:$8 sps:$4 sm:$0xff]  }
  0x5a   : > { %3378 = vmatprep.subr.bf16.mxu1 %v4703_v18  ;;  %v217_v53 = vld [vmem:[%s5677_s11] sm:$0xff]  ;;  %v4753_v60 = vld [vmem:[%s5663_s10 + $0xb0] ss:$8 sps:$4 sm:$0xff]   ;;  %v4755_v63 = vld [vmem:[%s5663_s10 + $0xa4] ss:$8 sps:$4 sm:$0xff]  }
  0x5b   : > { %v5728_v50 = vsub.s32 %v708_v43, %v5720_v44  ;;  %v4747_v54 = vld [vmem:[%s5663_s10 + $0xc0] ss:$8 sps:$4 sm:$0xff]   ;;  %v4749_v57 = vld [vmem:[%s5663_s10 + $0xb4] ss:$8 sps:$4 sm:$0xff]   ;;  %v4754_v62 = vld [vmem:[%s5663_s10 + $0x1b0] ss:$8 sps:$4 sm:$0xff]   ;;  %v705_v2 = vcombine.high %v217_v53, %v217_v53 }
  0x5c   : > { %3338 = vmatpush1.bf16.msra.mxu0 %v4705_v19  ;;  %v4748_v56 = vld [vmem:[%s5663_s10 + $0x1c0] ss:$8 sps:$4 sm:$0xff]   ;;  %v4751_v58 = vld [vmem:[%s5663_s10 + $0x1b4] ss:$8 sps:$4 sm:$0xff]   ;;  %v4757_v0 = vld [vmem:[%s5663_s10 + $0x1a4] ss:$8 sps:$4 sm:$0xff]  }
  0x5d   : > { %3379 = vmatpush1.bf16.msra.mxu1 %v4706_v20  ;;  %3339 = vmatprep.subr.bf16.mxu0 %v4707_v21  ;;  %v712_v55 = vrot.slane %v217_v53, %v5728_v50  ;;  %v4759_v3 = vld [vmem:[%s5663_s10 + $0xa0] ss:$8 sps:$4 sm:$0xff]   ;;  %v4761_v5 = vld [vmem:[%s5663_s10 + $0x94] ss:$8 sps:$4 sm:$0xff]   ;;  %v5748_v7 = vrot.slane %v705_v2, %v5728_v50  ;;  %v4765_v8 = vld [vmem:[%s5663_s10 + $0x90] ss:$8 sps:$4 sm:$0xff]  }
  0x5e   : > { %3380 = vmatprep.subr.bf16.mxu1 %v4709_v22  ;;  %v4760_v4 = vld [vmem:[%s5663_s10 + $0x1a0] ss:$8 sps:$4 sm:$0xff]   ;;  %v4763_v6 = vld [vmem:[%s5663_s10 + $0x194] ss:$8 sps:$4 sm:$0xff]   ;;  %v4766_v9 = vld [vmem:[%s5663_s10 + $0x190] ss:$8 sps:$4 sm:$0xff]  }
  0x5f   : > { %v720_v59 = vcombine.high %v712_v55, %v712_v55  ;;  %v4767_v10 = vld [vmem:[%s5663_s10 + $0x84] ss:$8 sps:$4 sm:$0xff]   ;;  %v721_v12 = vcombine.high %v5748_v7, %v5748_v7  ;;  %v4771_v13 = vld [vmem:[%s5663_s10 + $0x80] ss:$8 sps:$4 sm:$0xff]   ;;  %v728_v14 = vrot.slane %v712_v55, %v5728_v50  ;;  %v4776_v16 = vld [vmem:[%s5663_s10 + $0x274] ss:$8 sps:$4 sm:$0xff]  }
  0x60   : > { %3340 = vmatpush1.bf16.msra.mxu0 %v4711_v23  ;;  %v4769_v11 = vld [vmem:[%s5663_s10 + $0x184] ss:$8 sps:$4 sm:$0xff]   ;;  %v4772_v15 = vld [vmem:[%s5663_s10 + $0x180] ss:$8 sps:$4 sm:$0xff]   ;;  %v4779_v17 = vld [vmem:[%s5663_s10 + $0x374] ss:$8 sps:$4 sm:$0xff]  }
  0x61   : > { %3381 = vmatpush1.bf16.msra.mxu1 %v4712_v24  ;;  %3341 = vmatprep.subr.bf16.mxu0 %v4713_v25  ;;  %v742_v61 = vrot.slane %v720_v59, %v5728_v50  ;;  %v749_v18 = vrot.slane %v721_v12, %v5728_v50  ;;  %v750_v19 = vcombine.high %v728_v14, %v728_v14  ;;  %v4774_v20 = vld [vmem:[%s5663_s10 + $0x270] ss:$8 sps:$4 sm:$0xff]   ;;  %v4782_v22 = vld [vmem:[%s5663_s10 + $0x264] ss:$8 sps:$4 sm:$0xff]   ;;  %v4780_v25 = vld [vmem:[%s5663_s10 + $0x260] ss:$8 sps:$4 sm:$0xff]  }
  0x62   : > { %3382 = vmatprep.subr.bf16.mxu1 %v4715_v26  ;;  %v4777_v21 = vld [vmem:[%s5663_s10 + $0x370] ss:$8 sps:$4 sm:$0xff]   ;;  %v4785_v23 = vld [vmem:[%s5663_s10 + $0x364] ss:$8 sps:$4 sm:$0xff]   ;;  %v4783_v26 = vld [vmem:[%s5663_s10 + $0x360] ss:$8 sps:$4 sm:$0xff]  }
  0x63   : > { %v752_v1 = vcombine.high %v742_v61, %v742_v61  ;;  %3361 = vmatprep.mubr.bf16.mxu0 %v742_v61  ;;  %v753_v24 = vcombine.high %v749_v18, %v749_v18  ;;  %v4798_v37 = vld [vmem:[%s5663_s10 + $0x230] ss:$8 sps:$4 sm:$0xff]   ;;  %v4806_v39 = vld [vmem:[%s5663_s10 + $0x224] ss:$8 sps:$4 sm:$0xff]   ;;  %v4812_v43 = vld [vmem:[%s5663_s10 + $0x214] ss:$8 sps:$4 sm:$0xff]  }
  0x64   : > { %3342 = vmatpush1.bf16.msra.mxu0 %v4717_v27  ;;  %v4788_v27 = vld [vmem:[%s5663_s10 + $0x254] ss:$8 sps:$4 sm:$0xff]   ;;  %v4801_v38 = vld [vmem:[%s5663_s10 + $0x330] ss:$8 sps:$4 sm:$0xff]   ;;  %v4828_v59 = vld [vmem:[%s5663_s10 + $0x2e0] ss:$8 sps:$4 sm:$0xff]  }
  0x65   : > { %3383 = vmatpush1.bf16.msra.mxu1 %v4718_v28  ;;  %3343 = vmatprep.subr.bf16.mxu0 %v4719_v29  ;;  %v4791_v28 = vld [vmem:[%s5663_s10 + $0x354] ss:$8 sps:$4 sm:$0xff]   ;;  %v4786_v29 = vld [vmem:[%s5663_s10 + $0x250] ss:$8 sps:$4 sm:$0xff]   ;;  %v4845_v2 = vld [vmem:[%s5663_s10 + $0x3c4] ss:$8 sps:$4 sm:$0xff]  }
  0x66   : > { %3384 = vmatprep.subr.bf16.mxu1 %v4721_v30  ;;  %3402 = vmatprep.mubr.bf16.mxu1 %v752_v1  ;;  %v4789_v30 = vld [vmem:[%s5663_s10 + $0x350] ss:$8 sps:$4 sm:$0xff]   ;;  %v4824_v53 = vld [vmem:[%s5663_s10 + $0x2f4] ss:$8 sps:$4 sm:$0xff]   ;;  %v4842_v1 = vld [vmem:[%s5663_s10 + $0x2c4] ss:$8 sps:$4 sm:$0xff]  }
  0x67   : > { %v4822_v55 = vld [vmem:[%s5663_s10 + $0x2f0] ss:$8 sps:$4 sm:$0xff]   ;;  %v4836_v61 = vld [vmem:[%s5663_s10 + $0x2d4] ss:$8 sps:$4 sm:$0xff]   ;;  %v4852_v12 = vld [vmem:[%s5663_s10 + $0x2a0] ss:$8 sps:$4 sm:$0xff]  }
  0x68   : > { %3344 = vmatpush1.bf16.msra.mxu0 %v4723_v31  ;;  %v4794_v31 = vld [vmem:[%s5663_s10 + $0x244] ss:$8 sps:$4 sm:$0xff]  }
  0x69   : > { %3385 = vmatpush1.bf16.msra.mxu1 %v4724_v32  ;;  %3345 = vmatprep.subr.bf16.mxu0 %v4725_v33  ;;  %v4797_v32 = vld [vmem:[%s5663_s10 + $0x344] ss:$8 sps:$4 sm:$0xff]   ;;  %v4792_v33 = vld [vmem:[%s5663_s10 + $0x240] ss:$8 sps:$4 sm:$0xff]  }
  0x6a   : > { %3386 = vmatprep.subr.bf16.mxu1 %v4727_v34  ;;  %v4795_v34 = vld [vmem:[%s5663_s10 + $0x340] ss:$8 sps:$4 sm:$0xff]  }
  0x6c   : > { %3346 = vmatpush2.bf16.msra.mxu0 %v4729_v35  ;;  %v4800_v35 = vld [vmem:[%s5663_s10 + $0x234] ss:$8 sps:$4 sm:$0xff]  }
  0x6d   : > { %3387 = vmatpush2.bf16.msra.mxu1 %v4730_v36  ;;  %3347 = vmatprep.subr.bf16.mxu0 %v4731_v40  ;;  %v4803_v36 = vld [vmem:[%s5663_s10 + $0x334] ss:$8 sps:$4 sm:$0xff]   ;;  %v4809_v40 = vld [vmem:[%s5663_s10 + $0x324] ss:$8 sps:$4 sm:$0xff]  }
  0x6e   : > { %3388 = vmatprep.subr.bf16.mxu1 %v4733_v41  ;;  %v4804_v41 = vld [vmem:[%s5663_s10 + $0x220] ss:$8 sps:$4 sm:$0xff]  }
  0x70   : > { %3348 = vmatpush2.bf16.msra.mxu0 %v4735_v42  ;;  %v4807_v42 = vld [vmem:[%s5663_s10 + $0x320] ss:$8 sps:$4 sm:$0xff]  }
  0x71   : > { %3389 = vmatpush2.bf16.msra.mxu1 %v4736_v45  ;;  %3349 = vmatprep.subr.bf16.mxu0 %v4737_v46  ;;  %v4815_v45 = vld [vmem:[%s5663_s10 + $0x314] ss:$8 sps:$4 sm:$0xff]   ;;  %v4810_v46 = vld [vmem:[%s5663_s10 + $0x210] ss:$8 sps:$4 sm:$0xff]  }
  0x72   : > { %3390 = vmatprep.subr.bf16.mxu1 %v4739_v47  ;;  %v4813_v47 = vld [vmem:[%s5663_s10 + $0x310] ss:$8 sps:$4 sm:$0xff]  }
  0x74   : > { %3350 = vmatpush2.bf16.msra.mxu0 %v4741_v48  ;;  %v4818_v48 = vld [vmem:[%s5663_s10 + $0x204] ss:$8 sps:$4 sm:$0xff]  }
  0x75   : > { %3391 = vmatpush2.bf16.msra.mxu1 %v4742_v49  ;;  %3351 = vmatprep.subr.bf16.mxu0 %v4743_v51  ;;  %v4821_v49 = vld [vmem:[%s5663_s10 + $0x304] ss:$8 sps:$4 sm:$0xff]   ;;  %v4816_v51 = vld [vmem:[%s5663_s10 + $0x200] ss:$8 sps:$4 sm:$0xff]  }
  0x76   : > { %3392 = vmatprep.subr.bf16.mxu1 %v4745_v52  ;;  %v4819_v52 = vld [vmem:[%s5663_s10 + $0x300] ss:$8 sps:$4 sm:$0xff]  }
  0x78   : > { %3352 = vmatpush2.bf16.msra.mxu0 %v4747_v54  ;;  %v4827_v54 = vld [vmem:[%s5663_s10 + $0x3f4] ss:$8 sps:$4 sm:$0xff]  }
  0x79   : > { %3393 = vmatpush2.bf16.msra.mxu1 %v4748_v56  ;;  %3353 = vmatprep.subr.bf16.mxu0 %v4749_v57  ;;  %v4825_v56 = vld [vmem:[%s5663_s10 + $0x3f0] ss:$8 sps:$4 sm:$0xff]   ;;  %v4830_v57 = vld [vmem:[%s5663_s10 + $0x2e4] ss:$8 sps:$4 sm:$0xff]  }
  0x7a   : > { %3394 = vmatprep.subr.bf16.mxu1 %v4751_v58  ;;  %v4833_v58 = vld [vmem:[%s5663_s10 + $0x3e4] ss:$8 sps:$4 sm:$0xff]  }
  0x7c   : > { %3354 = vmatpush2.bf16.msra.mxu0 %v4753_v60  ;;  %v4831_v60 = vld [vmem:[%s5663_s10 + $0x3e0] ss:$8 sps:$4 sm:$0xff]  }
  0x7d   : > { %3395 = vmatpush2.bf16.msra.mxu1 %v4754_v62  ;;  %3355 = vmatprep.subr.bf16.mxu0 %v4755_v63  ;;  %v4839_v62 = vld [vmem:[%s5663_s10 + $0x3d4] ss:$8 sps:$4 sm:$0xff]   ;;  %v4834_v63 = vld [vmem:[%s5663_s10 + $0x2d0] ss:$8 sps:$4 sm:$0xff]  }
  0x7e   : > { %3396 = vmatprep.subr.bf16.mxu1 %v4757_v0  ;;  %v4837_v0 = vld [vmem:[%s5663_s10 + $0x3d0] ss:$8 sps:$4 sm:$0xff]  }
  0x80   : > { %3356 = vmatpush2.bf16.msra.mxu0 %v4759_v3  ;;  %v4840_v3 = vld [vmem:[%s5663_s10 + $0x2c0] ss:$8 sps:$4 sm:$0xff]  }
  0x81   : > { %3397 = vmatpush2.bf16.msra.mxu1 %v4760_v4  ;;  %3357 = vmatprep.subr.bf16.mxu0 %v4761_v5  ;;  %v4843_v4 = vld [vmem:[%s5663_s10 + $0x3c0] ss:$8 sps:$4 sm:$0xff]   ;;  %v4848_v5 = vld [vmem:[%s5663_s10 + $0x2b4] ss:$8 sps:$4 sm:$0xff]  }
  0x82   : > { %3398 = vmatprep.subr.bf16.mxu1 %v4763_v6  ;;  %v4851_v6 = vld [vmem:[%s5663_s10 + $0x3b4] ss:$8 sps:$4 sm:$0xff]  }
  0x84   : > { %3358 = vmatpush2.bf16.msra.mxu0 %v4765_v8  ;;  %v4846_v8 = vld [vmem:[%s5663_s10 + $0x2b0] ss:$8 sps:$4 sm:$0xff]  }
  0x85   : > { %3399 = vmatpush2.bf16.msra.mxu1 %v4766_v9  ;;  %3359 = vmatprep.subr.bf16.mxu0 %v4767_v10  ;;  %v4849_v9 = vld [vmem:[%s5663_s10 + $0x3b0] ss:$8 sps:$4 sm:$0xff]   ;;  %v4854_v10 = vld [vmem:[%s5663_s10 + $0x2a4] ss:$8 sps:$4 sm:$0xff]  }
  0x86   : > { %3400 = vmatprep.subr.bf16.mxu1 %v4769_v11  ;;  %v4857_v11 = vld [vmem:[%s5663_s10 + $0x3a4] ss:$8 sps:$4 sm:$0xff]  }
  0x88   : > { %3360 = vmatpush2.bf16.msra.mxu0 %v4771_v13  ;;  %v4855_v13 = vld [vmem:[%s5663_s10 + $0x3a0] ss:$8 sps:$4 sm:$0xff]  }
  0x89   : > { %3401 = vmatpush2.bf16.msra.mxu1 %v4772_v15  ;;  %3411 = vmatprep.subr.bf16.mxu0 %v4776_v16  ;;  %v4863_v15 = vld [vmem:[%s5663_s10 + $0x394] ss:$8 sps:$4 sm:$0xff]   ;;  %v4858_v16 = vld [vmem:[%s5663_s10 + $0x290] ss:$8 sps:$4 sm:$0xff]  }
  0x8a   : > { %3452 = vmatprep.subr.bf16.mxu1 %v4779_v17  ;;  %v4861_v17 = vld [vmem:[%s5663_s10 + $0x390] ss:$8 sps:$4 sm:$0xff]  }
  0x8b   : > { %3362 = vmatmul.mubr.bf16.vlgmr.msra.gmra.mxu0 %v728_v14  ;;  %v4860_v14 = vld [vmem:[%s5663_s10 + $0x294] ss:$8 sps:$4 sm:$0xff]  }
  0x8c   : > { %3403 = vmatmul.mubr.bf16.vlgmr.msra.gmra.mxu1 %v750_v19  ;;  %3412 = vmatpush1.bf16.msra.mxu0 %v4774_v20  ;;  %v4869_v19 = vld [vmem:[%s5663_s10 + $0x384] ss:$8 sps:$4 sm:$0xff]   ;;  %v4864_v20 = vld [vmem:[%s5663_s10 + $0x280] ss:$8 sps:$4 sm:$0xff]  }
  0x8d   : > { %3453 = vmatpush1.bf16.msra.mxu1 %v4777_v21  ;;  %3413 = vmatprep.subr.bf16.mxu0 %v4782_v22  ;;  %v735_v21 = vrot.slane %v5748_v7, %v5728_v50  ;;  %v4867_v22 = vld [vmem:[%s5663_s10 + $0x380] ss:$8 sps:$4 sm:$0xff]   ;;  %v4878_v7 = vld [vmem:[%s5663_s10 + $0x464] ss:$8 sps:$4 sm:$0xff]  }
  0x8e   : > { %3454 = vmatprep.subr.bf16.mxu1 %v4785_v23  ;;  %3443 = vmatprep.mubr.bf16.mxu0 %v749_v18  ;;  %v4866_v18 = vld [vmem:[%s5663_s10 + $0x284] ss:$8 sps:$4 sm:$0xff]   ;;  %v4872_v23 = vld [vmem:[%s5663_s10 + $0x474] ss:$8 sps:$4 sm:$0xff]  }
  0x8f   : > { %3484 = vmatprep.mubr.bf16.mxu1 %v753_v24  ;;  %v4875_v24 = vld [vmem:[%s5663_s10 + $0x574] ss:$8 sps:$4 sm:$0xff]  }
  0x90   : > { %3414 = vmatpush1.bf16.msra.mxu0 %v4780_v25  ;;  %v4870_v25 = vld [vmem:[%s5663_s10 + $0x470] ss:$8 sps:$4 sm:$0xff]  }
  0x91   : > { %3455 = vmatpush1.bf16.msra.mxu1 %v4783_v26  ;;  %3415 = vmatprep.subr.bf16.mxu0 %v4788_v27  ;;  %v751_v26 = vcombine.high %v735_v21, %v735_v21  ;;  %v4873_v27 = vld [vmem:[%s5663_s10 + $0x570] ss:$8 sps:$4 sm:$0xff]  }
  0x92   : > { %3456 = vmatprep.subr.bf16.mxu1 %v4791_v28  ;;  %v5831_v28 = vld [vmem:[%s5677_s11 + $0x8] sm:$0xff] }
  0x94   : > { %3416 = vmatpush1.bf16.msra.mxu0 %v4786_v29  ;;  %v4881_v29 = vld [vmem:[%s5663_s10 + $0x564] ss:$8 sps:$4 sm:$0xff]  }
  0x95   : > { %3457 = vmatpush1.bf16.msra.mxu1 %v4789_v30  ;;  %3417 = vmatprep.subr.bf16.mxu0 %v4794_v31  ;;  %v5837_v30 = vrot.slane %v5831_v28, %v5728_v50 }
  0x96   : > { %3458 = vmatprep.subr.bf16.mxu1 %v4797_v32  ;;  %v4876_v32 = vld [vmem:[%s5663_s10 + $0x460] ss:$8 sps:$4 sm:$0xff]  }
  0x97   : > { %v769_v31 = vcombine.high %v5837_v30, %v5837_v30 }
  0x98   : > { %3418 = vmatpush1.bf16.msra.mxu0 %v4792_v33  ;;  %v4879_v33 = vld [vmem:[%s5663_s10 + $0x560] ss:$8 sps:$4 sm:$0xff]  }
  0x99   : > { %3459 = vmatpush1.bf16.msra.mxu1 %v4795_v34  ;;  %3419 = vmatprep.subr.bf16.mxu0 %v4800_v35  ;;  %v4884_v34 = vld [vmem:[%s5663_s10 + $0x454] ss:$8 sps:$4 sm:$0xff]  }
  0x9a   : > { %3460 = vmatprep.subr.bf16.mxu1 %v4803_v36  ;;  %v4887_v35 = vld [vmem:[%s5663_s10 + $0x554] ss:$8 sps:$4 sm:$0xff]   ;;  %v791_v36 = vrot.slane %v769_v31, %v5728_v50 }
  0x9c   : > { %3420 = vmatpush1.bf16.msra.mxu0 %v4798_v37  ;;  %v801_v37 = vcombine.high %v791_v36, %v791_v36 }
  0x9d   : > { %3461 = vmatpush1.bf16.msra.mxu1 %v4801_v38  ;;  %3421 = vmatprep.subr.bf16.mxu0 %v4806_v39  ;;  %v4882_v38 = vld [vmem:[%s5663_s10 + $0x450] ss:$8 sps:$4 sm:$0xff]  }
  0x9e   : > { %3462 = vmatprep.subr.bf16.mxu1 %v4809_v40  ;;  %v4885_v39 = vld [vmem:[%s5663_s10 + $0x550] ss:$8 sps:$4 sm:$0xff]   ;;  %v4890_v40 = vld [vmem:[%s5663_s10 + $0x444] ss:$8 sps:$4 sm:$0xff]  }
  0xa0   : > { %3422 = vmatpush1.bf16.msra.mxu0 %v4804_v41  ;;  %v4893_v41 = vld [vmem:[%s5663_s10 + $0x544] ss:$8 sps:$4 sm:$0xff]  }
  0xa1   : > { %3463 = vmatpush1.bf16.msra.mxu1 %v4807_v42  ;;  %3423 = vmatprep.subr.bf16.mxu0 %v4812_v43  ;;  %v4888_v42 = vld [vmem:[%s5663_s10 + $0x440] ss:$8 sps:$4 sm:$0xff]  }
  0xa2   : > { %3464 = vmatprep.subr.bf16.mxu1 %v4815_v45  ;;  %v4891_v43 = vld [vmem:[%s5663_s10 + $0x540] ss:$8 sps:$4 sm:$0xff]   ;;  %v4896_v45 = vld [vmem:[%s5663_s10 + $0x434] ss:$8 sps:$4 sm:$0xff]  }
  0xa4   : > { %3424 = vmatpush1.bf16.msra.mxu0 %v4810_v46  ;;  %v4899_v46 = vld [vmem:[%s5663_s10 + $0x534] ss:$8 sps:$4 sm:$0xff]  }
  0xa5   : > { %3465 = vmatpush1.bf16.msra.mxu1 %v4813_v47  ;;  %3425 = vmatprep.subr.bf16.mxu0 %v4818_v48  ;;  %v4894_v47 = vld [vmem:[%s5663_s10 + $0x430] ss:$8 sps:$4 sm:$0xff]  }
  0xa6   : > { %3466 = vmatprep.subr.bf16.mxu1 %v4821_v49  ;;  %v4897_v48 = vld [vmem:[%s5663_s10 + $0x530] ss:$8 sps:$4 sm:$0xff]   ;;  %v4902_v49 = vld [vmem:[%s5663_s10 + $0x424] ss:$8 sps:$4 sm:$0xff]  }
  0xa8   : > { %3426 = vmatpush1.bf16.msra.mxu0 %v4816_v51  ;;  %v4905_v51 = vld [vmem:[%s5663_s10 + $0x524] ss:$8 sps:$4 sm:$0xff]  }
  0xa9   : > { %3467 = vmatpush1.bf16.msra.mxu1 %v4819_v52  ;;  %3427 = vmatprep.subr.bf16.mxu0 %v4824_v53  ;;  %v4900_v52 = vld [vmem:[%s5663_s10 + $0x420] ss:$8 sps:$4 sm:$0xff]  }
  0xaa   : > { %3468 = vmatprep.subr.bf16.mxu1 %v4827_v54  ;;  %v4903_v53 = vld [vmem:[%s5663_s10 + $0x520] ss:$8 sps:$4 sm:$0xff]   ;;  %v4908_v54 = vld [vmem:[%s5663_s10 + $0x414] ss:$8 sps:$4 sm:$0xff]  }
  0xac   : > { %3428 = vmatpush2.bf16.msra.mxu0 %v4822_v55  ;;  %v4911_v55 = vld [vmem:[%s5663_s10 + $0x514] ss:$8 sps:$4 sm:$0xff]  }
  0xad   : > { %3469 = vmatpush2.bf16.msra.mxu1 %v4825_v56  ;;  %3429 = vmatprep.subr.bf16.mxu0 %v4830_v57  ;;  %v4906_v56 = vld [vmem:[%s5663_s10 + $0x410] ss:$8 sps:$4 sm:$0xff]  }
  0xae   : > { %3470 = vmatprep.subr.bf16.mxu1 %v4833_v58  ;;  %v4909_v57 = vld [vmem:[%s5663_s10 + $0x510] ss:$8 sps:$4 sm:$0xff]   ;;  %v4914_v58 = vld [vmem:[%s5663_s10 + $0x404] ss:$8 sps:$4 sm:$0xff]  }
  0xb0   : > { %3430 = vmatpush2.bf16.msra.mxu0 %v4828_v59  ;;  %v4917_v59 = vld [vmem:[%s5663_s10 + $0x504] ss:$8 sps:$4 sm:$0xff]  }
  0xb1   : > { %3471 = vmatpush2.bf16.msra.mxu1 %v4831_v60  ;;  %3431 = vmatprep.subr.bf16.mxu0 %v4836_v61  ;;  %v4912_v60 = vld [vmem:[%s5663_s10 + $0x400] ss:$8 sps:$4 sm:$0xff]  }
  0xb2   : > { %3472 = vmatprep.subr.bf16.mxu1 %v4839_v62  ;;  %v4915_v61 = vld [vmem:[%s5663_s10 + $0x500] ss:$8 sps:$4 sm:$0xff]   ;;  %v4920_v62 = vld [vmem:[%s5663_s10 + $0x4f4] ss:$8 sps:$4 sm:$0xff]  }
  0xb4   : > { %3432 = vmatpush2.bf16.msra.mxu0 %v4834_v63  ;;  %v4923_v63 = vld [vmem:[%s5663_s10 + $0x5f4] ss:$8 sps:$4 sm:$0xff]  }
  0xb5   : > { %3473 = vmatpush2.bf16.msra.mxu1 %v4837_v0  ;;  %3433 = vmatprep.subr.bf16.mxu0 %v4842_v1  ;;  %v4918_v0 = vld [vmem:[%s5663_s10 + $0x4f0] ss:$8 sps:$4 sm:$0xff]  }
  0xb6   : > { %3474 = vmatprep.subr.bf16.mxu1 %v4845_v2  ;;  %v4921_v1 = vld [vmem:[%s5663_s10 + $0x5f0] ss:$8 sps:$4 sm:$0xff]   ;;  %v4926_v2 = vld [vmem:[%s5663_s10 + $0x4e4] ss:$8 sps:$4 sm:$0xff]  }
  0xb8   : > { %3434 = vmatpush2.bf16.msra.mxu0 %v4840_v3  ;;  %v4929_v3 = vld [vmem:[%s5663_s10 + $0x5e4] ss:$8 sps:$4 sm:$0xff]  }
  0xb9   : > { %3475 = vmatpush2.bf16.msra.mxu1 %v4843_v4  ;;  %3435 = vmatprep.subr.bf16.mxu0 %v4848_v5  ;;  %v4924_v4 = vld [vmem:[%s5663_s10 + $0x4e0] ss:$8 sps:$4 sm:$0xff]  }
  0xba   : > { %3476 = vmatprep.subr.bf16.mxu1 %v4851_v6  ;;  %v4927_v5 = vld [vmem:[%s5663_s10 + $0x5e0] ss:$8 sps:$4 sm:$0xff]   ;;  %v4932_v6 = vld [vmem:[%s5663_s10 + $0x4d4] ss:$8 sps:$4 sm:$0xff]  }
  0xbc   : > { %3436 = vmatpush2.bf16.msra.mxu0 %v4846_v8  ;;  %v4935_v8 = vld [vmem:[%s5663_s10 + $0x5d4] ss:$8 sps:$4 sm:$0xff]  }
  0xbd   : > { %3477 = vmatpush2.bf16.msra.mxu1 %v4849_v9  ;;  %3437 = vmatprep.subr.bf16.mxu0 %v4854_v10  ;;  %v4930_v9 = vld [vmem:[%s5663_s10 + $0x4d0] ss:$8 sps:$4 sm:$0xff]  }
  0xbe   : > { %3478 = vmatprep.subr.bf16.mxu1 %v4857_v11  ;;  %v4933_v10 = vld [vmem:[%s5663_s10 + $0x5d0] ss:$8 sps:$4 sm:$0xff]   ;;  %v4938_v11 = vld [vmem:[%s5663_s10 + $0x4c4] ss:$8 sps:$4 sm:$0xff]  }
  0xc0   : > { %3438 = vmatpush2.bf16.msra.mxu0 %v4852_v12  ;;  %v4941_v12 = vld [vmem:[%s5663_s10 + $0x5c4] ss:$8 sps:$4 sm:$0xff]  }
  0xc1   : > { %3479 = vmatpush2.bf16.msra.mxu1 %v4855_v13  ;;  %3439 = vmatprep.subr.bf16.mxu0 %v4860_v14  ;;  %v4936_v13 = vld [vmem:[%s5663_s10 + $0x4c0] ss:$8 sps:$4 sm:$0xff]  }
  0xc2   : > { %3480 = vmatprep.subr.bf16.mxu1 %v4863_v15  ;;  %v4939_v14 = vld [vmem:[%s5663_s10 + $0x5c0] ss:$8 sps:$4 sm:$0xff]   ;;  %v4944_v15 = vld [vmem:[%s5663_s10 + $0x4b4] ss:$8 sps:$4 sm:$0xff]  }
  0xc4   : > { %3440 = vmatpush2.bf16.msra.mxu0 %v4858_v16  ;;  %v4947_v16 = vld [vmem:[%s5663_s10 + $0x5b4] ss:$8 sps:$4 sm:$0xff]  }
  0xc5   : > { %3481 = vmatpush2.bf16.msra.mxu1 %v4861_v17  ;;  %3441 = vmatprep.subr.bf16.mxu0 %v4866_v18  ;;  %v4942_v17 = vld [vmem:[%s5663_s10 + $0x4b0] ss:$8 sps:$4 sm:$0xff]  }
  0xc6   : > { %3482 = vmatprep.subr.bf16.mxu1 %v4869_v19  ;;  %v4945_v18 = vld [vmem:[%s5663_s10 + $0x5b0] ss:$8 sps:$4 sm:$0xff]   ;;  %v4950_v19 = vld [vmem:[%s5663_s10 + $0x4a4] ss:$8 sps:$4 sm:$0xff]  }
  0xc8   : > { %3442 = vmatpush2.bf16.msra.mxu0 %v4864_v20  ;;  %v4953_v20 = vld [vmem:[%s5663_s10 + $0x5a4] ss:$8 sps:$4 sm:$0xff]  }
  0xc9   : > { %3483 = vmatpush2.bf16.msra.mxu1 %v4867_v22  ;;  %3493 = vmatprep.subr.bf16.mxu0 %v4872_v23  ;;  %v4948_v22 = vld [vmem:[%s5663_s10 + $0x4a0] ss:$8 sps:$4 sm:$0xff]  }
  0xca   : > { %3534 = vmatprep.subr.bf16.mxu1 %v4875_v24  ;;  %v4951_v23 = vld [vmem:[%s5663_s10 + $0x5a0] ss:$8 sps:$4 sm:$0xff]   ;;  %v4956_v24 = vld [vmem:[%s5663_s10 + $0x494] ss:$8 sps:$4 sm:$0xff]  }
  0xcb   : > { %3444 = vmatmul.mubr.bf16.vlgmr.msra.gmra.mxu0 %v735_v21  ;;  %v754_v21 = vcombine.high %v5831_v28, %v5831_v28  ;;  %v4957_v28 = vld [vmem:[%s5663_s10 + $0x590] ss:$8 sps:$4 sm:$0xff]  }
  0xcc   : > { %3485 = vmatmul.mubr.bf16.vlgmr.msra.gmra.mxu1 %v751_v26  ;;  %3494 = vmatpush1.bf16.msra.mxu0 %v4870_v25  ;;  %v4959_v25 = vld [vmem:[%s5663_s10 + $0x594] ss:$8 sps:$4 sm:$0xff]  }
  0xcd   : > { %3535 = vmatpush1.bf16.msra.mxu1 %v4873_v27  ;;  %3495 = vmatprep.subr.bf16.mxu0 %v4878_v7  ;;  %v5897_v26 = vrot.slane %v754_v21, %v5728_v50  ;;  %v4954_v27 = vld [vmem:[%s5663_s10 + $0x490] ss:$8 sps:$4 sm:$0xff]   ;;  %v4962_v7 = vld [vmem:[%s5663_s10 + $0x484] ss:$8 sps:$4 sm:$0xff]  }
  0xce   : > { %3536 = vmatprep.subr.bf16.mxu1 %v4881_v29  ;;  %3525 = vmatprep.mubr.bf16.mxu0 %v791_v36  ;;  %v4965_v29 = vld [vmem:[%s5663_s10 + $0x584] ss:$8 sps:$4 sm:$0xff]   ;;  %v4971_v36 = vld [vmem:[%s5663_s10 + $0x774] ss:$8 sps:$4 sm:$0xff]  }
  0xcf   : > { %3566 = vmatprep.mubr.bf16.mxu1 %v801_v37  ;;  %v770_v31 = vcombine.high %v5897_v26, %v5897_v26  ;;  %v5037_v21 = vld [vmem:[%s5663_s10 + $0x7c4] ss:$8 sps:$4 sm:$0xff]  }
  0xd0   : > { %3496 = vmatpush1.bf16.msra.mxu0 %v4876_v32  ;;  %v777_v32 = vrot.slane %v5837_v30, %v5728_v50  ;;  %v4969_v30 = vld [vmem:[%s5663_s10 + $0x770] ss:$8 sps:$4 sm:$0xff]  }
  0xd1   : > { %3537 = vmatpush1.bf16.msra.mxu1 %v4879_v33  ;;  %3497 = vmatprep.subr.bf16.mxu0 %v4884_v34  ;;  %v4960_v33 = vld [vmem:[%s5663_s10 + $0x480] ss:$8 sps:$4 sm:$0xff]   ;;  %v798_v37 = vrot.slane %v770_v31, %v5728_v50 }
  0xd2   : > { %3538 = vmatprep.subr.bf16.mxu1 %v4887_v35  ;;  %v4963_v34 = vld [vmem:[%s5663_s10 + $0x580] ss:$8 sps:$4 sm:$0xff]   ;;  %v4968_v35 = vld [vmem:[%s5663_s10 + $0x674] ss:$8 sps:$4 sm:$0xff]  }
  0xd3   : > { %v5044_v31 = vld [vmem:[%s5663_s10 + $0x6a0] ss:$8 sps:$4 sm:$0xff]  }
  0xd4   : > { %3498 = vmatpush1.bf16.msra.mxu0 %v4882_v38  ;;  %v799_v38 = vcombine.high %v777_v32, %v777_v32 }
  0xd5   : > { %3539 = vmatpush1.bf16.msra.mxu1 %v4885_v39  ;;  %3499 = vmatprep.subr.bf16.mxu0 %v4890_v40  ;;  %v4966_v39 = vld [vmem:[%s5663_s10 + $0x670] ss:$8 sps:$4 sm:$0xff]   ;;  %v4974_v40 = vld [vmem:[%s5663_s10 + $0x664] ss:$8 sps:$4 sm:$0xff]  }
  0xd6   : > { %3540 = vmatprep.subr.bf16.mxu1 %v4893_v41  ;;  %v4977_v41 = vld [vmem:[%s5663_s10 + $0x764] ss:$8 sps:$4 sm:$0xff]  }
  0xd8   : > { %3500 = vmatpush1.bf16.msra.mxu0 %v4888_v42  ;;  %v802_v42 = vcombine.high %v798_v37, %v798_v37 }
  0xd9   : > { %3541 = vmatpush1.bf16.msra.mxu1 %v4891_v43  ;;  %3501 = vmatprep.subr.bf16.mxu0 %v4896_v45  ;;  %v4972_v43 = vld [vmem:[%s5663_s10 + $0x660] ss:$8 sps:$4 sm:$0xff]  }
  0xda   : > { %3542 = vmatprep.subr.bf16.mxu1 %v4899_v46  ;;  %v4975_v45 = vld [vmem:[%s5663_s10 + $0x760] ss:$8 sps:$4 sm:$0xff]   ;;  %v4980_v46 = vld [vmem:[%s5663_s10 + $0x654] ss:$8 sps:$4 sm:$0xff]  }
  0xdc   : > { %3502 = vmatpush1.bf16.msra.mxu0 %v4894_v47  ;;  %v4983_v47 = vld [vmem:[%s5663_s10 + $0x754] ss:$8 sps:$4 sm:$0xff]  }
  0xdd   : > { %3543 = vmatpush1.bf16.msra.mxu1 %v4897_v48  ;;  %3503 = vmatprep.subr.bf16.mxu0 %v4902_v49  ;;  %v4978_v48 = vld [vmem:[%s5663_s10 + $0x650] ss:$8 sps:$4 sm:$0xff]  }
  0xde   : > { %3544 = vmatprep.subr.bf16.mxu1 %v4905_v51  ;;  %v4981_v49 = vld [vmem:[%s5663_s10 + $0x750] ss:$8 sps:$4 sm:$0xff]   ;;  %v4986_v51 = vld [vmem:[%s5663_s10 + $0x644] ss:$8 sps:$4 sm:$0xff]  }
  0xe0   : > { %3504 = vmatpush1.bf16.msra.mxu0 %v4900_v52  ;;  %v4989_v52 = vld [vmem:[%s5663_s10 + $0x744] ss:$8 sps:$4 sm:$0xff]  }
  0xe1   : > { %3545 = vmatpush1.bf16.msra.mxu1 %v4903_v53  ;;  %3505 = vmatprep.subr.bf16.mxu0 %v4908_v54  ;;  %v4984_v53 = vld [vmem:[%s5663_s10 + $0x640] ss:$8 sps:$4 sm:$0xff]  }
  0xe2   : > { %3546 = vmatprep.subr.bf16.mxu1 %v4911_v55  ;;  %v4987_v54 = vld [vmem:[%s5663_s10 + $0x740] ss:$8 sps:$4 sm:$0xff]   ;;  %v4992_v55 = vld [vmem:[%s5663_s10 + $0x634] ss:$8 sps:$4 sm:$0xff]  }
  0xe4   : > { %3506 = vmatpush1.bf16.msra.mxu0 %v4906_v56  ;;  %v4995_v56 = vld [vmem:[%s5663_s10 + $0x734] ss:$8 sps:$4 sm:$0xff]  }
  0xe5   : > { %3547 = vmatpush1.bf16.msra.mxu1 %v4909_v57  ;;  %3507 = vmatprep.subr.bf16.mxu0 %v4914_v58  ;;  %v4990_v57 = vld [vmem:[%s5663_s10 + $0x630] ss:$8 sps:$4 sm:$0xff]  }
  0xe6   : > { %3548 = vmatprep.subr.bf16.mxu1 %v4917_v59  ;;  %v4993_v58 = vld [vmem:[%s5663_s10 + $0x730] ss:$8 sps:$4 sm:$0xff]   ;;  %v4998_v59 = vld [vmem:[%s5663_s10 + $0x624] ss:$8 sps:$4 sm:$0xff]  }
  0xe8   : > { %3508 = vmatpush1.bf16.msra.mxu0 %v4912_v60  ;;  %v5001_v60 = vld [vmem:[%s5663_s10 + $0x724] ss:$8 sps:$4 sm:$0xff]  }
  0xe9   : > { %3549 = vmatpush1.bf16.msra.mxu1 %v4915_v61  ;;  %3509 = vmatprep.subr.bf16.mxu0 %v4920_v62  ;;  %v4996_v61 = vld [vmem:[%s5663_s10 + $0x620] ss:$8 sps:$4 sm:$0xff]  }
  0xea   : > { %3550 = vmatprep.subr.bf16.mxu1 %v4923_v63  ;;  %v4999_v62 = vld [vmem:[%s5663_s10 + $0x720] ss:$8 sps:$4 sm:$0xff]   ;;  %v5004_v63 = vld [vmem:[%s5663_s10 + $0x614] ss:$8 sps:$4 sm:$0xff]  }
  0xec   : > { %3510 = vmatpush2.bf16.msra.mxu0 %v4918_v0  ;;  %v5007_v0 = vld [vmem:[%s5663_s10 + $0x714] ss:$8 sps:$4 sm:$0xff]  }
  0xed   : > { %3551 = vmatpush2.bf16.msra.mxu1 %v4921_v1  ;;  %3511 = vmatprep.subr.bf16.mxu0 %v4926_v2  ;;  %v5002_v1 = vld [vmem:[%s5663_s10 + $0x610] ss:$8 sps:$4 sm:$0xff]  }
  0xee   : > { %3552 = vmatprep.subr.bf16.mxu1 %v4929_v3  ;;  %v5005_v2 = vld [vmem:[%s5663_s10 + $0x710] ss:$8 sps:$4 sm:$0xff]   ;;  %v5010_v3 = vld [vmem:[%s5663_s10 + $0x604] ss:$8 sps:$4 sm:$0xff]  }
  0xf0   : > { %3512 = vmatpush2.bf16.msra.mxu0 %v4924_v4  ;;  %v5013_v4 = vld [vmem:[%s5663_s10 + $0x704] ss:$8 sps:$4 sm:$0xff]  }
  0xf1   : > { %3553 = vmatpush2.bf16.msra.mxu1 %v4927_v5  ;;  %3513 = vmatprep.subr.bf16.mxu0 %v4932_v6  ;;  %v5008_v5 = vld [vmem:[%s5663_s10 + $0x600] ss:$8 sps:$4 sm:$0xff]  }
  0xf2   : > { %3554 = vmatprep.subr.bf16.mxu1 %v4935_v8  ;;  %v5011_v6 = vld [vmem:[%s5663_s10 + $0x700] ss:$8 sps:$4 sm:$0xff]   ;;  %v5016_v8 = vld [vmem:[%s5663_s10 + $0x6f4] ss:$8 sps:$4 sm:$0xff]  }
  0xf4   : > { %3514 = vmatpush2.bf16.msra.mxu0 %v4930_v9  ;;  %v5019_v9 = vld [vmem:[%s5663_s10 + $0x7f4] ss:$8 sps:$4 sm:$0xff]  }
  0xf5   : > { %3555 = vmatpush2.bf16.msra.mxu1 %v4933_v10  ;;  %3515 = vmatprep.subr.bf16.mxu0 %v4938_v11  ;;  %v5014_v10 = vld [vmem:[%s5663_s10 + $0x6f0] ss:$8 sps:$4 sm:$0xff]  }
  0xf6   : > { %3556 = vmatprep.subr.bf16.mxu1 %v4941_v12  ;;  %v5017_v11 = vld [vmem:[%s5663_s10 + $0x7f0] ss:$8 sps:$4 sm:$0xff]   ;;  %v5022_v12 = vld [vmem:[%s5663_s10 + $0x6e4] ss:$8 sps:$4 sm:$0xff]  }
  0xf8   : > { %3516 = vmatpush2.bf16.msra.mxu0 %v4936_v13  ;;  %v5025_v13 = vld [vmem:[%s5663_s10 + $0x7e4] ss:$8 sps:$4 sm:$0xff]  }
  0xf9   : > { %3557 = vmatpush2.bf16.msra.mxu1 %v4939_v14  ;;  %3517 = vmatprep.subr.bf16.mxu0 %v4944_v15  ;;  %v5020_v14 = vld [vmem:[%s5663_s10 + $0x6e0] ss:$8 sps:$4 sm:$0xff]  }
  0xfa   : > { %3558 = vmatprep.subr.bf16.mxu1 %v4947_v16  ;;  %v5023_v15 = vld [vmem:[%s5663_s10 + $0x7e0] ss:$8 sps:$4 sm:$0xff]   ;;  %v5028_v16 = vld [vmem:[%s5663_s10 + $0x6d4] ss:$8 sps:$4 sm:$0xff]  }
  0xfc   : > { %3518 = vmatpush2.bf16.msra.mxu0 %v4942_v17  ;;  %v5031_v17 = vld [vmem:[%s5663_s10 + $0x7d4] ss:$8 sps:$4 sm:$0xff]  }
  0xfd   : > { %3559 = vmatpush2.bf16.msra.mxu1 %v4945_v18  ;;  %3519 = vmatprep.subr.bf16.mxu0 %v4950_v19  ;;  %v5026_v18 = vld [vmem:[%s5663_s10 + $0x6d0] ss:$8 sps:$4 sm:$0xff]  }
  0xfe   : > { %3560 = vmatprep.subr.bf16.mxu1 %v4953_v20  ;;  %v5029_v19 = vld [vmem:[%s5663_s10 + $0x7d0] ss:$8 sps:$4 sm:$0xff]   ;;  %v5034_v20 = vld [vmem:[%s5663_s10 + $0x6c4] ss:$8 sps:$4 sm:$0xff]  }
 0x100   : > { %3520 = vmatpush2.bf16.msra.mxu0 %v4948_v22  ;;  %v5032_v22 = vld [vmem:[%s5663_s10 + $0x6c0] ss:$8 sps:$4 sm:$0xff]  }
 0x101   : > { %3561 = vmatpush2.bf16.msra.mxu1 %v4951_v23  ;;  %3521 = vmatprep.subr.bf16.mxu0 %v4956_v24  ;;  %v5035_v23 = vld [vmem:[%s5663_s10 + $0x7c0] ss:$8 sps:$4 sm:$0xff]   ;;  %v5040_v24 = vld [vmem:[%s5663_s10 + $0x6b4] ss:$8 sps:$4 sm:$0xff]  }
 0x102   : > { %3562 = vmatprep.subr.bf16.mxu1 %v4959_v25  ;;  %v5043_v25 = vld [vmem:[%s5663_s10 + $0x7b4] ss:$8 sps:$4 sm:$0xff]  }
 0x104   : > { %3522 = vmatpush2.bf16.msra.mxu0 %v4954_v27  ;;  %v5038_v27 = vld [vmem:[%s5663_s10 + $0x6b0] ss:$8 sps:$4 sm:$0xff]  }
 0x105   : > { %3563 = vmatpush2.bf16.msra.mxu1 %v4957_v28  ;;  %3523 = vmatprep.subr.bf16.mxu0 %v4962_v7  ;;  %v5041_v28 = vld [vmem:[%s5663_s10 + $0x7b0] ss:$8 sps:$4 sm:$0xff]   ;;  %v5046_v7 = vld [vmem:[%s5663_s10 + $0x6a4] ss:$8 sps:$4 sm:$0xff]  }
 0x106   : > { %3564 = vmatprep.subr.bf16.mxu1 %v4965_v29  ;;  %v5049_v29 = vld [vmem:[%s5663_s10 + $0x7a4] ss:$8 sps:$4 sm:$0xff]  }
 0x108   : > { %3524 = vmatpush2.bf16.msra.mxu0 %v4960_v33  ;;  %v5047_v33 = vld [vmem:[%s5663_s10 + $0x7a0] ss:$8 sps:$4 sm:$0xff]  }
 0x109   : > { %3565 = vmatpush2.bf16.msra.mxu1 %v4963_v34  ;;  %3575 = vmatprep.subr.bf16.mxu0 %v4968_v35  ;;  %v5052_v34 = vld [vmem:[%s5663_s10 + $0x694] ss:$8 sps:$4 sm:$0xff]  }
 0x10a   : > { %3616 = vmatprep.subr.bf16.mxu1 %v4971_v36  ;;  %v5055_v35 = vld [vmem:[%s5663_s10 + $0x794] ss:$8 sps:$4 sm:$0xff]  }
 0x10b   : > { %3526 = vmatmul.mubr.bf16.vlgmr.msra.gmra.mxu0 %v777_v32  ;;  %v5966_v32 = vld [vmem:[%s5677_s11 + $0x10] sm:$0xff] }
 0x10c   : > { %3567 = vmatmul.mubr.bf16.vlgmr.msra.gmra.mxu1 %v799_v38  ;;  %3576 = vmatpush1.bf16.msra.mxu0 %v4966_v39  ;;  %v5973_v36 = vrot.slane %v5966_v32, %v5728_v50  ;;  %v5053_v38 = vld [vmem:[%s5663_s10 + $0x790] ss:$8 sps:$4 sm:$0xff]   ;;  %v5058_v39 = vld [vmem:[%s5663_s10 + $0x684] ss:$8 sps:$4 sm:$0xff]  }
 0x10d   : > { %3617 = vmatpush1.bf16.msra.mxu1 %v4969_v30  ;;  %3577 = vmatprep.subr.bf16.mxu0 %v4974_v40  ;;  %v5061_v30 = vld [vmem:[%s5663_s10 + $0x784] ss:$8 sps:$4 sm:$0xff]  }
 0x10e   : > { %3618 = vmatprep.subr.bf16.mxu1 %v4977_v41  ;;  %3607 = vmatprep.mubr.bf16.mxu0 %v798_v37  ;;  %v5050_v37 = vld [vmem:[%s5663_s10 + $0x690] ss:$8 sps:$4 sm:$0xff]   ;;  %v818_v40 = vcombine.high %v5973_v36, %v5973_v36  ;;  %v5056_v41 = vld [vmem:[%s5663_s10 + $0x680] ss:$8 sps:$4 sm:$0xff]  }
 0x10f   : > { %3648 = vmatprep.mubr.bf16.mxu1 %v802_v42  ;;  %v784_v42 = vrot.slane %v5897_v26, %v5728_v50  ;;  %v5074_v26 = vld [vmem:[%s5663_s10 + $0x964] ss:$8 sps:$4 sm:$0xff]  }
 0x110   : > { %3578 = vmatpush1.bf16.msra.mxu0 %v4972_v43  ;;  %v5059_v43 = vld [vmem:[%s5663_s10 + $0x780] ss:$8 sps:$4 sm:$0xff]  }
 0x111   : > { %3619 = vmatpush1.bf16.msra.mxu1 %v4975_v45  ;;  %3579 = vmatprep.subr.bf16.mxu0 %v4980_v46  ;;  %v5065_v45 = vld [vmem:[%s5663_s10 + $0x874] ss:$8 sps:$4 sm:$0xff]  }
 0x112   : > { %3620 = vmatprep.subr.bf16.mxu1 %v4983_v47  ;;  %v5068_v46 = vld [vmem:[%s5663_s10 + $0x974] ss:$8 sps:$4 sm:$0xff]   ;;  %v840_v47 = vrot.slane %v818_v40, %v5728_v50  ;;  %v5126_v40 = vld [vmem:[%s5663_s10 + $0x9d0] ss:$8 sps:$4 sm:$0xff]  }
 0x114   : > { %3580 = vmatpush1.bf16.msra.mxu0 %v4978_v48  ;;  %v5063_v48 = vld [vmem:[%s5663_s10 + $0x870] ss:$8 sps:$4 sm:$0xff]  }
 0x115   : > { %3621 = vmatpush1.bf16.msra.mxu1 %v4981_v49  ;;  %3581 = vmatprep.subr.bf16.mxu0 %v4986_v51  ;;  %v800_v49 = vcombine.high %v784_v42, %v784_v42  ;;  %v5066_v51 = vld [vmem:[%s5663_s10 + $0x970] ss:$8 sps:$4 sm:$0xff]  }
 0x116   : > { %3622 = vmatprep.subr.bf16.mxu1 %v4989_v52  ;;  %v5071_v52 = vld [vmem:[%s5663_s10 + $0x864] ss:$8 sps:$4 sm:$0xff]  }
 0x118   : > { %3582 = vmatpush1.bf16.msra.mxu0 %v4984_v53  ;;  %v5069_v53 = vld [vmem:[%s5663_s10 + $0x860] ss:$8 sps:$4 sm:$0xff]  }
 0x119   : > { %3623 = vmatpush1.bf16.msra.mxu1 %v4987_v54  ;;  %3583 = vmatprep.subr.bf16.mxu0 %v4992_v55  ;;  %v850_v54 = vcombine.high %v840_v47, %v840_v47 }
 0x11a   : > { %3624 = vmatprep.subr.bf16.mxu1 %v4995_v56 }
 0x11c   : > { %3584 = vmatpush1.bf16.msra.mxu0 %v4990_v57  ;;  %v5072_v57 = vld [vmem:[%s5663_s10 + $0x960] ss:$8 sps:$4 sm:$0xff]  }
 0x11d   : > { %3625 = vmatpush1.bf16.msra.mxu1 %v4993_v58  ;;  %3585 = vmatprep.subr.bf16.mxu0 %v4998_v59  ;;  %v5077_v59 = vld [vmem:[%s5663_s10 + $0x854] ss:$8 sps:$4 sm:$0xff]  }
 0x11e   : > { %3626 = vmatprep.subr.bf16.mxu1 %v5001_v60 }
 0x120   : > { %3586 = vmatpush1.bf16.msra.mxu0 %v4996_v61 }
 0x121   : > { %3627 = vmatpush1.bf16.msra.mxu1 %v4999_v62  ;;  %3587 = vmatprep.subr.bf16.mxu0 %v5004_v63  ;;  %v5080_v62 = vld [vmem:[%s5663_s10 + $0x954] ss:$8 sps:$4 sm:$0xff]  }
 0x122   : > { %3628 = vmatprep.subr.bf16.mxu1 %v5007_v0 }
 0x124   : > { %3588 = vmatpush1.bf16.msra.mxu0 %v5002_v1  ;;  %v5075_v1 = vld [vmem:[%s5663_s10 + $0x850] ss:$8 sps:$4 sm:$0xff]  }
 0x125   : > { %3629 = vmatpush1.bf16.msra.mxu1 %v5005_v2  ;;  %3589 = vmatprep.subr.bf16.mxu0 %v5010_v3  ;;  %v5078_v3 = vld [vmem:[%s5663_s10 + $0x950] ss:$8 sps:$4 sm:$0xff]  }
 0x126   : > { %3630 = vmatprep.subr.bf16.mxu1 %v5013_v4 }
 0x128   : > { %3590 = vmatpush1.bf16.msra.mxu0 %v5008_v5  ;;  %v5083_v5 = vld [vmem:[%s5663_s10 + $0x844] ss:$8 sps:$4 sm:$0xff]  }
 0x129   : > { %3631 = vmatpush1.bf16.msra.mxu1 %v5011_v6  ;;  %3591 = vmatprep.subr.bf16.mxu0 %v5016_v8  ;;  %v5086_v6 = vld [vmem:[%s5663_s10 + $0x944] ss:$8 sps:$4 sm:$0xff]  }
 0x12a   : > { %3632 = vmatprep.subr.bf16.mxu1 %v5019_v9  ;;  %v5081_v9 = vld [vmem:[%s5663_s10 + $0x840] ss:$8 sps:$4 sm:$0xff]  }
 0x12c   : > { %3592 = vmatpush2.bf16.msra.mxu0 %v5014_v10  ;;  %v5084_v10 = vld [vmem:[%s5663_s10 + $0x940] ss:$8 sps:$4 sm:$0xff]  }
 0x12d   : > { %3633 = vmatpush2.bf16.msra.mxu1 %v5017_v11  ;;  %3593 = vmatprep.subr.bf16.mxu0 %v5022_v12  ;;  %v5089_v11 = vld [vmem:[%s5663_s10 + $0x834] ss:$8 sps:$4 sm:$0xff]  }
 0x12e   : > { %3634 = vmatprep.subr.bf16.mxu1 %v5025_v13  ;;  %v5092_v12 = vld [vmem:[%s5663_s10 + $0x934] ss:$8 sps:$4 sm:$0xff]   ;;  %v5087_v13 = vld [vmem:[%s5663_s10 + $0x830] ss:$8 sps:$4 sm:$0xff]  }
 0x130   : > { %3594 = vmatpush2.bf16.msra.mxu0 %v5020_v14  ;;  %v5090_v14 = vld [vmem:[%s5663_s10 + $0x930] ss:$8 sps:$4 sm:$0xff]  }
 0x131   : > { %3635 = vmatpush2.bf16.msra.mxu1 %v5023_v15  ;;  %3595 = vmatprep.subr.bf16.mxu0 %v5028_v16  ;;  %v5095_v15 = vld [vmem:[%s5663_s10 + $0x824] ss:$8 sps:$4 sm:$0xff]  }
 0x132   : > { %3636 = vmatprep.subr.bf16.mxu1 %v5031_v17  ;;  %v5098_v16 = vld [vmem:[%s5663_s10 + $0x924] ss:$8 sps:$4 sm:$0xff]   ;;  %v5093_v17 = vld [vmem:[%s5663_s10 + $0x820] ss:$8 sps:$4 sm:$0xff]  }
 0x134   : > { %3596 = vmatpush2.bf16.msra.mxu0 %v5026_v18  ;;  %v5096_v18 = vld [vmem:[%s5663_s10 + $0x920] ss:$8 sps:$4 sm:$0xff]  }
 0x135   : > { %3637 = vmatpush2.bf16.msra.mxu1 %v5029_v19  ;;  %3597 = vmatprep.subr.bf16.mxu0 %v5034_v20  ;;  %v5101_v19 = vld [vmem:[%s5663_s10 + $0x814] ss:$8 sps:$4 sm:$0xff]  }
 0x136   : > { %3638 = vmatprep.subr.bf16.mxu1 %v5037_v21  ;;  %v5104_v20 = vld [vmem:[%s5663_s10 + $0x914] ss:$8 sps:$4 sm:$0xff]   ;;  %v5099_v21 = vld [vmem:[%s5663_s10 + $0x810] ss:$8 sps:$4 sm:$0xff]  }
 0x138   : > { %3598 = vmatpush2.bf16.msra.mxu0 %v5032_v22  ;;  %v5102_v22 = vld [vmem:[%s5663_s10 + $0x910] ss:$8 sps:$4 sm:$0xff]  }
 0x139   : > { %3639 = vmatpush2.bf16.msra.mxu1 %v5035_v23  ;;  %3599 = vmatprep.subr.bf16.mxu0 %v5040_v24  ;;  %v5107_v23 = vld [vmem:[%s5663_s10 + $0x804] ss:$8 sps:$4 sm:$0xff]  }
 0x13a   : > { %3640 = vmatprep.subr.bf16.mxu1 %v5043_v25  ;;  %v5110_v24 = vld [vmem:[%s5663_s10 + $0x904] ss:$8 sps:$4 sm:$0xff]   ;;  %v5105_v25 = vld [vmem:[%s5663_s10 + $0x800] ss:$8 sps:$4 sm:$0xff]  }
 0x13c   : > { %3600 = vmatpush2.bf16.msra.mxu0 %v5038_v27  ;;  %v5108_v27 = vld [vmem:[%s5663_s10 + $0x900] ss:$8 sps:$4 sm:$0xff]  }
 0x13d   : > { %3641 = vmatpush2.bf16.msra.mxu1 %v5041_v28  ;;  %3601 = vmatprep.subr.bf16.mxu0 %v5046_v7  ;;  %v5113_v28 = vld [vmem:[%s5663_s10 + $0x8f4] ss:$8 sps:$4 sm:$0xff]  }
 0x13e   : > { %3642 = vmatprep.subr.bf16.mxu1 %v5049_v29  ;;  %v5116_v7 = vld [vmem:[%s5663_s10 + $0x9f4] ss:$8 sps:$4 sm:$0xff]   ;;  %v5111_v29 = vld [vmem:[%s5663_s10 + $0x8f0] ss:$8 sps:$4 sm:$0xff]  }
 0x140   : > { %3602 = vmatpush2.bf16.msra.mxu0 %v5044_v31  ;;  %v5114_v31 = vld [vmem:[%s5663_s10 + $0x9f0] ss:$8 sps:$4 sm:$0xff]  }
 0x141   : > { %3643 = vmatpush2.bf16.msra.mxu1 %v5047_v33  ;;  %3603 = vmatprep.subr.bf16.mxu0 %v5052_v34  ;;  %v5119_v33 = vld [vmem:[%s5663_s10 + $0x8e4] ss:$8 sps:$4 sm:$0xff]  }
 0x142   : > { %3644 = vmatprep.subr.bf16.mxu1 %v5055_v35  ;;  %v5122_v34 = vld [vmem:[%s5663_s10 + $0x9e4] ss:$8 sps:$4 sm:$0xff]   ;;  %v5117_v35 = vld [vmem:[%s5663_s10 + $0x8e0] ss:$8 sps:$4 sm:$0xff]  }
 0x144   : > { %3604 = vmatpush2.bf16.msra.mxu0 %v5050_v37  ;;  %v5120_v37 = vld [vmem:[%s5663_s10 + $0x9e0] ss:$8 sps:$4 sm:$0xff]  }
 0x145   : > { %3645 = vmatpush2.bf16.msra.mxu1 %v5053_v38  ;;  %3605 = vmatprep.subr.bf16.mxu0 %v5058_v39  ;;  %v5125_v38 = vld [vmem:[%s5663_s10 + $0x8d4] ss:$8 sps:$4 sm:$0xff]  }
 0x146   : > { %3646 = vmatprep.subr.bf16.mxu1 %v5061_v30  ;;  %v5128_v39 = vld [vmem:[%s5663_s10 + $0x9d4] ss:$8 sps:$4 sm:$0xff]   ;;  %v5123_v30 = vld [vmem:[%s5663_s10 + $0x8d0] ss:$8 sps:$4 sm:$0xff]  }
 0x148   : > { %3606 = vmatpush2.bf16.msra.mxu0 %v5056_v41  ;;  %v5131_v41 = vld [vmem:[%s5663_s10 + $0x8c4] ss:$8 sps:$4 sm:$0xff]  }
 0x149   : > { %3647 = vmatpush2.bf16.msra.mxu1 %v5059_v43  ;;  %3657 = vmatprep.subr.bf16.mxu0 %v5065_v45  ;;  %v5129_v43 = vld [vmem:[%s5663_s10 + $0x8c0] ss:$8 sps:$4 sm:$0xff]  }
 0x14a   : > { %3698 = vmatprep.subr.bf16.mxu1 %v5068_v46  ;;  %v5132_v45 = vld [vmem:[%s5663_s10 + $0x9c0] ss:$8 sps:$4 sm:$0xff]   ;;  %v5137_v46 = vld [vmem:[%s5663_s10 + $0x8b4] ss:$8 sps:$4 sm:$0xff]  }
 0x14b   : > { %v3363_v55 = vpop.f32.mrf.mxu0  ;;  %3608 = vmatmul.mubr.bf16.vlgmr.msra.gmra.mxu0 %v784_v42  ;;  %v5134_v42 = vld [vmem:[%s5663_s10 + $0x9c4] ss:$8 sps:$4 sm:$0xff]  }
 0x14c   : > { %v3404_v56 = vpop.f32.mrf.mxu1  ;;  %3649 = vmatmul.mubr.bf16.vlgmr.msra.gmra.mxu1 %v800_v49  ;;  %3658 = vmatpush1.bf16.msra.mxu0 %v5063_v48  ;;  %v5135_v48 = vld [vmem:[%s5663_s10 + $0x8b0] ss:$8 sps:$4 sm:$0xff]  }
 0x14d   : > { %v5994_v58 = vadd.f32 %v3404_v56, %v3363_v55  ;;  %3699 = vmatpush1.bf16.msra.mxu1 %v5066_v51  ;;  %v3365_v60 = vpop.f32.mrf.mxu0  ;;  %3659 = vmatprep.subr.bf16.mxu0 %v5071_v52  ;;  %v5138_v49 = vld [vmem:[%s5663_s10 + $0x9b0] ss:$8 sps:$4 sm:$0xff]   ;;  %v5143_v51 = vld [vmem:[%s5663_s10 + $0x8a4] ss:$8 sps:$4 sm:$0xff]   ;;  %v5149_v55 = vld [vmem:[%s5663_s10 + $0x894] ss:$8 sps:$4 sm:$0xff]  }
 0x14e   : > { %v3406_v61 = vpop.f32.mrf.mxu1  ;;  %3700 = vmatprep.subr.bf16.mxu1 %v5074_v26  ;;  %3689 = vmatprep.mubr.bf16.mxu0 %v840_v47  ;;  %v5140_v47 = vld [vmem:[%s5663_s10 + $0x9b4] ss:$8 sps:$4 sm:$0xff]   ;;  %v5146_v52 = vld [vmem:[%s5663_s10 + $0x9a4] ss:$8 sps:$4 sm:$0xff]   ;;  %v803_v26 = vcombine.high %v5966_v32, %v5966_v32  ;;  %v5147_v32 = vld [vmem:[%s5663_s10 + $0x890] ss:$8 sps:$4 sm:$0xff]  }
 0x14f   : > { %v5998_v63 = vadd.f32 %v3406_v61, %v3365_v60  ;;  %3730 = vmatprep.mubr.bf16.mxu1 %v850_v54  ;;  %v3367_v0 = vpop.f32.mrf.mxu0  ;;  %v5144_v54 = vld [vmem:[%s5663_s10 + $0x9a0] ss:$8 sps:$4 sm:$0xff]   ;;  %v5152_v56 = vld [vmem:[%s5663_s10 + $0x994] ss:$8 sps:$4 sm:$0xff]   ;;  %v5155_v60 = vld [vmem:[%s5663_s10 + $0x884] ss:$8 sps:$4 sm:$0xff]  }
 0x150   : > { %v3408_v2 = vpop.f32.mrf.mxu1  ;;  %3660 = vmatpush1.bf16.msra.mxu0 %v5069_v53  ;;  %v5141_v53 = vld [vmem:[%s5663_s10 + $0x8a0] ss:$8 sps:$4 sm:$0xff]   ;;  %v5158_v61 = vld [vmem:[%s5663_s10 + $0x984] ss:$8 sps:$4 sm:$0xff]   ;;  %v826_v0 = vrot.slane %v5973_v36, %v5728_v50 }
 0x151   : > { %3701 = vmatpush1.bf16.msra.mxu1 %v5072_v57  ;;  %v3368_v4 = vpop.f32.mrf.mxu0  ;;  %3661 = vmatprep.subr.bf16.mxu0 %v5077_v59  ;;  %v6051_v57 = vrot.slane %v803_v26, %v5728_v50  ;;  %v5150_v59 = vld [vmem:[%s5663_s10 + $0x990] ss:$8 sps:$4 sm:$0xff]   ;;  %v5156_v2 = vld [vmem:[%s5663_s10 + $0x980] ss:$8 sps:$4 sm:$0xff]   ;;  %v5167_v36 = vld [vmem:[%s5663_s10 + $0xa64] ss:$8 sps:$4 sm:$0xff]  }
 0x152   : > { %3702 = vmatprep.subr.bf16.mxu1 %v5080_v62  ;;  %v3409_v8 = vpop.f32.mrf.mxu1  ;;  %v5164_v4 = vld [vmem:[%s5663_s10 + $0xb74] ss:$8 sps:$4 sm:$0xff]  }
 0x153   : > { %v819_v62 = vcombine.high %v6051_v57, %v6051_v57  ;;  %v5159_v8 = vld [vmem:[%s5663_s10 + $0xa70] ss:$8 sps:$4 sm:$0xff]   ;;  %v5212_v26 = vld [vmem:[%s5663_s10 + $0xbf4] ss:$8 sps:$4 sm:$0xff]  }
 0x154   : > { %3662 = vmatpush1.bf16.msra.mxu0 %v5075_v1  ;;  %v5153_v1 = vld [vmem:[%s5663_s10 + $0x880] ss:$8 sps:$4 sm:$0xff]  }
 0x155   : > { %3703 = vmatpush1.bf16.msra.mxu1 %v5078_v3  ;;  %3663 = vmatprep.subr.bf16.mxu0 %v5083_v5  ;;  %v5161_v3 = vld [vmem:[%s5663_s10 + $0xa74] ss:$8 sps:$4 sm:$0xff]   ;;  %v847_v5 = vrot.slane %v819_v62, %v5728_v50  ;;  %v5219_v62 = vld [vmem:[%s5663_s10 + $0xad0] ss:$8 sps:$4 sm:$0xff]  }
 0x156   : > { %3704 = vmatprep.subr.bf16.mxu1 %v5086_v6  ;;  %v848_v6 = vcombine.high %v826_v0, %v826_v0 }
 0x158   : > { %3664 = vmatpush1.bf16.msra.mxu0 %v5081_v9  ;;  %v5162_v9 = vld [vmem:[%s5663_s10 + $0xb70] ss:$8 sps:$4 sm:$0xff]  }
 0x159   : > { %3705 = vmatpush1.bf16.msra.mxu1 %v5084_v10  ;;  %3665 = vmatprep.subr.bf16.mxu0 %v5089_v11  ;;  %v5170_v10 = vld [vmem:[%s5663_s10 + $0xb64] ss:$8 sps:$4 sm:$0xff]   ;;  %v851_v11 = vcombine.high %v847_v5, %v847_v5 }
 0x15a   : > { %3706 = vmatprep.subr.bf16.mxu1 %v5092_v12 }
 0x15c   : > { %3666 = vmatpush1.bf16.msra.mxu0 %v5087_v13 }
 0x15d   : > { %3707 = vmatpush1.bf16.msra.mxu1 %v5090_v14  ;;  %3667 = vmatprep.subr.bf16.mxu0 %v5095_v15  ;;  %v5165_v15 = vld [vmem:[%s5663_s10 + $0xa60] ss:$8 sps:$4 sm:$0xff]  }
 0x15e   : > { %3708 = vmatprep.subr.bf16.mxu1 %v5098_v16  ;;  %v5168_v16 = vld [vmem:[%s5663_s10 + $0xb60] ss:$8 sps:$4 sm:$0xff]  }
 0x160   : > { %3668 = vmatpush1.bf16.msra.mxu0 %v5093_v17 }
 0x161   : > { %3709 = vmatpush1.bf16.msra.mxu1 %v5096_v18  ;;  %3669 = vmatprep.subr.bf16.mxu0 %v5101_v19  ;;  %v5173_v19 = vld [vmem:[%s5663_s10 + $0xa54] ss:$8 sps:$4 sm:$0xff]  }
 0x162   : > { %3710 = vmatprep.subr.bf16.mxu1 %v5104_v20  ;;  %v5176_v20 = vld [vmem:[%s5663_s10 + $0xb54] ss:$8 sps:$4 sm:$0xff]  }
 0x164   : > { %3670 = vmatpush1.bf16.msra.mxu0 %v5099_v21 }
 0x165   : > { %3711 = vmatpush1.bf16.msra.mxu1 %v5102_v22  ;;  %3671 = vmatprep.subr.bf16.mxu0 %v5107_v23 }
 0x166   : > { %3712 = vmatprep.subr.bf16.mxu1 %v5110_v24 }
 0x168   : > { %3672 = vmatpush1.bf16.msra.mxu0 %v5105_v25  ;;  %v5171_v25 = vld [vmem:[%s5663_s10 + $0xa50] ss:$8 sps:$4 sm:$0xff]  }
 0x169   : > { %3713 = vmatpush1.bf16.msra.mxu1 %v5108_v27  ;;  %3673 = vmatprep.subr.bf16.mxu0 %v5113_v28  ;;  %v5174_v27 = vld [vmem:[%s5663_s10 + $0xb50] ss:$8 sps:$4 sm:$0xff]  }
 0x16a   : > { %3714 = vmatprep.subr.bf16.mxu1 %v5116_v7  ;;  %v5182_v7 = vld [vmem:[%s5663_s10 + $0xb44] ss:$8 sps:$4 sm:$0xff]  }
 0x16c   : > { %3674 = vmatpush2.bf16.msra.mxu0 %v5111_v29 }
 0x16d   : > { %3715 = vmatpush2.bf16.msra.mxu1 %v5114_v31  ;;  %3675 = vmatprep.subr.bf16.mxu0 %v5119_v33  ;;  %v5177_v31 = vld [vmem:[%s5663_s10 + $0xa40] ss:$8 sps:$4 sm:$0xff]  }
 0x16e   : > { %3716 = vmatprep.subr.bf16.mxu1 %v5122_v34  ;;  %v5180_v33 = vld [vmem:[%s5663_s10 + $0xb40] ss:$8 sps:$4 sm:$0xff]   ;;  %v5185_v34 = vld [vmem:[%s5663_s10 + $0xa34] ss:$8 sps:$4 sm:$0xff]  }
 0x170   : > { %3676 = vmatpush2.bf16.msra.mxu0 %v5117_v35  ;;  %v5188_v35 = vld [vmem:[%s5663_s10 + $0xb34] ss:$8 sps:$4 sm:$0xff]  }
 0x171   : > { %3717 = vmatpush2.bf16.msra.mxu1 %v5120_v37  ;;  %3677 = vmatprep.subr.bf16.mxu0 %v5125_v38  ;;  %v5183_v37 = vld [vmem:[%s5663_s10 + $0xa30] ss:$8 sps:$4 sm:$0xff]  }
 0x172   : > { %3718 = vmatprep.subr.bf16.mxu1 %v5128_v39  ;;  %v5186_v38 = vld [vmem:[%s5663_s10 + $0xb30] ss:$8 sps:$4 sm:$0xff]   ;;  %v5191_v39 = vld [vmem:[%s5663_s10 + $0xa24] ss:$8 sps:$4 sm:$0xff]  }
 0x174   : > { %3678 = vmatpush2.bf16.msra.mxu0 %v5123_v30  ;;  %v5194_v30 = vld [vmem:[%s5663_s10 + $0xb24] ss:$8 sps:$4 sm:$0xff]  }
 0x175   : > { %3719 = vmatpush2.bf16.msra.mxu1 %v5126_v40  ;;  %3679 = vmatprep.subr.bf16.mxu0 %v5131_v41  ;;  %v5189_v40 = vld [vmem:[%s5663_s10 + $0xa20] ss:$8 sps:$4 sm:$0xff]  }
 0x176   : > { %3720 = vmatprep.subr.bf16.mxu1 %v5134_v42  ;;  %v5192_v41 = vld [vmem:[%s5663_s10 + $0xb20] ss:$8 sps:$4 sm:$0xff]   ;;  %v5197_v42 = vld [vmem:[%s5663_s10 + $0xa14] ss:$8 sps:$4 sm:$0xff]  }
 0x178   : > { %3680 = vmatpush2.bf16.msra.mxu0 %v5129_v43  ;;  %v5200_v43 = vld [vmem:[%s5663_s10 + $0xb14] ss:$8 sps:$4 sm:$0xff]  }
 0x179   : > { %3721 = vmatpush2.bf16.msra.mxu1 %v5132_v45  ;;  %3681 = vmatprep.subr.bf16.mxu0 %v5137_v46  ;;  %v5195_v45 = vld [vmem:[%s5663_s10 + $0xa10] ss:$8 sps:$4 sm:$0xff]  }
 0x17a   : > { %3722 = vmatprep.subr.bf16.mxu1 %v5140_v47  ;;  %v5198_v46 = vld [vmem:[%s5663_s10 + $0xb10] ss:$8 sps:$4 sm:$0xff]   ;;  %v5203_v47 = vld [vmem:[%s5663_s10 + $0xa04] ss:$8 sps:$4 sm:$0xff]  }
 0x17c   : > { %3682 = vmatpush2.bf16.msra.mxu0 %v5135_v48  ;;  %v5206_v48 = vld [vmem:[%s5663_s10 + $0xb04] ss:$8 sps:$4 sm:$0xff]  }
 0x17d   : > { %3723 = vmatpush2.bf16.msra.mxu1 %v5138_v49  ;;  %3683 = vmatprep.subr.bf16.mxu0 %v5143_v51  ;;  %v5201_v49 = vld [vmem:[%s5663_s10 + $0xa00] ss:$8 sps:$4 sm:$0xff]  }
 0x17e   : > { %3724 = vmatprep.subr.bf16.mxu1 %v5146_v52  ;;  %v5204_v51 = vld [vmem:[%s5663_s10 + $0xb00] ss:$8 sps:$4 sm:$0xff]   ;;  %v5209_v52 = vld [vmem:[%s5663_s10 + $0xaf4] ss:$8 sps:$4 sm:$0xff]  }
 0x180   : > { %3684 = vmatpush2.bf16.msra.mxu0 %v5141_v53  ;;  %v5207_v53 = vld [vmem:[%s5663_s10 + $0xaf0] ss:$8 sps:$4 sm:$0xff]  }
 0x181   : > { %3725 = vmatpush2.bf16.msra.mxu1 %v5144_v54  ;;  %3685 = vmatprep.subr.bf16.mxu0 %v5149_v55  ;;  %v5210_v54 = vld [vmem:[%s5663_s10 + $0xbf0] ss:$8 sps:$4 sm:$0xff]   ;;  %v5215_v55 = vld [vmem:[%s5663_s10 + $0xae4] ss:$8 sps:$4 sm:$0xff]  }
 0x182   : > { %3726 = vmatprep.subr.bf16.mxu1 %v5152_v56  ;;  %v5218_v56 = vld [vmem:[%s5663_s10 + $0xbe4] ss:$8 sps:$4 sm:$0xff]  }
 0x184   : > { %3686 = vmatpush2.bf16.msra.mxu0 %v5147_v32  ;;  %v5213_v32 = vld [vmem:[%s5663_s10 + $0xae0] ss:$8 sps:$4 sm:$0xff]  }
 0x185   : > { %3727 = vmatpush2.bf16.msra.mxu1 %v5150_v59  ;;  %3687 = vmatprep.subr.bf16.mxu0 %v5155_v60  ;;  %v5216_v59 = vld [vmem:[%s5663_s10 + $0xbe0] ss:$8 sps:$4 sm:$0xff]   ;;  %v5221_v60 = vld [vmem:[%s5663_s10 + $0xad4] ss:$8 sps:$4 sm:$0xff]  }
 0x186   : > { %3728 = vmatprep.subr.bf16.mxu1 %v5158_v61  ;;  %v5224_v61 = vld [vmem:[%s5663_s10 + $0xbd4] ss:$8 sps:$4 sm:$0xff]  }
 0x188   : > { %3688 = vmatpush2.bf16.msra.mxu0 %v5153_v1  ;;  %v5227_v1 = vld [vmem:[%s5663_s10 + $0xac4] ss:$8 sps:$4 sm:$0xff]  }
 0x189   : > { %3729 = vmatpush2.bf16.msra.mxu1 %v5156_v2  ;;  %3739 = vmatprep.subr.bf16.mxu0 %v5161_v3  ;;  %v5230_v2 = vld [vmem:[%s5663_s10 + $0xbc4] ss:$8 sps:$4 sm:$0xff]   ;;  %v5225_v3 = vld [vmem:[%s5663_s10 + $0xac0] ss:$8 sps:$4 sm:$0xff]  }
 0x18a   : > { %3780 = vmatprep.subr.bf16.mxu1 %v5164_v4  ;;  %v5228_v4 = vld [vmem:[%s5663_s10 + $0xbc0] ss:$8 sps:$4 sm:$0xff]  }
 0x18b   : > { %v3445_v12 = vpop.f32.mrf.mxu0  ;;  %3690 = vmatmul.mubr.bf16.vlgmr.msra.gmra.mxu0 %v826_v0  ;;  %v5222_v0 = vld [vmem:[%s5663_s10 + $0xbd0] ss:$8 sps:$4 sm:$0xff]  }
 0x18c   : > { %v3486_v13 = vpop.f32.mrf.mxu1  ;;  %3731 = vmatmul.mubr.bf16.vlgmr.msra.gmra.mxu1 %v848_v6  ;;  %v3446_v14 = vadd.f32 %v3445_v12, %v5994_v58  ;;  %3740 = vmatpush1.bf16.msra.mxu0 %v5159_v8  ;;  %v5236_v6 = vld [vmem:[%s5663_s10 + $0xbb4] ss:$8 sps:$4 sm:$0xff]   ;;  %v5231_v8 = vld [vmem:[%s5663_s10 + $0xab0] ss:$8 sps:$4 sm:$0xff]   ;;  %v5237_v12 = vld [vmem:[%s5663_s10 + $0xaa0] ss:$8 sps:$4 sm:$0xff]  }
 0x18d   : > { %3781 = vmatpush1.bf16.msra.mxu1 %v5162_v9  ;;  %v3447_v17 = vpop.f32.mrf.mxu0  ;;  %3741 = vmatprep.subr.bf16.mxu0 %v5167_v36  ;;  %v5234_v9 = vld [vmem:[%s5663_s10 + $0xbb0] ss:$8 sps:$4 sm:$0xff]   ;;  %v5239_v36 = vld [vmem:[%s5663_s10 + $0xaa4] ss:$8 sps:$4 sm:$0xff]  }
 0x18e   : > { %v3488_v18 = vpop.f32.mrf.mxu1  ;;  %3782 = vmatprep.subr.bf16.mxu1 %v5170_v10  ;;  %v3448_v21 = vadd.f32 %v3447_v17, %v5998_v63  ;;  %v6076_v22 = vadd.f32 %v3486_v13, %v3446_v14  ;;  %3771 = vmatprep.mubr.bf16.mxu0 %v847_v5  ;;  %v5179_v63 = vld [vmem:[%s5663_s10 + $0xa44] ss:$8 sps:$4 sm:$0xff]   ;;  %v5233_v5 = vld [vmem:[%s5663_s10 + $0xab4] ss:$8 sps:$4 sm:$0xff]   ;;  %v5240_v13 = vld [vmem:[%s5663_s10 + $0xba0] ss:$8 sps:$4 sm:$0xff]  }
 0x18f   : > { %3812 = vmatprep.mubr.bf16.mxu1 %v851_v11  ;;  %v3449_v58 = vpop.f32.mrf.mxu0  ;;  %v5242_v10 = vld [vmem:[%s5663_s10 + $0xba4] ss:$8 sps:$4 sm:$0xff]   ;;  %v6125_v11 = vld [vmem:[%s5677_s11 + $0x18] sm:$0x3f] }
 0x190   : > { %v3490_v23 = vpop.f32.mrf.mxu1  ;;  %v6078_v24 = vadd.f32 %v3488_v18, %v3448_v21  ;;  %3742 = vmatpush1.bf16.msra.mxu0 %v5165_v15  ;;  %v5245_v14 = vld [vmem:[%s5663_s10 + $0xa94] ss:$8 sps:$4 sm:$0xff]   ;;  %v5243_v17 = vld [vmem:[%s5663_s10 + $0xa90] ss:$8 sps:$4 sm:$0xff]   ;;  %v833_v58 = vrot.slane %v6051_v57, %v5728_v50  ;;  %v5264_v57 = vld [vmem:[%s5663_s10 + $0xc64] ss:$8 sps:$4 sm:$0xff]  }
 0x191   : > { %3783 = vmatpush1.bf16.msra.mxu1 %v5168_v16  ;;  %v3450_v28 = vpop.f32.mrf.mxu0  ;;  %3743 = vmatprep.subr.bf16.mxu0 %v5173_v19  ;;  %v5248_v15 = vld [vmem:[%s5663_s10 + $0xb94] ss:$8 sps:$4 sm:$0xff]   ;;  %v6133_v16 = vrot.slane %v6125_v11, %v5728_v50  ;;  %v5246_v18 = vld [vmem:[%s5663_s10 + $0xb90] ss:$8 sps:$4 sm:$0xff]   ;;  %v5251_v19 = vld [vmem:[%s5663_s10 + $0xa84] ss:$8 sps:$4 sm:$0xff]  }
 0x192   : > { %3784 = vmatprep.subr.bf16.mxu1 %v5176_v20  ;;  %v3491_v29 = vpop.f32.mrf.mxu1  ;;  %v5254_v20 = vld [vmem:[%s5663_s10 + $0xb84] ss:$8 sps:$4 sm:$0xff]   ;;  %v5249_v23 = vld [vmem:[%s5663_s10 + $0xa80] ss:$8 sps:$4 sm:$0xff]   ;;  %v5261_v28 = vld [vmem:[%s5663_s10 + $0xd74] ss:$8 sps:$4 sm:$0xff]  }
 0x193   : > { %v867_v21 = vcombine.high %v6133_v16, %v6133_v16  ;;  %v5256_v29 = vld [vmem:[%s5663_s10 + $0xc70] ss:$8 sps:$4 sm:$0xff]  }
 0x194   : > { %3744 = vmatpush1.bf16.msra.mxu0 %v5171_v25  ;;  %v5252_v25 = vld [vmem:[%s5663_s10 + $0xb80] ss:$8 sps:$4 sm:$0xff]  }
 0x195   : > { %3785 = vmatpush1.bf16.msra.mxu1 %v5174_v27  ;;  %3745 = vmatprep.subr.bf16.mxu0 %v5179_v63  ;;  %v5258_v27 = vld [vmem:[%s5663_s10 + $0xc74] ss:$8 sps:$4 sm:$0xff]   ;;  %v889_v63 = vrot.slane %v867_v21, %v5728_v50 }
 0x196   : > { %3786 = vmatprep.subr.bf16.mxu1 %v5182_v7  ;;  %v849_v7 = vcombine.high %v833_v58, %v833_v58  ;;  %v5321_v21 = vld [vmem:[%s5663_s10 + $0xdd4] ss:$8 sps:$4 sm:$0xff]  }
 0x198   : > { %3746 = vmatpush1.bf16.msra.mxu0 %v5177_v31  ;;  %v5259_v31 = vld [vmem:[%s5663_s10 + $0xd70] ss:$8 sps:$4 sm:$0xff]  }
 0x199   : > { %3787 = vmatpush1.bf16.msra.mxu1 %v5180_v33  ;;  %3747 = vmatprep.subr.bf16.mxu0 %v5185_v34  ;;  %v5267_v33 = vld [vmem:[%s5663_s10 + $0xd64] ss:$8 sps:$4 sm:$0xff]   ;;  %v898_v34 = vcombine.high %v889_v63, %v889_v63 }
 0x19a   : > { %3788 = vmatprep.subr.bf16.mxu1 %v5188_v35 }
 0x19c   : > { %3748 = vmatpush1.bf16.msra.mxu0 %v5183_v37 }
 0x19d   : > { %3789 = vmatpush1.bf16.msra.mxu1 %v5186_v38  ;;  %3749 = vmatprep.subr.bf16.mxu0 %v5191_v39  ;;  %v5262_v39 = vld [vmem:[%s5663_s10 + $0xc60] ss:$8 sps:$4 sm:$0xff]  }
 0x19e   : > { %3790 = vmatprep.subr.bf16.mxu1 %v5194_v30  ;;  %v5265_v30 = vld [vmem:[%s5663_s10 + $0xd60] ss:$8 sps:$4 sm:$0xff]  }
 0x1a0   : > { %3750 = vmatpush1.bf16.msra.mxu0 %v5189_v40 }
 0x1a1   : > { %3791 = vmatpush1.bf16.msra.mxu1 %v5192_v41  ;;  %3751 = vmatprep.subr.bf16.mxu0 %v5197_v42  ;;  %v5270_v42 = vld [vmem:[%s5663_s10 + $0xc54] ss:$8 sps:$4 sm:$0xff]  }
 0x1a2   : > { %3792 = vmatprep.subr.bf16.mxu1 %v5200_v43  ;;  %v5273_v43 = vld [vmem:[%s5663_s10 + $0xd54] ss:$8 sps:$4 sm:$0xff]  }
 0x1a4   : > { %3752 = vmatpush1.bf16.msra.mxu0 %v5195_v45 }
 0x1a5   : > { %3793 = vmatpush1.bf16.msra.mxu1 %v5198_v46  ;;  %3753 = vmatprep.subr.bf16.mxu0 %v5203_v47 }
 0x1a6   : > { %3794 = vmatprep.subr.bf16.mxu1 %v5206_v48 }
 0x1a8   : > { %3754 = vmatpush1.bf16.msra.mxu0 %v5201_v49  ;;  %v5268_v49 = vld [vmem:[%s5663_s10 + $0xc50] ss:$8 sps:$4 sm:$0xff]  }
 0x1a9   : > { %3795 = vmatpush1.bf16.msra.mxu1 %v5204_v51  ;;  %3755 = vmatprep.subr.bf16.mxu0 %v5209_v52  ;;  %v5271_v51 = vld [vmem:[%s5663_s10 + $0xd50] ss:$8 sps:$4 sm:$0xff]  }
 0x1aa   : > { %3796 = vmatprep.subr.bf16.mxu1 %v5212_v26  ;;  %v5279_v26 = vld [vmem:[%s5663_s10 + $0xd44] ss:$8 sps:$4 sm:$0xff]  }
 0x1ac   : > { %3756 = vmatpush2.bf16.msra.mxu0 %v5207_v53 }
 0x1ad   : > { %3797 = vmatpush2.bf16.msra.mxu1 %v5210_v54  ;;  %3757 = vmatprep.subr.bf16.mxu0 %v5215_v55  ;;  %v5274_v54 = vld [vmem:[%s5663_s10 + $0xc40] ss:$8 sps:$4 sm:$0xff]  }
 0x1ae   : > { %3798 = vmatprep.subr.bf16.mxu1 %v5218_v56  ;;  %v5277_v55 = vld [vmem:[%s5663_s10 + $0xd40] ss:$8 sps:$4 sm:$0xff]   ;;  %v5282_v56 = vld [vmem:[%s5663_s10 + $0xc34] ss:$8 sps:$4 sm:$0xff]  }
 0x1b0   : > { %3758 = vmatpush2.bf16.msra.mxu0 %v5213_v32  ;;  %v5285_v32 = vld [vmem:[%s5663_s10 + $0xd34] ss:$8 sps:$4 sm:$0xff]  }
 0x1b1   : > { %3799 = vmatpush2.bf16.msra.mxu1 %v5216_v59  ;;  %3759 = vmatprep.subr.bf16.mxu0 %v5221_v60  ;;  %v5280_v59 = vld [vmem:[%s5663_s10 + $0xc30] ss:$8 sps:$4 sm:$0xff]  }
 0x1b2   : > { %3800 = vmatprep.subr.bf16.mxu1 %v5224_v61  ;;  %v5283_v60 = vld [vmem:[%s5663_s10 + $0xd30] ss:$8 sps:$4 sm:$0xff]   ;;  %v5288_v61 = vld [vmem:[%s5663_s10 + $0xc24] ss:$8 sps:$4 sm:$0xff]  }
 0x1b4   : > { %3760 = vmatpush2.bf16.msra.mxu0 %v5219_v62  ;;  %v5291_v62 = vld [vmem:[%s5663_s10 + $0xd24] ss:$8 sps:$4 sm:$0xff]  }
 0x1b5   : > { %3801 = vmatpush2.bf16.msra.mxu1 %v5222_v0  ;;  %3761 = vmatprep.subr.bf16.mxu0 %v5227_v1  ;;  %v5286_v0 = vld [vmem:[%s5663_s10 + $0xc20] ss:$8 sps:$4 sm:$0xff]  }
 0x1b6   : > { %3802 = vmatprep.subr.bf16.mxu1 %v5230_v2  ;;  %v5289_v1 = vld [vmem:[%s5663_s10 + $0xd20] ss:$8 sps:$4 sm:$0xff]   ;;  %v5294_v2 = vld [vmem:[%s5663_s10 + $0xc14] ss:$8 sps:$4 sm:$0xff]  }
 0x1b8   : > { %3762 = vmatpush2.bf16.msra.mxu0 %v5225_v3  ;;  %v5297_v3 = vld [vmem:[%s5663_s10 + $0xd14] ss:$8 sps:$4 sm:$0xff]  }
 0x1b9   : > { %3803 = vmatpush2.bf16.msra.mxu1 %v5228_v4  ;;  %3763 = vmatprep.subr.bf16.mxu0 %v5233_v5  ;;  %v5292_v4 = vld [vmem:[%s5663_s10 + $0xc10] ss:$8 sps:$4 sm:$0xff]  }
 0x1ba   : > { %3804 = vmatprep.subr.bf16.mxu1 %v5236_v6  ;;  %v5295_v5 = vld [vmem:[%s5663_s10 + $0xd10] ss:$8 sps:$4 sm:$0xff]   ;;  %v5300_v6 = vld [vmem:[%s5663_s10 + $0xc04] ss:$8 sps:$4 sm:$0xff]  }
 0x1bc   : > { %3764 = vmatpush2.bf16.msra.mxu0 %v5231_v8  ;;  %v5303_v8 = vld [vmem:[%s5663_s10 + $0xd04] ss:$8 sps:$4 sm:$0xff]  }
 0x1bd   : > { %3805 = vmatpush2.bf16.msra.mxu1 %v5234_v9  ;;  %3765 = vmatprep.subr.bf16.mxu0 %v5239_v36  ;;  %v5298_v9 = vld [vmem:[%s5663_s10 + $0xc00] ss:$8 sps:$4 sm:$0xff]  }
 0x1be   : > { %3806 = vmatprep.subr.bf16.mxu1 %v5242_v10  ;;  %v5301_v36 = vld [vmem:[%s5663_s10 + $0xd00] ss:$8 sps:$4 sm:$0xff]   ;;  %v5306_v10 = vld [vmem:[%s5663_s10 + $0xcf4] ss:$8 sps:$4 sm:$0xff]  }
 0x1c0   : > { %3766 = vmatpush2.bf16.msra.mxu0 %v5237_v12  ;;  %v5309_v12 = vld [vmem:[%s5663_s10 + $0xdf4] ss:$8 sps:$4 sm:$0xff]  }
 0x1c1   : > { %3807 = vmatpush2.bf16.msra.mxu1 %v5240_v13  ;;  %3767 = vmatprep.subr.bf16.mxu0 %v5245_v14  ;;  %v5304_v13 = vld [vmem:[%s5663_s10 + $0xcf0] ss:$8 sps:$4 sm:$0xff]  }
 0x1c2   : > { %3808 = vmatprep.subr.bf16.mxu1 %v5248_v15  ;;  %v5307_v14 = vld [vmem:[%s5663_s10 + $0xdf0] ss:$8 sps:$4 sm:$0xff]   ;;  %v5312_v15 = vld [vmem:[%s5663_s10 + $0xce4] ss:$8 sps:$4 sm:$0xff]  }
 0x1c4   : > { %3768 = vmatpush2.bf16.msra.mxu0 %v5243_v17  ;;  %v5315_v17 = vld [vmem:[%s5663_s10 + $0xde4] ss:$8 sps:$4 sm:$0xff]  }
 0x1c5   : > { %3809 = vmatpush2.bf16.msra.mxu1 %v5246_v18  ;;  %3769 = vmatprep.subr.bf16.mxu0 %v5251_v19  ;;  %v5310_v18 = vld [vmem:[%s5663_s10 + $0xce0] ss:$8 sps:$4 sm:$0xff]  }
 0x1c6   : > { %3810 = vmatprep.subr.bf16.mxu1 %v5254_v20  ;;  %v5313_v19 = vld [vmem:[%s5663_s10 + $0xde0] ss:$8 sps:$4 sm:$0xff]   ;;  %v5318_v20 = vld [vmem:[%s5663_s10 + $0xcd4] ss:$8 sps:$4 sm:$0xff]  }
 0x1c8   : > { %3770 = vmatpush2.bf16.msra.mxu0 %v5249_v23  ;;  %v5319_v23 = vld [vmem:[%s5663_s10 + $0xdd0] ss:$8 sps:$4 sm:$0xff]  }
 0x1c9   : > { %3811 = vmatpush2.bf16.msra.mxu1 %v5252_v25  ;;  %3821 = vmatprep.subr.bf16.mxu0 %v5258_v27  ;;  %v5324_v25 = vld [vmem:[%s5663_s10 + $0xcc4] ss:$8 sps:$4 sm:$0xff]  }
 0x1ca   : > { %3862 = vmatprep.subr.bf16.mxu1 %v5261_v28  ;;  %v5327_v27 = vld [vmem:[%s5663_s10 + $0xdc4] ss:$8 sps:$4 sm:$0xff]   ;;  %v5322_v28 = vld [vmem:[%s5663_s10 + $0xcc0] ss:$8 sps:$4 sm:$0xff]  }
 0x1cb   : > { %v3527_v35 = vpop.f32.mrf.mxu0  ;;  %3772 = vmatmul.mubr.bf16.vlgmr.msra.gmra.mxu0 %v833_v58  ;;  %v5316_v58 = vld [vmem:[%s5663_s10 + $0xcd0] ss:$8 sps:$4 sm:$0xff]  }
 0x1cc   : > { %v3568_v37 = vpop.f32.mrf.mxu1  ;;  %3813 = vmatmul.mubr.bf16.vlgmr.msra.gmra.mxu1 %v849_v7  ;;  %v3528_v38 = vadd.f32 %v3527_v35, %v6076_v22  ;;  %3822 = vmatpush1.bf16.msra.mxu0 %v5256_v29  ;;  %v5330_v7 = vld [vmem:[%s5663_s10 + $0xcb4] ss:$8 sps:$4 sm:$0xff]   ;;  %v5334_v35 = vld [vmem:[%s5663_s10 + $0xca0] ss:$8 sps:$4 sm:$0xff]  }
 0x1cd   : > { %3863 = vmatpush1.bf16.msra.mxu1 %v5259_v31  ;;  %v3529_v40 = vpop.f32.mrf.mxu0  ;;  %3823 = vmatprep.subr.bf16.mxu0 %v5264_v57  ;;  %v5333_v29 = vld [vmem:[%s5663_s10 + $0xdb4] ss:$8 sps:$4 sm:$0xff]   ;;  %v5328_v31 = vld [vmem:[%s5663_s10 + $0xcb0] ss:$8 sps:$4 sm:$0xff]  }
 0x1ce   : > { %v3570_v41 = vpop.f32.mrf.mxu1  ;;  %3864 = vmatprep.subr.bf16.mxu1 %v5267_v33  ;;  %v3530_v45 = vadd.f32 %v3529_v40, %v6078_v24  ;;  %v6158_v46 = vadd.f32 %v3568_v37, %v3528_v38  ;;  %3853 = vmatprep.mubr.bf16.mxu0 %v889_v63  ;;  %v5276_v24 = vld [vmem:[%s5663_s10 + $0xc44] ss:$8 sps:$4 sm:$0xff]   ;;  %v5325_v63 = vld [vmem:[%s5663_s10 + $0xdc0] ss:$8 sps:$4 sm:$0xff]   ;;  %v5331_v57 = vld [vmem:[%s5663_s10 + $0xdb0] ss:$8 sps:$4 sm:$0xff]   ;;  %v852_v38 = vcombine.high %v6125_v11, %v6125_v11 }
 0x1cf   : > { %3894 = vmatprep.mubr.bf16.mxu1 %v898_v34  ;;  %v3531_v22 = vpop.f32.mrf.mxu0  ;;  %v5336_v33 = vld [vmem:[%s5663_s10 + $0xca4] ss:$8 sps:$4 sm:$0xff]   ;;  %v5337_v37 = vld [vmem:[%s5663_s10 + $0xda0] ss:$8 sps:$4 sm:$0xff]   ;;  %v5340_v40 = vld [vmem:[%s5663_s10 + $0xc90] ss:$8 sps:$4 sm:$0xff]   ;;  %v875_v11 = vrot.slane %v6133_v16, %v5728_v50 }
 0x1d0   : > { %v3572_v47 = vpop.f32.mrf.mxu1  ;;  %v6160_v48 = vadd.f32 %v3570_v41, %v3530_v45  ;;  %3824 = vmatpush1.bf16.msra.mxu0 %v5262_v39  ;;  %v5339_v34 = vld [vmem:[%s5663_s10 + $0xda4] ss:$8 sps:$4 sm:$0xff]   ;;  %v5342_v39 = vld [vmem:[%s5663_s10 + $0xc94] ss:$8 sps:$4 sm:$0xff]   ;;  %v5343_v41 = vld [vmem:[%s5663_s10 + $0xd90] ss:$8 sps:$4 sm:$0xff]  }
 0x1d1   : > { %3865 = vmatpush1.bf16.msra.mxu1 %v5265_v30  ;;  %v3532_v52 = vpop.f32.mrf.mxu0  ;;  %3825 = vmatprep.subr.bf16.mxu0 %v5270_v42  ;;  %v5345_v30 = vld [vmem:[%s5663_s10 + $0xd94] ss:$8 sps:$4 sm:$0xff]   ;;  %v6215_v42 = vrot.slane %v852_v38, %v5728_v50  ;;  %v5351_v45 = vld [vmem:[%s5663_s10 + $0xd84] ss:$8 sps:$4 sm:$0xff]   ;;  %v5346_v22 = vld [vmem:[%s5663_s10 + $0xc80] ss:$8 sps:$4 sm:$0xff]  }
 0x1d2   : > { %3866 = vmatprep.subr.bf16.mxu1 %v5273_v43  ;;  %v3573_v53 = vpop.f32.mrf.mxu1  ;;  %v5348_v43 = vld [vmem:[%s5663_s10 + $0xc84] ss:$8 sps:$4 sm:$0xff]   ;;  %v5349_v47 = vld [vmem:[%s5663_s10 + $0xd80] ss:$8 sps:$4 sm:$0xff]   ;;  %v897_v52 = vcombine.high %v875_v11, %v875_v11 }
 0x1d3   : > { %v5357_v16 = vld [vmem:[%s5663_s10 + $0xe64] ss:$8 sps:$4 sm:$0xff]  }
 0x1d4   : > { %3826 = vmatpush1.bf16.msra.mxu0 %v5268_v49  ;;  %v868_v49 = vcombine.high %v6215_v42, %v6215_v42 }
 0x1d5   : > { %3867 = vmatpush1.bf16.msra.mxu1 %v5271_v51  ;;  %3827 = vmatprep.subr.bf16.mxu0 %v5276_v24  ;;  %v5354_v51 = vld [vmem:[%s5663_s10 + $0xe74] ss:$8 sps:$4 sm:$0xff]   ;;  %v5352_v24 = vld [vmem:[%s5663_s10 + $0xe70] ss:$8 sps:$4 sm:$0xff]  }
 0x1d6   : > { %3868 = vmatprep.subr.bf16.mxu1 %v5279_v26  ;;  %v896_v26 = vrot.slane %v868_v49, %v5728_v50 }
 0x1d8   : > { %3828 = vmatpush1.bf16.msra.mxu0 %v5274_v54 }
 0x1d9   : > { %3869 = vmatpush1.bf16.msra.mxu1 %v5277_v55  ;;  %3829 = vmatprep.subr.bf16.mxu0 %v5282_v56  ;;  %v5355_v56 = vld [vmem:[%s5663_s10 + $0xe60] ss:$8 sps:$4 sm:$0xff]  }
 0x1da   : > { %3870 = vmatprep.subr.bf16.mxu1 %v5285_v32 }
 0x1dc   : > { %3830 = vmatpush1.bf16.msra.mxu0 %v5280_v59 }
 0x1dd   : > { %3871 = vmatpush1.bf16.msra.mxu1 %v5283_v60  ;;  %3831 = vmatprep.subr.bf16.mxu0 %v5288_v61  ;;  %v5360_v60 = vld [vmem:[%s5663_s10 + $0xe54] ss:$8 sps:$4 sm:$0xff]  }
 0x1de   : > { %3872 = vmatprep.subr.bf16.mxu1 %v5291_v62 }
 0x1e0   : > { %3832 = vmatpush1.bf16.msra.mxu0 %v5286_v0 }
 0x1e1   : > { %3873 = vmatpush1.bf16.msra.mxu1 %v5289_v1  ;;  %3833 = vmatprep.subr.bf16.mxu0 %v5294_v2 }
 0x1e2   : > { %3874 = vmatprep.subr.bf16.mxu1 %v5297_v3 }
 0x1e4   : > { %3834 = vmatpush1.bf16.msra.mxu0 %v5292_v4  ;;  %v5363_v4 = vld [vmem:[%s5663_s10 + $0xe44] ss:$8 sps:$4 sm:$0xff]  }
 0x1e5   : > { %3875 = vmatpush1.bf16.msra.mxu1 %v5295_v5  ;;  %3835 = vmatprep.subr.bf16.mxu0 %v5300_v6  ;;  %v5366_v6 = vld [vmem:[%s5663_s10 + $0xe34] ss:$8 sps:$4 sm:$0xff]  }
 0x1e6   : > { %3876 = vmatprep.subr.bf16.mxu1 %v5303_v8  ;;  %v5364_v8 = vld [vmem:[%s5663_s10 + $0xe30] ss:$8 sps:$4 sm:$0xff]  }
 0x1e8   : > { %3836 = vmatpush1.bf16.msra.mxu0 %v5298_v9  ;;  %v5369_v9 = vld [vmem:[%s5663_s10 + $0xe24] ss:$8 sps:$4 sm:$0xff]  }
 0x1e9   : > { %3877 = vmatpush1.bf16.msra.mxu1 %v5301_v36  ;;  %3837 = vmatprep.subr.bf16.mxu0 %v5306_v10  ;;  %v5367_v36 = vld [vmem:[%s5663_s10 + $0xe20] ss:$8 sps:$4 sm:$0xff]   ;;  %v5372_v10 = vld [vmem:[%s5663_s10 + $0xe14] ss:$8 sps:$4 sm:$0xff]  }
 0x1ea   : > { %3878 = vmatprep.subr.bf16.mxu1 %v5309_v12  ;;  %v5370_v12 = vld [vmem:[%s5663_s10 + $0xe10] ss:$8 sps:$4 sm:$0xff]  }
 0x1ec   : > { %3838 = vmatpush2.bf16.msra.mxu0 %v5304_v13  ;;  %v5375_v13 = vld [vmem:[%s5663_s10 + $0xe04] ss:$8 sps:$4 sm:$0xff]  }
 0x1ed   : > { %3879 = vmatpush2.bf16.msra.mxu1 %v5307_v14  ;;  %3839 = vmatprep.subr.bf16.mxu0 %v5312_v15  ;;  %v5373_v14 = vld [vmem:[%s5663_s10 + $0xe00] ss:$8 sps:$4 sm:$0xff]   ;;  %v5378_v15 = vld [vmem:[%s5663_s10 + $0xef4] ss:$8 sps:$4 sm:$0xff]  }
 0x1ee   : > { %3880 = vmatprep.subr.bf16.mxu1 %v5315_v17  ;;  %v5376_v17 = vld [vmem:[%s5663_s10 + $0xef0] ss:$8 sps:$4 sm:$0xff]  }
 0x1f0   : > { %3840 = vmatpush2.bf16.msra.mxu0 %v5310_v18  ;;  %v5381_v18 = vld [vmem:[%s5663_s10 + $0xee4] ss:$8 sps:$4 sm:$0xff]  }
 0x1f1   : > { %3881 = vmatpush2.bf16.msra.mxu1 %v5313_v19  ;;  %3841 = vmatprep.subr.bf16.mxu0 %v5318_v20  ;;  %v5379_v19 = vld [vmem:[%s5663_s10 + $0xee0] ss:$8 sps:$4 sm:$0xff]   ;;  %v5384_v20 = vld [vmem:[%s5663_s10 + $0xed4] ss:$8 sps:$4 sm:$0xff]  }
 0x1f2   : > { %3882 = vmatprep.subr.bf16.mxu1 %v5321_v21  ;;  %v5382_v21 = vld [vmem:[%s5663_s10 + $0xed0] ss:$8 sps:$4 sm:$0xff]  }
 0x1f4   : > { %3842 = vmatpush2.bf16.msra.mxu0 %v5316_v58  ;;  %v5387_v58 = vld [vmem:[%s5663_s10 + $0xec4] ss:$8 sps:$4 sm:$0xff]  }
 0x1f5   : > { %3883 = vmatpush2.bf16.msra.mxu1 %v5319_v23  ;;  %3843 = vmatprep.subr.bf16.mxu0 %v5324_v25  ;;  %v5385_v23 = vld [vmem:[%s5663_s10 + $0xec0] ss:$8 sps:$4 sm:$0xff]   ;;  %v5390_v25 = vld [vmem:[%s5663_s10 + $0xeb4] ss:$8 sps:$4 sm:$0xff]  }
 0x1f6   : > { %3884 = vmatprep.subr.bf16.mxu1 %v5327_v27  ;;  %v5388_v27 = vld [vmem:[%s5663_s10 + $0xeb0] ss:$8 sps:$4 sm:$0xff]  }
 0x1f8   : > { %3844 = vmatpush2.bf16.msra.mxu0 %v5322_v28  ;;  %v5393_v28 = vld [vmem:[%s5663_s10 + $0xea4] ss:$8 sps:$4 sm:$0xff]  }
 0x1f9   : > { %3885 = vmatpush2.bf16.msra.mxu1 %v5325_v63  ;;  %3845 = vmatprep.subr.bf16.mxu0 %v5330_v7  ;;  %v5391_v63 = vld [vmem:[%s5663_s10 + $0xea0] ss:$8 sps:$4 sm:$0xff]   ;;  %v5396_v7 = vld [vmem:[%s5663_s10 + $0xe94] ss:$8 sps:$4 sm:$0xff]  }
 0x1fa   : > { %3886 = vmatprep.subr.bf16.mxu1 %v5333_v29  ;;  %v5394_v29 = vld [vmem:[%s5663_s10 + $0xe90] ss:$8 sps:$4 sm:$0xff]  }
 0x1fc   : > { %3846 = vmatpush2.bf16.msra.mxu0 %v5328_v31  ;;  %v5399_v31 = vld [vmem:[%s5663_s10 + $0xe84] ss:$8 sps:$4 sm:$0xff]  }
 0x1fd   : > { %3887 = vmatpush2.bf16.msra.mxu1 %v5331_v57  ;;  %3847 = vmatprep.subr.bf16.mxu0 %v5336_v33  ;;  %v5397_v57 = vld [vmem:[%s5663_s10 + $0xe80] ss:$8 sps:$4 sm:$0xff]   ;;  %v882_v33 = vrot.slane %v6215_v42, %v5728_v50 }
 0x1fe   : > { %3888 = vmatprep.subr.bf16.mxu1 %v5339_v34 }
 0x200   : > { %3848 = vmatpush2.bf16.msra.mxu0 %v5334_v35 }
 0x201   : > { %3889 = vmatpush2.bf16.msra.mxu1 %v5337_v37  ;;  %3849 = vmatprep.subr.bf16.mxu0 %v5342_v39 }
 0x202   : > { %3890 = vmatprep.subr.bf16.mxu1 %v5345_v30 }
 0x204   : > { %3850 = vmatpush2.bf16.msra.mxu0 %v5340_v40 }
 0x205   : > { %3891 = vmatpush2.bf16.msra.mxu1 %v5343_v41  ;;  %3851 = vmatprep.subr.bf16.mxu0 %v5348_v43 }
 0x206   : > { %3892 = vmatprep.subr.bf16.mxu1 %v5351_v45 }
 0x208   : > { %3852 = vmatpush2.bf16.msra.mxu0 %v5346_v22 }
 0x209   : > { %3893 = vmatpush2.bf16.msra.mxu1 %v5349_v47  ;;  %3903 = vmatprep.subr.bf16.mxu0 %v5354_v51 }
 0x20b   : > { %v3609_v53 = vpop.f32.mrf.mxu0  ;;  %3854 = vmatmul.mubr.bf16.vlgmr.msra.gmra.mxu0 %v875_v11 }
 0x20c   : > { %v3650_v54 = vpop.f32.mrf.mxu1  ;;  %3895 = vmatmul.mubr.bf16.vlgmr.msra.gmra.mxu1 %v897_v52  ;;  %v3610_v55 = vadd.f32 %v3609_v53, %v6158_v46  ;;  %3904 = vmatpush1.bf16.msra.mxu0 %v5352_v24  ;;  %v5358_v46 = vld [vmem:[%s5663_s10 + $0xe50] ss:$8 sps:$4 sm:$0xff]  }
 0x20d   : > { %3935 = vmatprep.mubr.bf16.mxu0 %v896_v26  ;;  %v3611_v32 = vpop.f32.mrf.mxu0  ;;  %3905 = vmatprep.subr.bf16.mxu0 %v5357_v16 }
 0x20e   : > { %v3652_v59 = vpop.f32.mrf.mxu1  ;;  %v3612_v61 = vadd.f32 %v3611_v32, %v6160_v48  ;;  %v6233_v62 = vadd.f32 %v3650_v54, %v3610_v55  ;;  %v5361_v48 = vld [vmem:[%s5663_s10 + $0xe40] ss:$8 sps:$4 sm:$0xff]  }
 0x20f   : > { %v3613_v0 = vpop.f32.mrf.mxu0 }
 0x210   : > { %v3654_v1 = vpop.f32.mrf.mxu1  ;;  %v6235_v2 = vadd.f32 %v3652_v59, %v3612_v61  ;;  %3906 = vmatpush1.bf16.msra.mxu0 %v5355_v56 }
 0x211   : > { %v3614_v3 = vpop.f32.mrf.mxu0  ;;  %3907 = vmatprep.subr.bf16.mxu0 %v5360_v60 }
 0x212   : > { %v3655_v5 = vpop.f32.mrf.mxu1  ;;  %v5533_v3 = vmov 1983009808  }
 0x214   : > { %3908 = vmatpush1.bf16.msra.mxu0 %v5358_v46 }
 0x215   : > { %3909 = vmatprep.subr.bf16.mxu0 %v5363_v4  ;;  %v3948_v4 = vunpack.c.l.s4 %v5533_v3 }
 0x218   : > { %3910 = vmatpush1.bf16.msra.mxu0 %v5361_v48  ;;  %v3949_v48 = vunpack.c.0.s8 %v3948_v4 }
 0x219   : > { %3911 = vmatprep.subr.bf16.mxu0 %v5366_v6 }
 0x21c   : > { %3912 = vmatpush1.bf16.msra.mxu0 %v5364_v8 }
 0x21d   : > { %3913 = vmatprep.subr.bf16.mxu0 %v5369_v9 }
 0x220   : > { %3914 = vmatpush1.bf16.msra.mxu0 %v5367_v36 }
 0x221   : > { %3915 = vmatprep.subr.bf16.mxu0 %v5372_v10 }
 0x224   : > { %3916 = vmatpush1.bf16.msra.mxu0 %v5370_v12  ;;  %v3952_v12 = vsub.s32 %v3949_v48, %v5720_v44 }
 0x225   : > { %3917 = vmatprep.subr.bf16.mxu0 %v5375_v13 }
 0x228   : > { %3918 = vmatpush1.bf16.msra.mxu0 %v5373_v14 }
 0x229   : > { %3919 = vmatprep.subr.bf16.mxu0 %v5378_v15  ;;  %v216_v15 = vld [vmem:[#allocation2] sm:$0xf] }
 0x22c   : > { %3920 = vmatpush2.bf16.msra.mxu0 %v5376_v17 }
 0x22d   : > { %3921 = vmatprep.subr.bf16.mxu0 %v5381_v18 }
 0x230   : > { %3922 = vmatpush2.bf16.msra.mxu0 %v5379_v19 }
 0x231   : > { %3923 = vmatprep.subr.bf16.mxu0 %v5384_v20 }
 0x234   : > { %3924 = vmatpush2.bf16.msra.mxu0 %v5382_v21 }
 0x235   : > { %3925 = vmatprep.subr.bf16.mxu0 %v5387_v58 }
 0x238   : > { %3926 = vmatpush2.bf16.msra.mxu0 %v5385_v23 }
 0x239   : > { %3927 = vmatprep.subr.bf16.mxu0 %v5390_v25 }
 0x23c   : > { %3928 = vmatpush2.bf16.msra.mxu0 %v5388_v27 }
 0x23d   : > { %3929 = vmatprep.subr.bf16.mxu0 %v5393_v28 }
 0x240   : > { %3930 = vmatpush2.bf16.msra.mxu0 %v5391_v63 }
 0x241   : > { %3931 = vmatprep.subr.bf16.mxu0 %v5396_v7 }
 0x244   : > { %3932 = vmatpush2.bf16.msra.mxu0 %v5394_v29 }
 0x245   : > { %3933 = vmatprep.subr.bf16.mxu0 %v5399_v31 }
 0x248   : > { %3934 = vmatpush2.bf16.msra.mxu0 %v5397_v57 }
 0x24b   : > { %v3691_v34 = vpop.f32.mrf.mxu0  ;;  %3936 = vmatmul.mubr.bf16.vlgmr.msra.gmra.mxu0 %v882_v33 }
 0x24c   : > { %v3732_v35 = vpop.f32.mrf.mxu1  ;;  %v3692_v37 = vadd.f32 %v3691_v34, %v6233_v62 }
 0x24d   : > { %v3693_v38 = vpop.f32.mrf.mxu0 }
 0x24e   : > { %v3734_v39 = vpop.f32.mrf.mxu1  ;;  %v3694_v30 = vadd.f32 %v3693_v38, %v6235_v2  ;;  %v3733_v40 = vadd.f32 %v3732_v35, %v3692_v37 }
 0x24f   : > { %v3695_v41 = vpop.f32.mrf.mxu0 }
 0x250   : > { %v3736_v43 = vpop.f32.mrf.mxu1  ;;  %v3735_v45 = vadd.f32 %v3734_v39, %v3694_v30 }
 0x251   : > { %v3696_v11 = vpop.f32.mrf.mxu0 }
 0x252   : > { %v3737_v22 = vpop.f32.mrf.mxu1 }
 0x28b   : > { %v3773_v47 = vpop.f32.mrf.mxu0 }
 0x28c   : > { %v3814_v49 = vpop.f32.mrf.mxu1  ;;  %v3774_v51 = vadd.f32 %v3773_v47, %v3733_v40 }
 0x28d   : > { %v3775_v50 = vpop.f32.mrf.mxu0 }
 0x28e   : > { %v3816_v42 = vpop.f32.mrf.mxu1  ;;  %v3776_v52 = vadd.f32 %v3775_v50, %v3735_v45  ;;  %v3815_v24 = vadd.f32 %v3814_v49, %v3774_v51 }
 0x28f   : > { %v3777_v26 = vpop.f32.mrf.mxu0 }
 0x290   : > { %v3818_v16 = vpop.f32.mrf.mxu1  ;;  %v3817_v53 = vadd.f32 %v3816_v42, %v3776_v52 }
 0x291   : > { %v3778_v54 = vpop.f32.mrf.mxu0 }
 0x292   : > { %v3819_v55 = vpop.f32.mrf.mxu1 }
 0x2cb   : > { %v3855_v56 = vpop.f32.mrf.mxu0 }
 0x2cc   : > { %v3896_v32 = vpop.f32.mrf.mxu1  ;;  %v3856_v59 = vadd.f32 %v3855_v56, %v3815_v24 }
 0x2cd   : > { %v3857_v60 = vpop.f32.mrf.mxu0 }
 0x2ce   : > { %v3898_v61 = vpop.f32.mrf.mxu1  ;;  %v3897_v62 = vadd.f32 %v3896_v32, %v3856_v59  ;;  %v3858_v5 = vadd.f32 %v3857_v60, %v3817_v53 }
 0x2cf   : > { %v3859_v0 = vpop.f32.mrf.mxu0 }
 0x2d0   : > { %v3900_v1 = vpop.f32.mrf.mxu1  ;;  %v3899_v8 = vadd.f32 %v3898_v61, %v3858_v5 }
 0x2d1   : > { %v3860_v2 = vpop.f32.mrf.mxu0 }
 0x2d2   : > { %v3901_v46 = vpop.f32.mrf.mxu1 }
 0x30b   : > { %v3937_v6 = vpop.f32.mrf.mxu0 }
 0x30c   : > { %v3938_v36 = vadd.f32 %v3937_v6, %v3897_v62 }
 0x30d   : > { %v3939_v9 = vpop.f32.mrf.mxu0 }
 0x30e   : > { %v3940_v10 = vadd.f32 %v3939_v9, %v3899_v8 }
 0x30f   : > { %v3941_v13 = vpop.f32.mrf.mxu0 }
 0x310   : > { %v3946_v14 = vcombine.low %v3938_v36, %v3940_v10 }
 0x311   : > { %v3942_v17 = vpop.f32.mrf.mxu0 }
 0x312   : > { %v3953_v18 = vrot.slane %v3946_v14, %v3952_v12  ;;  %3960 = sbr.rel (%p4604_p1) target bundleno = 1130 (0x46a), region = 48 }
 0x314   : > { %v3955_v19 = vadd.f32 %v3953_v18, %v216_v15 }
 0x316   : > { %3956 = vst [vmem:[#allocation2] sm:$0xf] %v3955_v19 }
 0x317   : > { %v3962_v20 = vld [vmem:[#allocation6] sm:$0x3]  ;;  %v3966_v21 = vsub.s32 0, %v5720_v44  ;;  %v3970_v58 = vsub.s32 1, %v5720_v44  ;;  %vm3993_vm0 = vcmask 1041408  }
 0x318   : > { %v5534_v35 = vmov 269488144  }
 0x319   : > { %v3967_v23 = vrot.slane %v3962_v20, %v3966_v21  ;;  %v3971_v25 = vrot.slane %v3962_v20, %v3970_v58  ;;  %v4001_v37 = vunpack.c.l.s4 %v5534_v35 }
 0x31b   : > { %v3972_v27 = vcombine.low %v3967_v23, %v3971_v25  ;;  %v4002_v38 = vunpack.c.0.s8 %v4001_v37 }
 0x31d   : > { %v3961_v28 = vld [vmem:[#allocation2] sm:$0xf]  ;;  %v3979_v63 = vrot.slane %v3972_v27, %v3952_v12  ;;  %v4005_v39 = vsub.s32 %v4002_v38, %v5720_v44 }
 0x31f   : > { %v3981_v7 = vadd.f32 %v3979_v63, %v3961_v28 }
 0x321   : > { %v3989_v29 = vrot.slane %v3981_v7, %v3952_v12 }
 0x323   : > { %v3990_v31 = vcombine.high %v3989_v29, %v3989_v29  ;;  %v3994_v57 = vsel %vm3993_vm0, %v3989_v29, -inf }
 0x325   : > { %v3995_v33 = vsel %vm3993_vm0, %v3990_v31, -inf }
 0x326   : > { %v3996_v34 = vmax.f32 %v3994_v57, %v3995_v33 }
 0x328   : > { %3997 = vmax.xlane.f32.xlu0 %v3996_v34 }
 0x3b1   : > { %v3998_v30 = vpop.xlane.xlu0 %3997 }
 0x3b2   : > { %v4006_v40 = vrot.slane %v3998_v30, %v4005_v39 }
 0x3b4   : > { %v4008_v41 = vsub.f32 %v3981_v7, %v4006_v40 }
 0x3b6   : > { %v4009_v43 = vmul.f32 1.442695, %v4008_v41 }
 0x3b8   : > { %5401 = vpow2.f32 %v4009_v43 }
 0x3c5   : > { %v5402_v45 = vpop.eup %5401 }
 0x3c6   : > { %v4018_v11 = vrot.slane %v5402_v45, %v3952_v12 }
 0x3c8   : > { %v4019_v22 = vcombine.high %v4018_v11, %v4018_v11  ;;  %v4022_v47 = vsel %vm3993_vm0, %v4018_v11, 0.0 }
 0x3ca   : > { %v4023_v49 = vsel %vm3993_vm0, %v4019_v22, 0.0 }
 0x3cb   : > { %v4024_v51 = vadd.f32 %v4023_v49, %v4022_v47 }
 0x3cd   : > { %4025 = vadd.xlane.f32.xlu0 %v4024_v51 }
 0x456   : > { %v4026_v50 = vpop.xlane.xlu0 %4025 }
 0x457   : > { %v4034_v42 = vrot.slane %v4026_v50, %v4005_v39 }
 0x459   : > { %5403 = vrcp.f32 %v4034_v42 }
 0x466   : > { %v5404_v52 = vpop.eup %5403 }
 0x467   : > { %v4037_v24 = vmul.f32 %v5404_v52, %v5402_v45 }
 0x469   : > { %4038 = vst [vmem:[#allocation8] sm:$0xf] %v4037_v24 }
 0x46a PF: > { %p4635_p2 = scmp.eq.s32.totalorder %s5575_s16, 3  ;;  %s5535_s22 = smov [#allocation8]  }
 0x46b   : > { %s4046_s12 = sshll.u32 %s5535_s22, 4  ;;  %s4047_s12 = int_to_ptr.vmem [resolvable:$true] %s4046_s12 }
 0x46c   : > { %s5459_s15 = scalar_lea.vmem %s4047_s12, 64  ;;  %p5466_p11 = scmp.lt.s32.totalorder %s4047_s12, %s4047_s12 }
 0x46d   : > { %p5460_p3 = scmp.ne.s32.totalorder %s4047_s12, %s5459_s15  ;;  %p5467_p4 = scmp.lt.s32.totalorder %s5459_s15, %s5459_s15 }
 0x46f   : > { %p5461_p6 = pnand %p5460_p3, %p4635_p2  ;;  %p5468_p9 = por %p5467_p4, %p5466_p11 }
 0x471   : > { %p5462_p7 = pneg %p5461_p6 }
 0x473   : > { %p5469_p5 = pnand %p5468_p9, %p5462_p7 }
 0x475   : > { %5472 = shalt.err (!%p5469_p5)
}
 0x476   : > { %4621 = dma.vmem_to_hbm [thread:$0]  (%p4635_p2), %s4047_s12, 64, %s6305_s3, [#allocation5]  }
 0x477   : > { %5508 = dma.done.wait (%p4635_p2), [#allocation5], 64  }
 0x478   : > { %5510 = vsyncadd (%p4635_p2), [#allocation5], 4294967232 }
 0x479 PF: > { %p15_p8 = scmp.ge.s32.totalorder %s5578_s17, 6   ;;  %s6319_s12 = smov %s5517_s13 }
 0x47a   : > { %s6320_s13 = smov %s5521_s14  ;;  %s6321_s14 = smov %s5588_s20 }
 0x47b   : > { %s6322_s15 = smov %s5578_s17  ;;  %17 = sbr.rel (!%p15_p8) target bundleno = 5 (0x5), region = 84 }
 0x480   :  { %4059 = vsyncpa [#allocation4], 1 }
 0x481   :  { %4061 = vsyncpa [#allocation4 + $0x1], 1 }
 0x482   :  { %4062 = vsyncpa [#allocation7], 1 }
 0x483   :  { %4063 = vsyncpa [#allocation5], 1 }
 0x484   :  { %4065 = vsyncpa [#allocation5 + $0x1], 1 }

</bundles_post_ra>
